<compile_context>
chip_gen: v5e
topology: v5e:2x2
jax: 0.10.0
libtpu: 0.0.40
codegen_flags: <defaults>
</compile_context>

<pallas_src>
import math

import jax
import jax.numpy as jnp
from jax import lax
from jax.experimental import pallas as pl
from jax.experimental.pallas import tpu as pltpu

NEG_SLOPE = 0.2                       # LeakyReLU slope used throughout
COUT_TILE = 512                       # output-channel tile (multiple of 128)
VMEM_LIMIT_BYTES = 48 * 1024 * 1024   # explicit scoped-VMEM cap (v7x-safe)


def _leaky(x, neg_slope=NEG_SLOPE):
    return jnp.where(x >= 0, x, neg_slope * x)


def _cout_tile(cout):
    assert cout % 128 == 0, cout
    return min(cout, COUT_TILE)


def _compiler_params(n_axes):
    return pltpu.CompilerParams(
        dimension_semantics=("parallel",) * n_axes,
        vmem_limit_bytes=VMEM_LIMIT_BYTES)


def _cost(flops, arrays, out_shapes):
    nbytes = 0
    for a in arrays:
        nbytes += math.prod(a.shape) * jnp.dtype(a.dtype).itemsize
    for s in out_shapes:
        nbytes += math.prod(s.shape) * jnp.dtype(s.dtype).itemsize
    return pl.CostEstimate(flops=int(flops), transcendentals=0,
                           bytes_accessed=int(nbytes))


# ---------------------------------------------------------------------------
# 1x1 conv kernel:  out = x @ W + b  [+ add]  (optionally LeakyReLU)
# Used for embed_spec (+pos) and the folded proj-bias final layer.
# ---------------------------------------------------------------------------
def _make_pointwise_kernel(use_relu, use_add):
    def kernel(*refs):
        if use_add:
            x_ref, w_ref, b_ref, add_ref, o_ref = refs
        else:
            x_ref, w_ref, b_ref, o_ref = refs
            add_ref = None
        acc = jnp.dot(x_ref[0], w_ref[...], preferred_element_type=jnp.float32)
        acc = acc + b_ref[...]
        if use_relu:
            acc = _leaky(acc)
        if use_add:
            acc = acc + add_ref[0].astype(jnp.float32)
        o_ref[0] = acc.astype(o_ref.dtype)
    return kernel


def pointwise_conv(x, w, b, add=None, relu=False, out_dtype=jnp.bfloat16):
    """x: (B, T, C);  w: (C, Cout);  b: (Cout,);  add: None | (1|B, T, Cout)."""
    B, T, C = x.shape
    Cout = w.shape[-1]
    tc = _cout_tile(Cout)
    nj = Cout // tc
    x = x.astype(jnp.bfloat16)
    w = w.astype(jnp.bfloat16)
    b2 = b.reshape(1, Cout).astype(jnp.float32)

    in_specs = [
        pl.BlockSpec((1, T, C), lambda j, i: (i, 0, 0)),
        pl.BlockSpec((C, tc), lambda j, i: (0, j)),
        pl.BlockSpec((1, tc), lambda j, i: (0, j)),
    ]
    args = [x, w, b2]
    if add is not None:
        if add.shape[0] == 1:                       # broadcast over batch (pos)
            add_idx = lambda j, i: (0, 0, j)
        else:
            add_idx = lambda j, i: (i, 0, j)
        in_specs.append(pl.BlockSpec((1, T, tc), add_idx))
        args.append(add)

    out_shape = jax.ShapeDtypeStruct((B, T, Cout), out_dtype)
    return pl.pallas_call(
        _make_pointwise_kernel(relu, add is not None),
        out_shape=out_shape,
        grid=(nj, B),                               # batch fastest: each weight
        in_specs=in_specs,                          # tile is DMA'd exactly once
        out_specs=pl.BlockSpec((1, T, tc), lambda j, i: (i, 0, j)),
        compiler_params=_compiler_params(2),
        cost_estimate=_cost(2 * B * T * C * Cout, args, [out_shape]),
    )(*args)


# ---------------------------------------------------------------------------
# Conv1d(C, C, k=3, s=2, p=1) + LeakyReLU(0.2)     (batch folded into M)
# Input is passed as (M=B*T/2, 2C) (free reshape): lanes [:C] / [C:] hold
# x[2t] / x[2t+1].  The third tap x[2t-1] is obtained by rolling the f32
# accumulator of the x[2t+1]@W0 matmul down one row and zeroing the first row
# of every batch segment (rows % Th == 0) — exact, since a row permutation
# commutes with the matmul.
# ---------------------------------------------------------------------------
def _make_down_kernel(C, Th):
    def kernel(x_ref, w_ref, b_ref, o_ref):
        xv = x_ref[...]                              # (M, 2C) bf16
        xe = xv[:, :C]                               # x[2t]
        xo = xv[:, C:]                               # x[2t+1]
        acc = jnp.dot(xe, w_ref[1], preferred_element_type=jnp.float32)
        acc = acc + jnp.dot(xo, w_ref[2], preferred_element_type=jnp.float32)
        if Th > 1:                                   # x[2t-1] contribution
            y = jnp.dot(xo, w_ref[0], preferred_element_type=jnp.float32)
            rows = lax.broadcasted_iota(jnp.int32, y.shape, 0)
            acc = acc + jnp.where(rows % Th == 0, 0.0,
                                  pltpu.roll(y, shift=1, axis=0))
        # Th == 1: x[2t-1] = x[-1] = 0 for every row -> tap contributes nothing
        acc = acc + b_ref[...]
        o_ref[...] = _leaky(acc).astype(o_ref.dtype)
    return kernel


def down_conv(x, w, b):
    """x: (B, T, C) -> (B, T//2, C).  w: (3, C, C) per-tap (Cin, Cout) bf16."""
    B, T, C = x.shape
    Th = T // 2
    M = B * Th
    tc = _cout_tile(C)
    nj = C // tc
    x2 = x.reshape(M, 2 * C).astype(jnp.bfloat16)              # free reshape
    b2 = b.reshape(1, C).astype(jnp.float32)
    out_shape = jax.ShapeDtypeStruct((M, C), jnp.bfloat16)
    out = pl.pallas_call(
        _make_down_kernel(C, Th),
        out_shape=out_shape,
        grid=(nj,),
        in_specs=[
            pl.BlockSpec((M, 2 * C), lambda j: (0, 0)),
            pl.BlockSpec((3, C, tc), lambda j: (0, 0, j)),
            pl.BlockSpec((1, tc), lambda j: (0, j)),
        ],
        out_specs=pl.BlockSpec((M, tc), lambda j: (0, j)),
        compiler_params=_compiler_params(1),
        cost_estimate=_cost(2 * 3 * M * C * C, [x2, w, b2], [out_shape]),
    )(x2, w, b2)
    return out.reshape(B, Th, C)                                # free reshape


# ---------------------------------------------------------------------------
# ConvTranspose1d(C, C, k=4, s=2, p=1) + LeakyReLU(0.2) [+ skip]
# Batch folded into M; grid = (phase, cout_tile):
#   phase 0 (even): out[2t]   = x[t] @ W1 + x[t-1] @ W3 + b
#   phase 1 (odd) : out[2t+1] = x[t] @ W2 + x[t+1] @ W0 + b
# Weights are pre-packed as (2, 2, C, C) = [phase][current, rolled].  Shifted
# taps are obtained by rolling the (M, tc) f32 accumulator (+1 row for "prev",
# -1 row for "next") and zeroing the batch-segment boundary rows.
# Output is lane-dense (M, 2C) = [even C | odd C] per row -> free reshape to
# (B, 2T, C); the skip is read through the same free (M, 2C) view.
# ---------------------------------------------------------------------------
def _make_up_kernel(T, use_skip):
    def kernel(*refs):
        if use_skip:
            x_ref, w_ref, b_ref, s_ref, o_ref = refs
        else:
            x_ref, w_ref, b_ref, o_ref = refs
            s_ref = None
        x = x_ref[...]                               # (M, C) bf16
        M = x.shape[0]
        phase = pl.program_id(0)                     # 0 -> even, 1 -> odd
        acc = jnp.dot(x, w_ref[0, 0], preferred_element_type=jnp.float32)
        if T > 1:
            y = jnp.dot(x, w_ref[0, 1], preferred_element_type=jnp.float32)
            rows = lax.broadcasted_iota(jnp.int32, y.shape, 0)
            t = rows % T
            y_dn = jnp.where(t == 0, 0.0, pltpu.roll(y, shift=1, axis=0))
            y_up = jnp.where(t == T - 1, 0.0, pltpu.roll(y, shift=M - 1, axis=0))
            acc = acc + jnp.where(phase == 0, y_dn, y_up)
        # T == 1: x[t-1] and x[t+1] are zero-padding -> rolled tap vanishes
        acc = _leaky(acc + b_ref[...])
        if use_skip:                                 # skip added after LeakyReLU
            acc = acc + s_ref[...].astype(jnp.float32)
        o_ref[...] = acc.astype(o_ref.dtype)
    return kernel


def up_conv(x, w, b, skip=None):
    """x: (B, T, C) -> (B, 2T, C).  w: (2, 2, C, C) bf16; skip: (B, 2T, C)."""
    B, T, C = x.shape
    M = B * T
    tc = _cout_tile(C)
    nj = C // tc
    x2 = x.reshape(M, C).astype(jnp.bfloat16)
    b2 = b.reshape(1, C).astype(jnp.float32)
    in_specs = [
        pl.BlockSpec((M, C), lambda p, j: (0, 0)),
        pl.BlockSpec((1, 2, C, tc), lambda p, j: (p, 0, 0, j)),
        pl.BlockSpec((1, tc), lambda p, j: (0, j)),
    ]
    args = [x2, w, b2]
    if skip is not None:
        in_specs.append(pl.BlockSpec((M, tc), lambda p, j: (0, p * nj + j)))
        args.append(skip.reshape(M, 2 * C))          # free reshape, lane-dense
    out_shape = jax.ShapeDtypeStruct((M, 2 * C), jnp.bfloat16)
    out = pl.pallas_call(
        _make_up_kernel(T, skip is not None),
        out_shape=out_shape,
        grid=(2, nj),                                # phase x cout tiles
        in_specs=in_specs,
        out_specs=pl.BlockSpec((M, tc), lambda p, j: (0, p * nj + j)),
        compiler_params=_compiler_params(2),
        cost_estimate=_cost(2 * 4 * M * C * C, args, [out_shape]),
    )(*args)
    return out.reshape(B, 2 * T, C)                  # free interleave


# ---------------------------------------------------------------------------
# Parameter construction (deterministic, synthetic).  `channels` stands in for
# the module's hard-coded 1024, `seq_len` for 128, 4*channels for 4096.
# ---------------------------------------------------------------------------
def _conv_init(kw, kb, cout, cin, ksz):
    bound = 1.0 / math.sqrt(cin * ksz)
    w = jax.random.uniform(kw, (cout, cin, ksz), jnp.float32, -bound, bound)
    b = jax.random.uniform(kb, (cout,), jnp.float32, -bound, bound)
    return w, b


def _weight_norm_eff(v):
    # torch weight_norm(dim=0): w = g * v / ||v||; g is initialized to ||v||,
    # so the effective weight at init equals v.
    norm = jnp.sqrt(jnp.sum(v * v, axis=(1, 2), keepdims=True))
    return norm * v / norm


def init_params(key, channels, seq_len):
    """Kernel-ready (bf16, pre-transposed/stacked/folded) params; raw f32 conv
    weights kept under 'raw' only for the pure-JAX reference check."""
    C, L = channels, seq_len
    keys = iter(jax.random.split(key, 64))
    raw = {}
    raw["embed_w"], raw["embed_b"] = _conv_init(next(keys), next(keys), C, C, 1)
    raw["pos"] = jax.random.uniform(next(keys), (1, C, L), jnp.float32, -0.01, 0.01)
    raw["down"] = []
    for _ in range(5):               # weight_norm(Conv1d(C, C, 3, 2, 1))
        v, b = _conv_init(next(keys), next(keys), C, C, 3)
        raw["down"].append((_weight_norm_eff(v), b))
    raw["up"] = []
    for _ in range(5):               # weight_norm(ConvTranspose1d(C, C, 4, 2, 1))
        v, b = _conv_init(next(keys), next(keys), C, C, 4)     # (Cin, Cout, 4)
        raw["up"].append((_weight_norm_eff(v), b))
    raw["bias_w"], raw["bias_b"] = _conv_init(next(keys), next(keys), 4 * C, C, 1)
    raw["proj_w"], raw["proj_b"] = _conv_init(next(keys), next(keys), 4 * C, C, 1)

    p = {"raw": raw}
    # kernel-ready layouts (hoisted out of the forward pass), bf16 weights
    p["embed_w"] = raw["embed_w"][:, :, 0].T.astype(jnp.bfloat16)       # (C, C)
    p["embed_b"] = raw["embed_b"]
    p["pos_t"] = jnp.transpose(raw["pos"], (0, 2, 1))                   # (1, L, C)
    p["down"] = [
        (jnp.stack([w[:, :, k].T for k in range(3)], 0).astype(jnp.bfloat16), b)
        for (w, b) in raw["down"]]                                      # (3, C, C)
    p["up"] = []
    for (w, b) in raw["up"]:
        taps = [w[:, :, k] for k in range(4)]                           # (Cin, Cout)
        w_ph = jnp.stack([
            jnp.stack([taps[1], taps[3]], 0),    # even phase: current=W1, rolled(prev)=W3
            jnp.stack([taps[2], taps[0]], 0),    # odd  phase: current=W2, rolled(next)=W0
        ], 0).astype(jnp.bfloat16)                                      # (2, 2, C, C)
        p["up"].append((w_ph, b))
    # proj(x) - bias(x) folded into one 1x1 conv (same linear map, exact)
    p["final_w"] = (raw["proj_w"][:, :, 0]
                    - raw["bias_w"][:, :, 0]).T.astype(jnp.bfloat16)    # (C, 4C)
    p["final_b"] = raw["proj_b"] - raw["bias_b"]
    return p


# ---------------------------------------------------------------------------
# UNet forward (return_latent=False path; inference => dropout = identity)
# ---------------------------------------------------------------------------
def unet_forward(x_ncl, params):
    # TODO(synk): stft preprocessing branch (x.shape[1] == 1) not implemented;
    #             callers must pass spectrogram-shaped input (B, C, L).
    # TODO(synk): return_latent=True path (to_latent Linear) not exercised.
    B, C, L = x_ncl.shape
    x = jnp.transpose(x_ncl, (0, 2, 1)).astype(jnp.bfloat16)   # (B, L, C)

    # embed_spec (1x1 conv) then + pos (broadcast over batch via index map)
    x = pointwise_conv(x, params["embed_w"], params["embed_b"],
                       add=params["pos_t"])

    context = {}
    for w, b in params["down"]:
        x = down_conv(x, w, b)
        context[x.shape[1]] = x

    for w, b in params["up"]:
        skip = context.get(2 * x.shape[1])
        x = up_conv(x, w, b, skip)

    # proj(x) - bias(x): single folded 1x1 conv C -> 4C, batch folded into M
    T = x.shape[1]
    out = pointwise_conv(x.reshape(1, B * T, C), params["final_w"],
                         params["final_b"], out_dtype=jnp.float32)
    out = out.reshape(B, T, 4 * C)
    return jnp.transpose(out, (0, 2, 1))                        # (B, 4C, L)


# ---------------------------------------------------------------------------
# Pure-JAX f32 reference (PyTorch semantics) for validation
# ---------------------------------------------------------------------------
def _conv1d_ref(x, w, b, stride, padding):
    out = lax.conv_general_dilated(
        x, w, window_strides=(stride,), padding=[(padding, padding)],
        dimension_numbers=("NCH", "OIH", "NCH"), precision=lax.Precision.HIGHEST)
    return out + b[None, :, None]


def _conv_transpose1d_ref(x, w, b, stride, padding):
    K = w.shape[-1]                                  # w: (Cin, Cout, K)
    w_t = jnp.flip(jnp.transpose(w, (1, 0, 2)), axis=-1)
    out = lax.conv_general_dilated(
        x, w_t, window_strides=(1,), padding=[(K - 1 - padding,) * 2],
        lhs_dilation=(stride,), dimension_numbers=("NCH", "OIH", "NCH"),
        precision=lax.Precision.HIGHEST)
    return out + b[None, :, None]


def reference_forward(x_ncl, raw):
    x = _conv1d_ref(x_ncl, raw["embed_w"], raw["embed_b"], 1, 0)
    x = x + raw["pos"]
    ctx = {}
    for w, b in raw["down"]:
        x = _leaky(_conv1d_ref(x, w, b, 2, 1))
        ctx[x.shape[-1]] = x
    for w, b in raw["up"]:
        x = _leaky(_conv_transpose1d_ref(x, w, b, 2, 1))
        if x.shape[-1] in ctx:
            x = x + ctx[x.shape[-1]]
    return (_conv1d_ref(x, raw["proj_w"], raw["proj_b"], 1, 0)
            - _conv1d_ref(x, raw["bias_w"], raw["bias_b"], 1, 0))


if __name__ == "__main__":
    # Small, divisibility-consistent stand-ins: channels=128 (for 1024),
    # seq_len=32 (for 128; divisible by 2^5 so the 5 down/up stages line up).
    B, C, L = 2, 128, 32
    key = jax.random.PRNGKey(0)
    k_params, k_x = jax.random.split(key)
    params = init_params(k_params, C, L)
    x = jax.random.normal(k_x, (B, C, L), jnp.float32)          # NCL, like PyTorch

    out = jax.jit(unet_forward)(x, params)
    out = jax.block_until_ready(out)
    assert out.shape == (B, 4 * C, L), out.shape
    assert bool(jnp.all(jnp.isfinite(out)))

    # validate against the pure-JAX f32 reference (bf16 kernels => loose tol)
    ref = reference_forward(x, params["raw"])
    rel_err = float(jnp.max(jnp.abs(out - ref)) / (jnp.max(jnp.abs(ref)) + 1e-6))
    assert rel_err < 0.1, f"mismatch vs reference: rel_err={rel_err}"
    print("KERNEL_OK")
</pallas_src>

<mosaic_0001>
module attributes {stable_mosaic.version = 11 : i64} {
  func.func @kernel(%arg0: i32, %arg1: i32, %arg2: memref<1x32x128xbf16, #tpu.memory_space<vmem>>, %arg3: memref<128x128xbf16, #tpu.memory_space<vmem>>, %arg4: memref<1x128xf32, #tpu.memory_space<vmem>>, %arg5: memref<1x32x128xf32, #tpu.memory_space<vmem>>, %arg6: memref<1x32x128xbf16, #tpu.memory_space<vmem>>) attributes {dimension_semantics = [#tpu.dimension_semantics<parallel>, #tpu.dimension_semantics<parallel>], iteration_bounds = array<i64: 1, 2>, scalar_prefetch = 0 : i64, scratch_operands = 0 : i64, tpu.core_type = #tpu.core_type<tc>, window_params = [{transform_indices = @transform_0, window_bounds = array<i64: 1, 32, 128>}, {transform_indices = @transform_1, window_bounds = array<i64: 128, 128>}, {transform_indices = @transform_2, window_bounds = array<i64: 1, 128>}, {transform_indices = @transform_3, window_bounds = array<i64: 1, 32, 128>}, {transform_indices = @transform_4, window_bounds = array<i64: 1, 32, 128>}]} {
    %c0 = arith.constant 0 : index
    %c0_0 = arith.constant 0 : index
    %c0_1 = arith.constant 0 : index
    %0 = vector.load %arg2[%c0, %c0_0, %c0_1] : memref<1x32x128xbf16, #tpu.memory_space<vmem>>, vector<1x32x128xbf16>
    %1 = vector.shape_cast %0 : vector<1x32x128xbf16> to vector<32x128xbf16>
    %c0_2 = arith.constant 0 : index
    %c0_3 = arith.constant 0 : index
    %2 = vector.load %arg3[%c0_2, %c0_3] : memref<128x128xbf16, #tpu.memory_space<vmem>>, vector<128x128xbf16>
    %cst = arith.constant dense<0.000000e+00> : vector<32x128xf32>
    %3 = tpu.matmul %1, %2, %cst {dimension_numbers = #tpu.dot_dimension_numbers<[1], [0], [0], [1], [0, 0, 1, 1], [], []>} : vector<32x128xbf16>, vector<128x128xbf16>, vector<32x128xf32> -> vector<32x128xf32>
    %c0_4 = arith.constant 0 : index
    %c0_5 = arith.constant 0 : index
    %4 = vector.load %arg4[%c0_4, %c0_5] : memref<1x128xf32, #tpu.memory_space<vmem>>, vector<1x128xf32>
    %5 = vector.broadcast %4 : vector<1x128xf32> to vector<32x128xf32>
    %6 = arith.addf %3, %5 : vector<32x128xf32>
    %c0_6 = arith.constant 0 : index
    %c0_7 = arith.constant 0 : index
    %c0_8 = arith.constant 0 : index
    %7 = vector.load %arg5[%c0_6, %c0_7, %c0_8] : memref<1x32x128xf32, #tpu.memory_space<vmem>>, vector<1x32x128xf32>
    %8 = vector.shape_cast %7 : vector<1x32x128xf32> to vector<32x128xf32>
    %9 = arith.addf %6, %8 : vector<32x128xf32>
    %10 = arith.truncf %9 : vector<32x128xf32> to vector<32x128xbf16>
    %c0_9 = arith.constant 0 : index
    %c0_10 = arith.constant 0 : index
    %c0_11 = arith.constant 0 : index
    %11 = vector.load %arg6[%c0_9, %c0_10, %c0_11] : memref<1x32x128xbf16, #tpu.memory_space<vmem>>, vector<1x32x128xbf16>
    %12 = vector.shape_cast %11 : vector<1x32x128xbf16> to vector<32x128xbf16>
    %13 = vector.shape_cast %10 : vector<32x128xbf16> to vector<1x32x128xbf16>
    tpu.vector_store %arg6[%c0_9, %c0_10, %c0_11], %13 {strides = array<i32>} : memref<1x32x128xbf16, #tpu.memory_space<vmem>>, vector<1x32x128xbf16>,
    return
  }
  func.func @transform_0(%arg0: i32, %arg1: i32) -> (i32, i32, i32) {
    %c0_i32 = arith.constant 0 : i32
    %c0_i32_0 = arith.constant 0 : i32
    %c0_i32_1 = arith.constant 0 : i32
    return %arg1, %c0_i32, %c0_i32_0 : i32, i32, i32
  }
  func.func @transform_1(%arg0: i32, %arg1: i32) -> (i32, i32) {
    %c0_i32 = arith.constant 0 : i32
    %c0_i32_0 = arith.constant 0 : i32
    return %c0_i32, %arg0 : i32, i32
  }
  func.func @transform_2(%arg0: i32, %arg1: i32) -> (i32, i32) {
    %c0_i32 = arith.constant 0 : i32
    %c0_i32_0 = arith.constant 0 : i32
    return %c0_i32, %arg0 : i32, i32
  }
  func.func @transform_3(%arg0: i32, %arg1: i32) -> (i32, i32, i32) {
    %c0_i32 = arith.constant 0 : i32
    %c0_i32_0 = arith.constant 0 : i32
    %c0_i32_1 = arith.constant 0 : i32
    return %c0_i32, %c0_i32_0, %arg0 : i32, i32, i32
  }
  func.func @transform_4(%arg0: i32, %arg1: i32) -> (i32, i32, i32) {
    %c0_i32 = arith.constant 0 : i32
    %c0_i32_0 = arith.constant 0 : i32
    return %arg1, %c0_i32, %arg0 : i32, i32, i32
  }
}

module attributes {stable_mosaic.version = 11 : i64} {
  func.func @kernel(%arg0: i32, %arg1: memref<32x256xbf16, #tpu.memory_space<vmem>>, %arg2: memref<3x128x128xbf16, #tpu.memory_space<vmem>>, %arg3: memref<1x128xf32, #tpu.memory_space<vmem>>, %arg4: memref<32x128xbf16, #tpu.memory_space<vmem>>) attributes {dimension_semantics = [#tpu.dimension_semantics<parallel>], iteration_bounds = array<i64: 1>, scalar_prefetch = 0 : i64, scratch_operands = 0 : i64, tpu.core_type = #tpu.core_type<tc>, window_params = [{pipeline_mode = #tpu.pipeline_mode<synchronous>, transform_indices = @transform_0, window_bounds = array<i64: 32, 256>}, {transform_indices = @transform_1, window_bounds = array<i64: 3, 128, 128>}, {transform_indices = @transform_2, window_bounds = array<i64: 1, 128>}, {transform_indices = @transform_3, window_bounds = array<i64: 32, 128>}]} {
    %c0 = arith.constant 0 : index
    %c0_0 = arith.constant 0 : index
    %0 = vector.load %arg1[%c0, %c0_0] : memref<32x256xbf16, #tpu.memory_space<vmem>>, vector<32x256xbf16>
    %1 = vector.extract_strided_slice %0 {offsets = [0, 0], sizes = [32, 128], strides = [1, 1]} : vector<32x256xbf16> to vector<32x128xbf16>
    %2 = vector.extract_strided_slice %0 {offsets = [0, 128], sizes = [32, 128], strides = [1, 1]} : vector<32x256xbf16> to vector<32x128xbf16>
    %c1 = arith.constant 1 : index
    %c0_1 = arith.constant 0 : index
    %c0_2 = arith.constant 0 : index
    %3 = vector.load %arg2[%c1, %c0_1, %c0_2] : memref<3x128x128xbf16, #tpu.memory_space<vmem>>, vector<1x128x128xbf16>
    %4 = vector.shape_cast %3 : vector<1x128x128xbf16> to vector<128x128xbf16>
    %cst = arith.constant dense<0.000000e+00> : vector<32x128xf32>
    %5 = tpu.matmul %1, %4, %cst {dimension_numbers = #tpu.dot_dimension_numbers<[1], [0], [0], [1], [0, 0, 1, 1], [], []>} : vector<32x128xbf16>, vector<128x128xbf16>, vector<32x128xf32> -> vector<32x128xf32>
    %c2 = arith.constant 2 : index
    %c0_3 = arith.constant 0 : index
    %c0_4 = arith.constant 0 : index
    %6 = vector.load %arg2[%c2, %c0_3, %c0_4] : memref<3x128x128xbf16, #tpu.memory_space<vmem>>, vector<1x128x128xbf16>
    %7 = vector.shape_cast %6 : vector<1x128x128xbf16> to vector<128x128xbf16>
    %cst_5 = arith.constant dense<0.000000e+00> : vector<32x128xf32>
    %8 = tpu.matmul %2, %7, %cst_5 {dimension_numbers = #tpu.dot_dimension_numbers<[1], [0], [0], [1], [0, 0, 1, 1], [], []>} : vector<32x128xbf16>, vector<128x128xbf16>, vector<32x128xf32> -> vector<32x128xf32>
    %9 = arith.addf %5, %8 : vector<32x128xf32>
    %c0_6 = arith.constant 0 : index
    %c0_7 = arith.constant 0 : index
    %c0_8 = arith.constant 0 : index
    %10 = vector.load %arg2[%c0_6, %c0_7, %c0_8] : memref<3x128x128xbf16, #tpu.memory_space<vmem>>, vector<1x128x128xbf16>
    %11 = vector.shape_cast %10 : vector<1x128x128xbf16> to vector<128x128xbf16>
    %cst_9 = arith.constant dense<0.000000e+00> : vector<32x128xf32>
    %12 = tpu.matmul %2, %11, %cst_9 {dimension_numbers = #tpu.dot_dimension_numbers<[1], [0], [0], [1], [0, 0, 1, 1], [], []>} : vector<32x128xbf16>, vector<128x128xbf16>, vector<32x128xf32> -> vector<32x128xf32>
    %13 = tpu.iota {dimensions = array<i32: 0>} : vector<32x128xi32>
    %c16_i32 = arith.constant 16 : i32
    %c0_i32 = arith.constant 0 : i32
    %14 = arith.cmpi eq, %c16_i32, %c0_i32 : i32
    %c1_i32 = arith.constant 1 : i32
    %15 = arith.select %14, %c1_i32, %c16_i32 : i32
    %16 = vector.broadcast %15 : i32 to vector<32x128xi32>
    %17 = arith.remsi %13, %16 : vector<32x128xi32>
    %c0_i32_10 = arith.constant 0 : i32
    %18 = vector.broadcast %c0_i32_10 : i32 to vector<32x128xi32>
    %19 = arith.cmpi ne, %17, %18 : vector<32x128xi32>
    %c0_i32_11 = arith.constant 0 : i32
    %20 = vector.broadcast %c0_i32_11 : i32 to vector<32x128xi32>
    %21 = arith.cmpi slt, %17, %20 : vector<32x128xi32>
    %c0_i32_12 = arith.constant 0 : i32
    %22 = arith.cmpi slt, %15, %c0_i32_12 : i32
    %23 = vector.broadcast %22 : i1 to vector<32x128xi1>
    %24 = vector.broadcast %23 : vector<32x128xi1> to vector<32x128xi1>
    %25 = arith.xori %21, %24 : vector<32x128xi1>
    %26 = arith.andi %25, %19 : vector<32x128xi1>
    %27 = vector.broadcast %15 : i32 to vector<32x128xi32>
    %28 = arith.addi %17, %27 : vector<32x128xi32>
    %29 = arith.select %26, %28, %17 : vector<32x128xi1>, vector<32x128xi32>
    %c0_i32_13 = arith.constant 0 : i32
    %30 = vector.broadcast %c0_i32_13 : i32 to vector<32x128xi32>
    %31 = arith.cmpi eq, %29, %30 : vector<32x128xi32>
    %c1_i32_14 = arith.constant 1 : i32
    %32 = tpu.dynamic_rotate %12 by %c1_i32_14 dim 0 : vector<32x128xf32>, i32 -> vector<32x128xf32>
    %cst_15 = arith.constant 0.000000e+00 : f32
    %33 = vector.broadcast %cst_15 : f32 to vector<32x128xf32>
    %34 = arith.select %31, %33, %32 : vector<32x128xi1>, vector<32x128xf32>
    %35 = arith.addf %9, %34 : vector<32x128xf32>
    %c0_16 = arith.constant 0 : index
    %c0_17 = arith.constant 0 : index
    %36 = vector.load %arg3[%c0_16, %c0_17] : memref<1x128xf32, #tpu.memory_space<vmem>>, vector<1x128xf32>
    %37 = vector.broadcast %36 : vector<1x128xf32> to vector<32x128xf32>
    %38 = arith.addf %35, %37 : vector<32x128xf32>
    %cst_18 = arith.constant 0.000000e+00 : f32
    %39 = vector.broadcast %cst_18 : f32 to vector<32x128xf32>
    %40 = arith.cmpf oge, %38, %39 : vector<32x128xf32>
    %cst_19 = arith.constant 2.000000e-01 : f32
    %41 = vector.broadcast %cst_19 : f32 to vector<32x128xf32>
    %42 = arith.mulf %41, %38 : vector<32x128xf32>
    %43 = arith.select %40, %38, %42 : vector<32x128xi1>, vector<32x128xf32>
    %44 = arith.truncf %43 : vector<32x128xf32> to vector<32x128xbf16>
    %c0_20 = arith.constant 0 : index
    %c0_21 = arith.constant 0 : index
    %45 = vector.load %arg4[%c0_20, %c0_21] : memref<32x128xbf16, #tpu.memory_space<vmem>>, vector<32x128xbf16>
    tpu.vector_store %arg4[%c0_20, %c0_21], %44 {strides = array<i32>} : memref<32x128xbf16, #tpu.memory_space<vmem>>, vector<32x128xbf16>,
    return
  }
  func.func @transform_0(%arg0: i32) -> (i32, i32) {
    %c0_i32 = arith.constant 0 : i32
    %c0_i32_0 = arith.constant 0 : i32
    %c0_i32_1 = arith.constant 0 : i32
    return %c0_i32, %c0_i32_0 : i32, i32
  }
  func.func @transform_1(%arg0: i32) -> (i32, i32, i32) {
    %c0_i32 = arith.constant 0 : i32
    %c0_i32_0 = arith.constant 0 : i32
    %c0_i32_1 = arith.constant 0 : i32
    return %c0_i32, %c0_i32_0, %arg0 : i32, i32, i32
  }
  func.func @transform_2(%arg0: i32) -> (i32, i32) {
    %c0_i32 = arith.constant 0 : i32
    %c0_i32_0 = arith.constant 0 : i32
    return %c0_i32, %arg0 : i32, i32
  }
  func.func @transform_3(%arg0: i32) -> (i32, i32) {
    %c0_i32 = arith.constant 0 : i32
    %c0_i32_0 = arith.constant 0 : i32
    return %c0_i32, %arg0 : i32, i32
  }
}

module attributes {stable_mosaic.version = 11 : i64} {
  func.func @kernel(%arg0: i32, %arg1: memref<8x256xbf16, #tpu.memory_space<vmem>>, %arg2: memref<3x128x128xbf16, #tpu.memory_space<vmem>>, %arg3: memref<1x128xf32, #tpu.memory_space<vmem>>, %arg4: memref<8x128xbf16, #tpu.memory_space<vmem>>) attributes {dimension_semantics = [#tpu.dimension_semantics<parallel>], iteration_bounds = array<i64: 1>, scalar_prefetch = 0 : i64, scratch_operands = 0 : i64, tpu.core_type = #tpu.core_type<tc>, window_params = [{pipeline_mode = #tpu.pipeline_mode<synchronous>, transform_indices = @transform_0, window_bounds = array<i64: 8, 256>}, {transform_indices = @transform_1, window_bounds = array<i64: 3, 128, 128>}, {transform_indices = @transform_2, window_bounds = array<i64: 1, 128>}, {transform_indices = @transform_3, window_bounds = array<i64: 8, 128>}]} {
    %c0 = arith.constant 0 : index
    %c0_0 = arith.constant 0 : index
    %0 = vector.load %arg1[%c0, %c0_0] : memref<8x256xbf16, #tpu.memory_space<vmem>>, vector<8x256xbf16>
    %1 = vector.extract_strided_slice %0 {offsets = [0, 0], sizes = [8, 128], strides = [1, 1]} : vector<8x256xbf16> to vector<8x128xbf16>
    %2 = vector.extract_strided_slice %0 {offsets = [0, 128], sizes = [8, 128], strides = [1, 1]} : vector<8x256xbf16> to vector<8x128xbf16>
    %c1 = arith.constant 1 : index
    %c0_1 = arith.constant 0 : index
    %c0_2 = arith.constant 0 : index
    %3 = vector.load %arg2[%c1, %c0_1, %c0_2] : memref<3x128x128xbf16, #tpu.memory_space<vmem>>, vector<1x128x128xbf16>
    %4 = vector.shape_cast %3 : vector<1x128x128xbf16> to vector<128x128xbf16>
    %cst = arith.constant dense<0.000000e+00> : vector<8x128xf32>
    %5 = tpu.matmul %1, %4, %cst {dimension_numbers = #tpu.dot_dimension_numbers<[1], [0], [0], [1], [0, 0, 1, 1], [], []>} : vector<8x128xbf16>, vector<128x128xbf16>, vector<8x128xf32> -> vector<8x128xf32>
    %c2 = arith.constant 2 : index
    %c0_3 = arith.constant 0 : index
    %c0_4 = arith.constant 0 : index
    %6 = vector.load %arg2[%c2, %c0_3, %c0_4] : memref<3x128x128xbf16, #tpu.memory_space<vmem>>, vector<1x128x128xbf16>
    %7 = vector.shape_cast %6 : vector<1x128x128xbf16> to vector<128x128xbf16>
    %cst_5 = arith.constant dense<0.000000e+00> : vector<8x128xf32>
    %8 = tpu.matmul %2, %7, %cst_5 {dimension_numbers = #tpu.dot_dimension_numbers<[1], [0], [0], [1], [0, 0, 1, 1], [], []>} : vector<8x128xbf16>, vector<128x128xbf16>, vector<8x128xf32> -> vector<8x128xf32>
    %9 = arith.addf %5, %8 : vector<8x128xf32>
    %c0_6 = arith.constant 0 : index
    %c0_7 = arith.constant 0 : index
    %c0_8 = arith.constant 0 : index
    %10 = vector.load %arg2[%c0_6, %c0_7, %c0_8] : memref<3x128x128xbf16, #tpu.memory_space<vmem>>, vector<1x128x128xbf16>
    %11 = vector.shape_cast %10 : vector<1x128x128xbf16> to vector<128x128xbf16>
    %cst_9 = arith.constant dense<0.000000e+00> : vector<8x128xf32>
    %12 = tpu.matmul %2, %11, %cst_9 {dimension_numbers = #tpu.dot_dimension_numbers<[1], [0], [0], [1], [0, 0, 1, 1], [], []>} : vector<8x128xbf16>, vector<128x128xbf16>, vector<8x128xf32> -> vector<8x128xf32>
    %13 = tpu.iota {dimensions = array<i32: 0>} : vector<8x128xi32>
    %c4_i32 = arith.constant 4 : i32
    %c0_i32 = arith.constant 0 : i32
    %14 = arith.cmpi eq, %c4_i32, %c0_i32 : i32
    %c1_i32 = arith.constant 1 : i32
    %15 = arith.select %14, %c1_i32, %c4_i32 : i32
    %16 = vector.broadcast %15 : i32 to vector<8x128xi32>
    %17 = arith.remsi %13, %16 : vector<8x128xi32>
    %c0_i32_10 = arith.constant 0 : i32
    %18 = vector.broadcast %c0_i32_10 : i32 to vector<8x128xi32>
    %19 = arith.cmpi ne, %17, %18 : vector<8x128xi32>
    %c0_i32_11 = arith.constant 0 : i32
    %20 = vector.broadcast %c0_i32_11 : i32 to vector<8x128xi32>
    %21 = arith.cmpi slt, %17, %20 : vector<8x128xi32>
    %c0_i32_12 = arith.constant 0 : i32
    %22 = arith.cmpi slt, %15, %c0_i32_12 : i32
    %23 = vector.broadcast %22 : i1 to vector<8x128xi1>
    %24 = vector.broadcast %23 : vector<8x128xi1> to vector<8x128xi1>
    %25 = arith.xori %21, %24 : vector<8x128xi1>
    %26 = arith.andi %25, %19 : vector<8x128xi1>
    %27 = vector.broadcast %15 : i32 to vector<8x128xi32>
    %28 = arith.addi %17, %27 : vector<8x128xi32>
    %29 = arith.select %26, %28, %17 : vector<8x128xi1>, vector<8x128xi32>
    %c0_i32_13 = arith.constant 0 : i32
    %30 = vector.broadcast %c0_i32_13 : i32 to vector<8x128xi32>
    %31 = arith.cmpi eq, %29, %30 : vector<8x128xi32>
    %c1_i32_14 = arith.constant 1 : i32
    %32 = tpu.dynamic_rotate %12 by %c1_i32_14 dim 0 : vector<8x128xf32>, i32 -> vector<8x128xf32>
    %cst_15 = arith.constant 0.000000e+00 : f32
    %33 = vector.broadcast %cst_15 : f32 to vector<8x128xf32>
    %34 = arith.select %31, %33, %32 : vector<8x128xi1>, vector<8x128xf32>
    %35 = arith.addf %9, %34 : vector<8x128xf32>
    %c0_16 = arith.constant 0 : index
    %c0_17 = arith.constant 0 : index
    %36 = vector.load %arg3[%c0_16, %c0_17] : memref<1x128xf32, #tpu.memory_space<vmem>>, vector<1x128xf32>
    %37 = vector.broadcast %36 : vector<1x128xf32> to vector<8x128xf32>
    %38 = arith.addf %35, %37 : vector<8x128xf32>
    %cst_18 = arith.constant 0.000000e+00 : f32
    %39 = vector.broadcast %cst_18 : f32 to vector<8x128xf32>
    %40 = arith.cmpf oge, %38, %39 : vector<8x128xf32>
    %cst_19 = arith.constant 2.000000e-01 : f32
    %41 = vector.broadcast %cst_19 : f32 to vector<8x128xf32>
    %42 = arith.mulf %41, %38 : vector<8x128xf32>
    %43 = arith.select %40, %38, %42 : vector<8x128xi1>, vector<8x128xf32>
    %44 = arith.truncf %43 : vector<8x128xf32> to vector<8x128xbf16>
    %c0_20 = arith.constant 0 : index
    %c0_21 = arith.constant 0 : index
    %45 = vector.load %arg4[%c0_20, %c0_21] : memref<8x128xbf16, #tpu.memory_space<vmem>>, vector<8x128xbf16>
    tpu.vector_store %arg4[%c0_20, %c0_21], %44 {strides = array<i32>} : memref<8x128xbf16, #tpu.memory_space<vmem>>, vector<8x128xbf16>,
    return
  }
  func.func @transform_0(%arg0: i32) -> (i32, i32) {
    %c0_i32 = arith.constant 0 : i32
    %c0_i32_0 = arith.constant 0 : i32
    %c0_i32_1 = arith.constant 0 : i32
    return %c0_i32, %c0_i32_0 : i32, i32
  }
  func.func @transform_1(%arg0: i32) -> (i32, i32, i32) {
    %c0_i32 = arith.constant 0 : i32
    %c0_i32_0 = arith.constant 0 : i32
    %c0_i32_1 = arith.constant 0 : i32
    return %c0_i32, %c0_i32_0, %arg0 : i32, i32, i32
  }
  func.func @transform_2(%arg0: i32) -> (i32, i32) {
    %c0_i32 = arith.constant 0 : i32
    %c0_i32_0 = arith.constant 0 : i32
    return %c0_i32, %arg0 : i32, i32
  }
  func.func @transform_3(%arg0: i32) -> (i32, i32) {
    %c0_i32 = arith.constant 0 : i32
    %c0_i32_0 = arith.constant 0 : i32
    return %c0_i32, %arg0 : i32, i32
  }
}

module attributes {stable_mosaic.version = 11 : i64} {
  func.func @kernel(%arg0: i32, %arg1: memref<16x256xbf16, #tpu.memory_space<vmem>>, %arg2: memref<3x128x128xbf16, #tpu.memory_space<vmem>>, %arg3: memref<1x128xf32, #tpu.memory_space<vmem>>, %arg4: memref<16x128xbf16, #tpu.memory_space<vmem>>) attributes {dimension_semantics = [#tpu.dimension_semantics<parallel>], iteration_bounds = array<i64: 1>, scalar_prefetch = 0 : i64, scratch_operands = 0 : i64, tpu.core_type = #tpu.core_type<tc>, window_params = [{pipeline_mode = #tpu.pipeline_mode<synchronous>, transform_indices = @transform_0, window_bounds = array<i64: 16, 256>}, {transform_indices = @transform_1, window_bounds = array<i64: 3, 128, 128>}, {transform_indices = @transform_2, window_bounds = array<i64: 1, 128>}, {transform_indices = @transform_3, window_bounds = array<i64: 16, 128>}]} {
    %c0 = arith.constant 0 : index
    %c0_0 = arith.constant 0 : index
    %0 = vector.load %arg1[%c0, %c0_0] : memref<16x256xbf16, #tpu.memory_space<vmem>>, vector<16x256xbf16>
    %1 = vector.extract_strided_slice %0 {offsets = [0, 0], sizes = [16, 128], strides = [1, 1]} : vector<16x256xbf16> to vector<16x128xbf16>
    %2 = vector.extract_strided_slice %0 {offsets = [0, 128], sizes = [16, 128], strides = [1, 1]} : vector<16x256xbf16> to vector<16x128xbf16>
    %c1 = arith.constant 1 : index
    %c0_1 = arith.constant 0 : index
    %c0_2 = arith.constant 0 : index
    %3 = vector.load %arg2[%c1, %c0_1, %c0_2] : memref<3x128x128xbf16, #tpu.memory_space<vmem>>, vector<1x128x128xbf16>
    %4 = vector.shape_cast %3 : vector<1x128x128xbf16> to vector<128x128xbf16>
    %cst = arith.constant dense<0.000000e+00> : vector<16x128xf32>
    %5 = tpu.matmul %1, %4, %cst {dimension_numbers = #tpu.dot_dimension_numbers<[1], [0], [0], [1], [0, 0, 1, 1], [], []>} : vector<16x128xbf16>, vector<128x128xbf16>, vector<16x128xf32> -> vector<16x128xf32>
    %c2 = arith.constant 2 : index
    %c0_3 = arith.constant 0 : index
    %c0_4 = arith.constant 0 : index
    %6 = vector.load %arg2[%c2, %c0_3, %c0_4] : memref<3x128x128xbf16, #tpu.memory_space<vmem>>, vector<1x128x128xbf16>
    %7 = vector.shape_cast %6 : vector<1x128x128xbf16> to vector<128x128xbf16>
    %cst_5 = arith.constant dense<0.000000e+00> : vector<16x128xf32>
    %8 = tpu.matmul %2, %7, %cst_5 {dimension_numbers = #tpu.dot_dimension_numbers<[1], [0], [0], [1], [0, 0, 1, 1], [], []>} : vector<16x128xbf16>, vector<128x128xbf16>, vector<16x128xf32> -> vector<16x128xf32>
    %9 = arith.addf %5, %8 : vector<16x128xf32>
    %c0_6 = arith.constant 0 : index
    %c0_7 = arith.constant 0 : index
    %c0_8 = arith.constant 0 : index
    %10 = vector.load %arg2[%c0_6, %c0_7, %c0_8] : memref<3x128x128xbf16, #tpu.memory_space<vmem>>, vector<1x128x128xbf16>
    %11 = vector.shape_cast %10 : vector<1x128x128xbf16> to vector<128x128xbf16>
    %cst_9 = arith.constant dense<0.000000e+00> : vector<16x128xf32>
    %12 = tpu.matmul %2, %11, %cst_9 {dimension_numbers = #tpu.dot_dimension_numbers<[1], [0], [0], [1], [0, 0, 1, 1], [], []>} : vector<16x128xbf16>, vector<128x128xbf16>, vector<16x128xf32> -> vector<16x128xf32>
    %13 = tpu.iota {dimensions = array<i32: 0>} : vector<16x128xi32>
    %c8_i32 = arith.constant 8 : i32
    %c0_i32 = arith.constant 0 : i32
    %14 = arith.cmpi eq, %c8_i32, %c0_i32 : i32
    %c1_i32 = arith.constant 1 : i32
    %15 = arith.select %14, %c1_i32, %c8_i32 : i32
    %16 = vector.broadcast %15 : i32 to vector<16x128xi32>
    %17 = arith.remsi %13, %16 : vector<16x128xi32>
    %c0_i32_10 = arith.constant 0 : i32
    %18 = vector.broadcast %c0_i32_10 : i32 to vector<16x128xi32>
    %19 = arith.cmpi ne, %17, %18 : vector<16x128xi32>
    %c0_i32_11 = arith.constant 0 : i32
    %20 = vector.broadcast %c0_i32_11 : i32 to vector<16x128xi32>
    %21 = arith.cmpi slt, %17, %20 : vector<16x128xi32>
    %c0_i32_12 = arith.constant 0 : i32
    %22 = arith.cmpi slt, %15, %c0_i32_12 : i32
    %23 = vector.broadcast %22 : i1 to vector<16x128xi1>
    %24 = vector.broadcast %23 : vector<16x128xi1> to vector<16x128xi1>
    %25 = arith.xori %21, %24 : vector<16x128xi1>
    %26 = arith.andi %25, %19 : vector<16x128xi1>
    %27 = vector.broadcast %15 : i32 to vector<16x128xi32>
    %28 = arith.addi %17, %27 : vector<16x128xi32>
    %29 = arith.select %26, %28, %17 : vector<16x128xi1>, vector<16x128xi32>
    %c0_i32_13 = arith.constant 0 : i32
    %30 = vector.broadcast %c0_i32_13 : i32 to vector<16x128xi32>
    %31 = arith.cmpi eq, %29, %30 : vector<16x128xi32>
    %c1_i32_14 = arith.constant 1 : i32
    %32 = tpu.dynamic_rotate %12 by %c1_i32_14 dim 0 : vector<16x128xf32>, i32 -> vector<16x128xf32>
    %cst_15 = arith.constant 0.000000e+00 : f32
    %33 = vector.broadcast %cst_15 : f32 to vector<16x128xf32>
    %34 = arith.select %31, %33, %32 : vector<16x128xi1>, vector<16x128xf32>
    %35 = arith.addf %9, %34 : vector<16x128xf32>
    %c0_16 = arith.constant 0 : index
    %c0_17 = arith.constant 0 : index
    %36 = vector.load %arg3[%c0_16, %c0_17] : memref<1x128xf32, #tpu.memory_space<vmem>>, vector<1x128xf32>
    %37 = vector.broadcast %36 : vector<1x128xf32> to vector<16x128xf32>
    %38 = arith.addf %35, %37 : vector<16x128xf32>
    %cst_18 = arith.constant 0.000000e+00 : f32
    %39 = vector.broadcast %cst_18 : f32 to vector<16x128xf32>
    %40 = arith.cmpf oge, %38, %39 : vector<16x128xf32>
    %cst_19 = arith.constant 2.000000e-01 : f32
    %41 = vector.broadcast %cst_19 : f32 to vector<16x128xf32>
    %42 = arith.mulf %41, %38 : vector<16x128xf32>
    %43 = arith.select %40, %38, %42 : vector<16x128xi1>, vector<16x128xf32>
    %44 = arith.truncf %43 : vector<16x128xf32> to vector<16x128xbf16>
    %c0_20 = arith.constant 0 : index
    %c0_21 = arith.constant 0 : index
    %45 = vector.load %arg4[%c0_20, %c0_21] : memref<16x128xbf16, #tpu.memory_space<vmem>>, vector<16x128xbf16>
    tpu.vector_store %arg4[%c0_20, %c0_21], %44 {strides = array<i32>} : memref<16x128xbf16, #tpu.memory_space<vmem>>, vector<16x128xbf16>,
    return
  }
  func.func @transform_0(%arg0: i32) -> (i32, i32) {
    %c0_i32 = arith.constant 0 : i32
    %c0_i32_0 = arith.constant 0 : i32
    %c0_i32_1 = arith.constant 0 : i32
    return %c0_i32, %c0_i32_0 : i32, i32
  }
  func.func @transform_1(%arg0: i32) -> (i32, i32, i32) {
    %c0_i32 = arith.constant 0 : i32
    %c0_i32_0 = arith.constant 0 : i32
    %c0_i32_1 = arith.constant 0 : i32
    return %c0_i32, %c0_i32_0, %arg0 : i32, i32, i32
  }
  func.func @transform_2(%arg0: i32) -> (i32, i32) {
    %c0_i32 = arith.constant 0 : i32
    %c0_i32_0 = arith.constant 0 : i32
    return %c0_i32, %arg0 : i32, i32
  }
  func.func @transform_3(%arg0: i32) -> (i32, i32) {
    %c0_i32 = arith.constant 0 : i32
    %c0_i32_0 = arith.constant 0 : i32
    return %c0_i32, %arg0 : i32, i32
  }
}

module attributes {stable_mosaic.version = 11 : i64} {
  func.func @kernel(%arg0: i32, %arg1: memref<4x256xbf16, #tpu.memory_space<vmem>>, %arg2: memref<3x128x128xbf16, #tpu.memory_space<vmem>>, %arg3: memref<1x128xf32, #tpu.memory_space<vmem>>, %arg4: memref<4x128xbf16, #tpu.memory_space<vmem>>) attributes {dimension_semantics = [#tpu.dimension_semantics<parallel>], iteration_bounds = array<i64: 1>, scalar_prefetch = 0 : i64, scratch_operands = 0 : i64, tpu.core_type = #tpu.core_type<tc>, window_params = [{pipeline_mode = #tpu.pipeline_mode<synchronous>, transform_indices = @transform_0, window_bounds = array<i64: 4, 256>}, {transform_indices = @transform_1, window_bounds = array<i64: 3, 128, 128>}, {transform_indices = @transform_2, window_bounds = array<i64: 1, 128>}, {transform_indices = @transform_3, window_bounds = array<i64: 4, 128>}]} {
    %c0 = arith.constant 0 : index
    %c0_0 = arith.constant 0 : index
    %0 = vector.load %arg1[%c0, %c0_0] : memref<4x256xbf16, #tpu.memory_space<vmem>>, vector<4x256xbf16>
    %1 = vector.extract_strided_slice %0 {offsets = [0, 0], sizes = [4, 128], strides = [1, 1]} : vector<4x256xbf16> to vector<4x128xbf16>
    %2 = vector.extract_strided_slice %0 {offsets = [0, 128], sizes = [4, 128], strides = [1, 1]} : vector<4x256xbf16> to vector<4x128xbf16>
    %c1 = arith.constant 1 : index
    %c0_1 = arith.constant 0 : index
    %c0_2 = arith.constant 0 : index
    %3 = vector.load %arg2[%c1, %c0_1, %c0_2] : memref<3x128x128xbf16, #tpu.memory_space<vmem>>, vector<1x128x128xbf16>
    %4 = vector.shape_cast %3 : vector<1x128x128xbf16> to vector<128x128xbf16>
    %cst = arith.constant dense<0.000000e+00> : vector<4x128xf32>
    %5 = tpu.matmul %1, %4, %cst {dimension_numbers = #tpu.dot_dimension_numbers<[1], [0], [0], [1], [0, 0, 1, 1], [], []>} : vector<4x128xbf16>, vector<128x128xbf16>, vector<4x128xf32> -> vector<4x128xf32>
    %c2 = arith.constant 2 : index
    %c0_3 = arith.constant 0 : index
    %c0_4 = arith.constant 0 : index
    %6 = vector.load %arg2[%c2, %c0_3, %c0_4] : memref<3x128x128xbf16, #tpu.memory_space<vmem>>, vector<1x128x128xbf16>
    %7 = vector.shape_cast %6 : vector<1x128x128xbf16> to vector<128x128xbf16>
    %cst_5 = arith.constant dense<0.000000e+00> : vector<4x128xf32>
    %8 = tpu.matmul %2, %7, %cst_5 {dimension_numbers = #tpu.dot_dimension_numbers<[1], [0], [0], [1], [0, 0, 1, 1], [], []>} : vector<4x128xbf16>, vector<128x128xbf16>, vector<4x128xf32> -> vector<4x128xf32>
    %9 = arith.addf %5, %8 : vector<4x128xf32>
    %c0_6 = arith.constant 0 : index
    %c0_7 = arith.constant 0 : index
    %c0_8 = arith.constant 0 : index
    %10 = vector.load %arg2[%c0_6, %c0_7, %c0_8] : memref<3x128x128xbf16, #tpu.memory_space<vmem>>, vector<1x128x128xbf16>
    %11 = vector.shape_cast %10 : vector<1x128x128xbf16> to vector<128x128xbf16>
    %cst_9 = arith.constant dense<0.000000e+00> : vector<4x128xf32>
    %12 = tpu.matmul %2, %11, %cst_9 {dimension_numbers = #tpu.dot_dimension_numbers<[1], [0], [0], [1], [0, 0, 1, 1], [], []>} : vector<4x128xbf16>, vector<128x128xbf16>, vector<4x128xf32> -> vector<4x128xf32>
    %13 = tpu.iota {dimensions = array<i32: 0>} : vector<4x128xi32>
    %c2_i32 = arith.constant 2 : i32
    %c0_i32 = arith.constant 0 : i32
    %14 = arith.cmpi eq, %c2_i32, %c0_i32 : i32
    %c1_i32 = arith.constant 1 : i32
    %15 = arith.select %14, %c1_i32, %c2_i32 : i32
    %16 = vector.broadcast %15 : i32 to vector<4x128xi32>
    %17 = arith.remsi %13, %16 : vector<4x128xi32>
    %c0_i32_10 = arith.constant 0 : i32
    %18 = vector.broadcast %c0_i32_10 : i32 to vector<4x128xi32>
    %19 = arith.cmpi ne, %17, %18 : vector<4x128xi32>
    %c0_i32_11 = arith.constant 0 : i32
    %20 = vector.broadcast %c0_i32_11 : i32 to vector<4x128xi32>
    %21 = arith.cmpi slt, %17, %20 : vector<4x128xi32>
    %c0_i32_12 = arith.constant 0 : i32
    %22 = arith.cmpi slt, %15, %c0_i32_12 : i32
    %23 = vector.broadcast %22 : i1 to vector<4x128xi1>
    %24 = vector.broadcast %23 : vector<4x128xi1> to vector<4x128xi1>
    %25 = arith.xori %21, %24 : vector<4x128xi1>
    %26 = arith.andi %25, %19 : vector<4x128xi1>
    %27 = vector.broadcast %15 : i32 to vector<4x128xi32>
    %28 = arith.addi %17, %27 : vector<4x128xi32>
    %29 = arith.select %26, %28, %17 : vector<4x128xi1>, vector<4x128xi32>
    %c0_i32_13 = arith.constant 0 : i32
    %30 = vector.broadcast %c0_i32_13 : i32 to vector<4x128xi32>
    %31 = arith.cmpi eq, %29, %30 : vector<4x128xi32>
    %c1_i32_14 = arith.constant 1 : i32
    %32 = tpu.dynamic_rotate %12 by %c1_i32_14 dim 0 : vector<4x128xf32>, i32 -> vector<4x128xf32>
    %cst_15 = arith.constant 0.000000e+00 : f32
    %33 = vector.broadcast %cst_15 : f32 to vector<4x128xf32>
    %34 = arith.select %31, %33, %32 : vector<4x128xi1>, vector<4x128xf32>
    %35 = arith.addf %9, %34 : vector<4x128xf32>
    %c0_16 = arith.constant 0 : index
    %c0_17 = arith.constant 0 : index
    %36 = vector.load %arg3[%c0_16, %c0_17] : memref<1x128xf32, #tpu.memory_space<vmem>>, vector<1x128xf32>
    %37 = vector.broadcast %36 : vector<1x128xf32> to vector<4x128xf32>
    %38 = arith.addf %35, %37 : vector<4x128xf32>
    %cst_18 = arith.constant 0.000000e+00 : f32
    %39 = vector.broadcast %cst_18 : f32 to vector<4x128xf32>
    %40 = arith.cmpf oge, %38, %39 : vector<4x128xf32>
    %cst_19 = arith.constant 2.000000e-01 : f32
    %41 = vector.broadcast %cst_19 : f32 to vector<4x128xf32>
    %42 = arith.mulf %41, %38 : vector<4x128xf32>
    %43 = arith.select %40, %38, %42 : vector<4x128xi1>, vector<4x128xf32>
    %44 = arith.truncf %43 : vector<4x128xf32> to vector<4x128xbf16>
    %c0_20 = arith.constant 0 : index
    %c0_21 = arith.constant 0 : index
    %45 = vector.load %arg4[%c0_20, %c0_21] : memref<4x128xbf16, #tpu.memory_space<vmem>>, vector<4x128xbf16>
    tpu.vector_store %arg4[%c0_20, %c0_21], %44 {strides = array<i32>} : memref<4x128xbf16, #tpu.memory_space<vmem>>, vector<4x128xbf16>,
    return
  }
  func.func @transform_0(%arg0: i32) -> (i32, i32) {
    %c0_i32 = arith.constant 0 : i32
    %c0_i32_0 = arith.constant 0 : i32
    %c0_i32_1 = arith.constant 0 : i32
    return %c0_i32, %c0_i32_0 : i32, i32
  }
  func.func @transform_1(%arg0: i32) -> (i32, i32, i32) {
    %c0_i32 = arith.constant 0 : i32
    %c0_i32_0 = arith.constant 0 : i32
    %c0_i32_1 = arith.constant 0 : i32
    return %c0_i32, %c0_i32_0, %arg0 : i32, i32, i32
  }
  func.func @transform_2(%arg0: i32) -> (i32, i32) {
    %c0_i32 = arith.constant 0 : i32
    %c0_i32_0 = arith.constant 0 : i32
    return %c0_i32, %arg0 : i32, i32
  }
  func.func @transform_3(%arg0: i32) -> (i32, i32) {
    %c0_i32 = arith.constant 0 : i32
    %c0_i32_0 = arith.constant 0 : i32
    return %c0_i32, %arg0 : i32, i32
  }
}

module attributes {stable_mosaic.version = 11 : i64} {
  func.func @kernel(%arg0: i32, %arg1: memref<2x256xbf16, #tpu.memory_space<vmem>>, %arg2: memref<3x128x128xbf16, #tpu.memory_space<vmem>>, %arg3: memref<1x128xf32, #tpu.memory_space<vmem>>, %arg4: memref<2x128xbf16, #tpu.memory_space<vmem>>) attributes {dimension_semantics = [#tpu.dimension_semantics<parallel>], iteration_bounds = array<i64: 1>, scalar_prefetch = 0 : i64, scratch_operands = 0 : i64, tpu.core_type = #tpu.core_type<tc>, window_params = [{pipeline_mode = #tpu.pipeline_mode<synchronous>, transform_indices = @transform_0, window_bounds = array<i64: 2, 256>}, {transform_indices = @transform_1, window_bounds = array<i64: 3, 128, 128>}, {transform_indices = @transform_2, window_bounds = array<i64: 1, 128>}, {transform_indices = @transform_3, window_bounds = array<i64: 2, 128>}]} {
    %c0 = arith.constant 0 : index
    %c0_0 = arith.constant 0 : index
    %0 = vector.load %arg1[%c0, %c0_0] : memref<2x256xbf16, #tpu.memory_space<vmem>>, vector<2x256xbf16>
    %1 = vector.extract_strided_slice %0 {offsets = [0, 0], sizes = [2, 128], strides = [1, 1]} : vector<2x256xbf16> to vector<2x128xbf16>
    %2 = vector.extract_strided_slice %0 {offsets = [0, 128], sizes = [2, 128], strides = [1, 1]} : vector<2x256xbf16> to vector<2x128xbf16>
    %c1 = arith.constant 1 : index
    %c0_1 = arith.constant 0 : index
    %c0_2 = arith.constant 0 : index
    %3 = vector.load %arg2[%c1, %c0_1, %c0_2] : memref<3x128x128xbf16, #tpu.memory_space<vmem>>, vector<1x128x128xbf16>
    %4 = vector.shape_cast %3 : vector<1x128x128xbf16> to vector<128x128xbf16>
    %cst = arith.constant dense<0.000000e+00> : vector<2x128xf32>
    %5 = tpu.matmul %1, %4, %cst {dimension_numbers = #tpu.dot_dimension_numbers<[1], [0], [0], [1], [0, 0, 1, 1], [], []>} : vector<2x128xbf16>, vector<128x128xbf16>, vector<2x128xf32> -> vector<2x128xf32>
    %c2 = arith.constant 2 : index
    %c0_3 = arith.constant 0 : index
    %c0_4 = arith.constant 0 : index
    %6 = vector.load %arg2[%c2, %c0_3, %c0_4] : memref<3x128x128xbf16, #tpu.memory_space<vmem>>, vector<1x128x128xbf16>
    %7 = vector.shape_cast %6 : vector<1x128x128xbf16> to vector<128x128xbf16>
    %cst_5 = arith.constant dense<0.000000e+00> : vector<2x128xf32>
    %8 = tpu.matmul %2, %7, %cst_5 {dimension_numbers = #tpu.dot_dimension_numbers<[1], [0], [0], [1], [0, 0, 1, 1], [], []>} : vector<2x128xbf16>, vector<128x128xbf16>, vector<2x128xf32> -> vector<2x128xf32>
    %9 = arith.addf %5, %8 : vector<2x128xf32>
    %c0_6 = arith.constant 0 : index
    %c0_7 = arith.constant 0 : index
    %10 = vector.load %arg3[%c0_6, %c0_7] : memref<1x128xf32, #tpu.memory_space<vmem>>, vector<1x128xf32>
    %11 = vector.broadcast %10 : vector<1x128xf32> to vector<2x128xf32>
    %12 = arith.addf %9, %11 : vector<2x128xf32>
    %cst_8 = arith.constant 0.000000e+00 : f32
    %13 = vector.broadcast %cst_8 : f32 to vector<2x128xf32>
    %14 = arith.cmpf oge, %12, %13 : vector<2x128xf32>
    %cst_9 = arith.constant 2.000000e-01 : f32
    %15 = vector.broadcast %cst_9 : f32 to vector<2x128xf32>
    %16 = arith.mulf %15, %12 : vector<2x128xf32>
    %17 = arith.select %14, %12, %16 : vector<2x128xi1>, vector<2x128xf32>
    %18 = arith.truncf %17 : vector<2x128xf32> to vector<2x128xbf16>
    %c0_10 = arith.constant 0 : index
    %c0_11 = arith.constant 0 : index
    %19 = vector.load %arg4[%c0_10, %c0_11] : memref<2x128xbf16, #tpu.memory_space<vmem>>, vector<2x128xbf16>
    tpu.vector_store %arg4[%c0_10, %c0_11], %18 {strides = array<i32>} : memref<2x128xbf16, #tpu.memory_space<vmem>>, vector<2x128xbf16>,
    return
  }
  func.func @transform_0(%arg0: i32) -> (i32, i32) {
    %c0_i32 = arith.constant 0 : i32
    %c0_i32_0 = arith.constant 0 : i32
    %c0_i32_1 = arith.constant 0 : i32
    return %c0_i32, %c0_i32_0 : i32, i32
  }
  func.func @transform_1(%arg0: i32) -> (i32, i32, i32) {
    %c0_i32 = arith.constant 0 : i32
    %c0_i32_0 = arith.constant 0 : i32
    %c0_i32_1 = arith.constant 0 : i32
    return %c0_i32, %c0_i32_0, %arg0 : i32, i32, i32
  }
  func.func @transform_2(%arg0: i32) -> (i32, i32) {
    %c0_i32 = arith.constant 0 : i32
    %c0_i32_0 = arith.constant 0 : i32
    return %c0_i32, %arg0 : i32, i32
  }
  func.func @transform_3(%arg0: i32) -> (i32, i32) {
    %c0_i32 = arith.constant 0 : i32
    %c0_i32_0 = arith.constant 0 : i32
    return %c0_i32, %arg0 : i32, i32
  }
}

module attributes {stable_mosaic.version = 11 : i64} {
  func.func @kernel(%arg0: i32, %arg1: i32, %arg2: memref<2x128xbf16, #tpu.memory_space<vmem>>, %arg3: memref<1x2x128x128xbf16, #tpu.memory_space<vmem>>, %arg4: memref<1x128xf32, #tpu.memory_space<vmem>>, %arg5: memref<2x128xbf16, #tpu.memory_space<vmem>>, %arg6: memref<2x128xbf16, #tpu.memory_space<vmem>>) attributes {dimension_semantics = [#tpu.dimension_semantics<parallel>, #tpu.dimension_semantics<parallel>], iteration_bounds = array<i64: 2, 1>, scalar_prefetch = 0 : i64, scratch_operands = 0 : i64, tpu.core_type = #tpu.core_type<tc>, window_params = [{pipeline_mode = #tpu.pipeline_mode<synchronous>, transform_indices = @transform_0, window_bounds = array<i64: 2, 128>}, {transform_indices = @transform_1, window_bounds = array<i64: 1, 2, 128, 128>}, {transform_indices = @transform_2, window_bounds = array<i64: 1, 128>}, {transform_indices = @transform_3, window_bounds = array<i64: 2, 128>}, {transform_indices = @transform_4, window_bounds = array<i64: 2, 128>}]} {
    %c0 = arith.constant 0 : index
    %c0_0 = arith.constant 0 : index
    %0 = vector.load %arg2[%c0, %c0_0] : memref<2x128xbf16, #tpu.memory_space<vmem>>, vector<2x128xbf16>
    %c0_1 = arith.constant 0 : index
    %c0_2 = arith.constant 0 : index
    %c0_3 = arith.constant 0 : index
    %c0_4 = arith.constant 0 : index
    %1 = vector.load %arg3[%c0_1, %c0_2, %c0_3, %c0_4] : memref<1x2x128x128xbf16, #tpu.memory_space<vmem>>, vector<1x1x128x128xbf16>
    %2 = vector.shape_cast %1 : vector<1x1x128x128xbf16> to vector<128x128xbf16>
    %cst = arith.constant dense<0.000000e+00> : vector<2x128xf32>
    %3 = tpu.matmul %0, %2, %cst {dimension_numbers = #tpu.dot_dimension_numbers<[1], [0], [0], [1], [0, 0, 1, 1], [], []>} : vector<2x128xbf16>, vector<128x128xbf16>, vector<2x128xf32> -> vector<2x128xf32>
    %c0_5 = arith.constant 0 : index
    %c0_6 = arith.constant 0 : index
    %4 = vector.load %arg4[%c0_5, %c0_6] : memref<1x128xf32, #tpu.memory_space<vmem>>, vector<1x128xf32>
    %5 = vector.broadcast %4 : vector<1x128xf32> to vector<2x128xf32>
    %6 = arith.addf %3, %5 : vector<2x128xf32>
    %cst_7 = arith.constant 0.000000e+00 : f32
    %7 = vector.broadcast %cst_7 : f32 to vector<2x128xf32>
    %8 = arith.cmpf oge, %6, %7 : vector<2x128xf32>
    %cst_8 = arith.constant 2.000000e-01 : f32
    %9 = vector.broadcast %cst_8 : f32 to vector<2x128xf32>
    %10 = arith.mulf %9, %6 : vector<2x128xf32>
    %11 = arith.select %8, %6, %10 : vector<2x128xi1>, vector<2x128xf32>
    %c0_9 = arith.constant 0 : index
    %c0_10 = arith.constant 0 : index
    %12 = vector.load %arg5[%c0_9, %c0_10] : memref<2x128xbf16, #tpu.memory_space<vmem>>, vector<2x128xbf16>
    %13 = arith.extf %12 : vector<2x128xbf16> to vector<2x128xf32>
    %14 = arith.addf %11, %13 : vector<2x128xf32>
    %15 = arith.truncf %14 : vector<2x128xf32> to vector<2x128xbf16>
    %c0_11 = arith.constant 0 : index
    %c0_12 = arith.constant 0 : index
    %16 = vector.load %arg6[%c0_11, %c0_12] : memref<2x128xbf16, #tpu.memory_space<vmem>>, vector<2x128xbf16>
    tpu.vector_store %arg6[%c0_11, %c0_12], %15 {strides = array<i32>} : memref<2x128xbf16, #tpu.memory_space<vmem>>, vector<2x128xbf16>,
    return
  }
  func.func @transform_0(%arg0: i32, %arg1: i32) -> (i32, i32) {
    %c0_i32 = arith.constant 0 : i32
    %c0_i32_0 = arith.constant 0 : i32
    %c0_i32_1 = arith.constant 0 : i32
    return %c0_i32, %c0_i32_0 : i32, i32
  }
  func.func @transform_1(%arg0: i32, %arg1: i32) -> (i32, i32, i32, i32) {
    %c0_i32 = arith.constant 0 : i32
    %c0_i32_0 = arith.constant 0 : i32
    %c0_i32_1 = arith.constant 0 : i32
    return %arg0, %c0_i32, %c0_i32_0, %arg1 : i32, i32, i32, i32
  }
  func.func @transform_2(%arg0: i32, %arg1: i32) -> (i32, i32) {
    %c0_i32 = arith.constant 0 : i32
    %c0_i32_0 = arith.constant 0 : i32
    return %c0_i32, %arg1 : i32, i32
  }
  func.func @transform_3(%arg0: i32, %arg1: i32) -> (i32, i32) {
    %c1_i32 = arith.constant 1 : i32
    %0 = arith.muli %arg0, %c1_i32 : i32
    %1 = arith.addi %0, %arg1 : i32
    %c0_i32 = arith.constant 0 : i32
    %c0_i32_0 = arith.constant 0 : i32
    return %c0_i32, %1 : i32, i32
  }
  func.func @transform_4(%arg0: i32, %arg1: i32) -> (i32, i32) {
    %c1_i32 = arith.constant 1 : i32
    %0 = arith.muli %arg0, %c1_i32 : i32
    %1 = arith.addi %0, %arg1 : i32
    %c0_i32 = arith.constant 0 : i32
    %c0_i32_0 = arith.constant 0 : i32
    return %c0_i32, %1 : i32, i32
  }
}

module attributes {stable_mosaic.version = 11 : i64} {
  func.func @kernel(%arg0: i32, %arg1: i32, %arg2: memref<4x128xbf16, #tpu.memory_space<vmem>>, %arg3: memref<1x2x128x128xbf16, #tpu.memory_space<vmem>>, %arg4: memref<1x128xf32, #tpu.memory_space<vmem>>, %arg5: memref<4x128xbf16, #tpu.memory_space<vmem>>, %arg6: memref<4x128xbf16, #tpu.memory_space<vmem>>) attributes {dimension_semantics = [#tpu.dimension_semantics<parallel>, #tpu.dimension_semantics<parallel>], iteration_bounds = array<i64: 2, 1>, scalar_prefetch = 0 : i64, scratch_operands = 0 : i64, tpu.core_type = #tpu.core_type<tc>, window_params = [{pipeline_mode = #tpu.pipeline_mode<synchronous>, transform_indices = @transform_0, window_bounds = array<i64: 4, 128>}, {transform_indices = @transform_1, window_bounds = array<i64: 1, 2, 128, 128>}, {transform_indices = @transform_2, window_bounds = array<i64: 1, 128>}, {transform_indices = @transform_3, window_bounds = array<i64: 4, 128>}, {transform_indices = @transform_4, window_bounds = array<i64: 4, 128>}]} {
    %c0 = arith.constant 0 : index
    %c0_0 = arith.constant 0 : index
    %0 = vector.load %arg2[%c0, %c0_0] : memref<4x128xbf16, #tpu.memory_space<vmem>>, vector<4x128xbf16>
    %c0_1 = arith.constant 0 : index
    %c0_2 = arith.constant 0 : index
    %c0_3 = arith.constant 0 : index
    %c0_4 = arith.constant 0 : index
    %1 = vector.load %arg3[%c0_1, %c0_2, %c0_3, %c0_4] : memref<1x2x128x128xbf16, #tpu.memory_space<vmem>>, vector<1x1x128x128xbf16>
    %2 = vector.shape_cast %1 : vector<1x1x128x128xbf16> to vector<128x128xbf16>
    %cst = arith.constant dense<0.000000e+00> : vector<4x128xf32>
    %3 = tpu.matmul %0, %2, %cst {dimension_numbers = #tpu.dot_dimension_numbers<[1], [0], [0], [1], [0, 0, 1, 1], [], []>} : vector<4x128xbf16>, vector<128x128xbf16>, vector<4x128xf32> -> vector<4x128xf32>
    %c0_5 = arith.constant 0 : index
    %c1 = arith.constant 1 : index
    %c0_6 = arith.constant 0 : index
    %c0_7 = arith.constant 0 : index
    %4 = vector.load %arg3[%c0_5, %c1, %c0_6, %c0_7] : memref<1x2x128x128xbf16, #tpu.memory_space<vmem>>, vector<1x1x128x128xbf16>
    %5 = vector.shape_cast %4 : vector<1x1x128x128xbf16> to vector<128x128xbf16>
    %cst_8 = arith.constant dense<0.000000e+00> : vector<4x128xf32>
    %6 = tpu.matmul %0, %5, %cst_8 {dimension_numbers = #tpu.dot_dimension_numbers<[1], [0], [0], [1], [0, 0, 1, 1], [], []>} : vector<4x128xbf16>, vector<128x128xbf16>, vector<4x128xf32> -> vector<4x128xf32>
    %7 = tpu.iota {dimensions = array<i32: 0>} : vector<4x128xi32>
    %c2_i32 = arith.constant 2 : i32
    %c0_i32 = arith.constant 0 : i32
    %8 = arith.cmpi eq, %c2_i32, %c0_i32 : i32
    %c1_i32 = arith.constant 1 : i32
    %9 = arith.select %8, %c1_i32, %c2_i32 : i32
    %10 = vector.broadcast %9 : i32 to vector<4x128xi32>
    %11 = arith.remsi %7, %10 : vector<4x128xi32>
    %c0_i32_9 = arith.constant 0 : i32
    %12 = vector.broadcast %c0_i32_9 : i32 to vector<4x128xi32>
    %13 = arith.cmpi ne, %11, %12 : vector<4x128xi32>
    %c0_i32_10 = arith.constant 0 : i32
    %14 = vector.broadcast %c0_i32_10 : i32 to vector<4x128xi32>
    %15 = arith.cmpi slt, %11, %14 : vector<4x128xi32>
    %c0_i32_11 = arith.constant 0 : i32
    %16 = arith.cmpi slt, %9, %c0_i32_11 : i32
    %17 = vector.broadcast %16 : i1 to vector<4x128xi1>
    %18 = vector.broadcast %17 : vector<4x128xi1> to vector<4x128xi1>
    %19 = arith.xori %15, %18 : vector<4x128xi1>
    %20 = arith.andi %19, %13 : vector<4x128xi1>
    %21 = vector.broadcast %9 : i32 to vector<4x128xi32>
    %22 = arith.addi %11, %21 : vector<4x128xi32>
    %23 = arith.select %20, %22, %11 : vector<4x128xi1>, vector<4x128xi32>
    %c0_i32_12 = arith.constant 0 : i32
    %24 = vector.broadcast %c0_i32_12 : i32 to vector<4x128xi32>
    %25 = arith.cmpi eq, %23, %24 : vector<4x128xi32>
    %c1_i32_13 = arith.constant 1 : i32
    %26 = tpu.dynamic_rotate %6 by %c1_i32_13 dim 0 : vector<4x128xf32>, i32 -> vector<4x128xf32>
    %cst_14 = arith.constant 0.000000e+00 : f32
    %27 = vector.broadcast %cst_14 : f32 to vector<4x128xf32>
    %28 = arith.select %25, %27, %26 : vector<4x128xi1>, vector<4x128xf32>
    %c1_i32_15 = arith.constant 1 : i32
    %29 = vector.broadcast %c1_i32_15 : i32 to vector<4x128xi32>
    %30 = arith.cmpi eq, %23, %29 : vector<4x128xi32>
    %c3_i32 = arith.constant 3 : i32
    %31 = tpu.dynamic_rotate %6 by %c3_i32 dim 0 : vector<4x128xf32>, i32 -> vector<4x128xf32>
    %cst_16 = arith.constant 0.000000e+00 : f32
    %32 = vector.broadcast %cst_16 : f32 to vector<4x128xf32>
    %33 = arith.select %30, %32, %31 : vector<4x128xi1>, vector<4x128xf32>
    %c0_i32_17 = arith.constant 0 : i32
    %34 = arith.cmpi eq, %arg0, %c0_i32_17 : i32
    %35 = arith.select %34, %28, %33 : vector<4x128xf32>
    %36 = arith.addf %3, %35 : vector<4x128xf32>
    %c0_18 = arith.constant 0 : index
    %c0_19 = arith.constant 0 : index
    %37 = vector.load %arg4[%c0_18, %c0_19] : memref<1x128xf32, #tpu.memory_space<vmem>>, vector<1x128xf32>
    %38 = vector.broadcast %37 : vector<1x128xf32> to vector<4x128xf32>
    %39 = arith.addf %36, %38 : vector<4x128xf32>
    %cst_20 = arith.constant 0.000000e+00 : f32
    %40 = vector.broadcast %cst_20 : f32 to vector<4x128xf32>
    %41 = arith.cmpf oge, %39, %40 : vector<4x128xf32>
    %cst_21 = arith.constant 2.000000e-01 : f32
    %42 = vector.broadcast %cst_21 : f32 to vector<4x128xf32>
    %43 = arith.mulf %42, %39 : vector<4x128xf32>
    %44 = arith.select %41, %39, %43 : vector<4x128xi1>, vector<4x128xf32>
    %c0_22 = arith.constant 0 : index
    %c0_23 = arith.constant 0 : index
    %45 = vector.load %arg5[%c0_22, %c0_23] : memref<4x128xbf16, #tpu.memory_space<vmem>>, vector<4x128xbf16>
    %46 = arith.extf %45 : vector<4x128xbf16> to vector<4x128xf32>
    %47 = arith.addf %44, %46 : vector<4x128xf32>
    %48 = arith.truncf %47 : vector<4x128xf32> to vector<4x128xbf16>
    %c0_24 = arith.constant 0 : index
    %c0_25 = arith.constant 0 : index
    %49 = vector.load %arg6[%c0_24, %c0_25] : memref<4x128xbf16, #tpu.memory_space<vmem>>, vector<4x128xbf16>
    tpu.vector_store %arg6[%c0_24, %c0_25], %48 {strides = array<i32>} : memref<4x128xbf16, #tpu.memory_space<vmem>>, vector<4x128xbf16>,
    return
  }
  func.func @transform_0(%arg0: i32, %arg1: i32) -> (i32, i32) {
    %c0_i32 = arith.constant 0 : i32
    %c0_i32_0 = arith.constant 0 : i32
    %c0_i32_1 = arith.constant 0 : i32
    return %c0_i32, %c0_i32_0 : i32, i32
  }
  func.func @transform_1(%arg0: i32, %arg1: i32) -> (i32, i32, i32, i32) {
    %c0_i32 = arith.constant 0 : i32
    %c0_i32_0 = arith.constant 0 : i32
    %c0_i32_1 = arith.constant 0 : i32
    return %arg0, %c0_i32, %c0_i32_0, %arg1 : i32, i32, i32, i32
  }
  func.func @transform_2(%arg0: i32, %arg1: i32) -> (i32, i32) {
    %c0_i32 = arith.constant 0 : i32
    %c0_i32_0 = arith.constant 0 : i32
    return %c0_i32, %arg1 : i32, i32
  }
  func.func @transform_3(%arg0: i32, %arg1: i32) -> (i32, i32) {
    %c1_i32 = arith.constant 1 : i32
    %0 = arith.muli %arg0, %c1_i32 : i32
    %1 = arith.addi %0, %arg1 : i32
    %c0_i32 = arith.constant 0 : i32
    %c0_i32_0 = arith.constant 0 : i32
    return %c0_i32, %1 : i32, i32
  }
  func.func @transform_4(%arg0: i32, %arg1: i32) -> (i32, i32) {
    %c1_i32 = arith.constant 1 : i32
    %0 = arith.muli %arg0, %c1_i32 : i32
    %1 = arith.addi %0, %arg1 : i32
    %c0_i32 = arith.constant 0 : i32
    %c0_i32_0 = arith.constant 0 : i32
    return %c0_i32, %1 : i32, i32
  }
}

module attributes {stable_mosaic.version = 11 : i64} {
  func.func @kernel(%arg0: i32, %arg1: i32, %arg2: memref<8x128xbf16, #tpu.memory_space<vmem>>, %arg3: memref<1x2x128x128xbf16, #tpu.memory_space<vmem>>, %arg4: memref<1x128xf32, #tpu.memory_space<vmem>>, %arg5: memref<8x128xbf16, #tpu.memory_space<vmem>>, %arg6: memref<8x128xbf16, #tpu.memory_space<vmem>>) attributes {dimension_semantics = [#tpu.dimension_semantics<parallel>, #tpu.dimension_semantics<parallel>], iteration_bounds = array<i64: 2, 1>, scalar_prefetch = 0 : i64, scratch_operands = 0 : i64, tpu.core_type = #tpu.core_type<tc>, window_params = [{pipeline_mode = #tpu.pipeline_mode<synchronous>, transform_indices = @transform_0, window_bounds = array<i64: 8, 128>}, {transform_indices = @transform_1, window_bounds = array<i64: 1, 2, 128, 128>}, {transform_indices = @transform_2, window_bounds = array<i64: 1, 128>}, {transform_indices = @transform_3, window_bounds = array<i64: 8, 128>}, {transform_indices = @transform_4, window_bounds = array<i64: 8, 128>}]} {
    %c0 = arith.constant 0 : index
    %c0_0 = arith.constant 0 : index
    %0 = vector.load %arg2[%c0, %c0_0] : memref<8x128xbf16, #tpu.memory_space<vmem>>, vector<8x128xbf16>
    %c0_1 = arith.constant 0 : index
    %c0_2 = arith.constant 0 : index
    %c0_3 = arith.constant 0 : index
    %c0_4 = arith.constant 0 : index
    %1 = vector.load %arg3[%c0_1, %c0_2, %c0_3, %c0_4] : memref<1x2x128x128xbf16, #tpu.memory_space<vmem>>, vector<1x1x128x128xbf16>
    %2 = vector.shape_cast %1 : vector<1x1x128x128xbf16> to vector<128x128xbf16>
    %cst = arith.constant dense<0.000000e+00> : vector<8x128xf32>
    %3 = tpu.matmul %0, %2, %cst {dimension_numbers = #tpu.dot_dimension_numbers<[1], [0], [0], [1], [0, 0, 1, 1], [], []>} : vector<8x128xbf16>, vector<128x128xbf16>, vector<8x128xf32> -> vector<8x128xf32>
    %c0_5 = arith.constant 0 : index
    %c1 = arith.constant 1 : index
    %c0_6 = arith.constant 0 : index
    %c0_7 = arith.constant 0 : index
    %4 = vector.load %arg3[%c0_5, %c1, %c0_6, %c0_7] : memref<1x2x128x128xbf16, #tpu.memory_space<vmem>>, vector<1x1x128x128xbf16>
    %5 = vector.shape_cast %4 : vector<1x1x128x128xbf16> to vector<128x128xbf16>
    %cst_8 = arith.constant dense<0.000000e+00> : vector<8x128xf32>
    %6 = tpu.matmul %0, %5, %cst_8 {dimension_numbers = #tpu.dot_dimension_numbers<[1], [0], [0], [1], [0, 0, 1, 1], [], []>} : vector<8x128xbf16>, vector<128x128xbf16>, vector<8x128xf32> -> vector<8x128xf32>
    %7 = tpu.iota {dimensions = array<i32: 0>} : vector<8x128xi32>
    %c4_i32 = arith.constant 4 : i32
    %c0_i32 = arith.constant 0 : i32
    %8 = arith.cmpi eq, %c4_i32, %c0_i32 : i32
    %c1_i32 = arith.constant 1 : i32
    %9 = arith.select %8, %c1_i32, %c4_i32 : i32
    %10 = vector.broadcast %9 : i32 to vector<8x128xi32>
    %11 = arith.remsi %7, %10 : vector<8x128xi32>
    %c0_i32_9 = arith.constant 0 : i32
    %12 = vector.broadcast %c0_i32_9 : i32 to vector<8x128xi32>
    %13 = arith.cmpi ne, %11, %12 : vector<8x128xi32>
    %c0_i32_10 = arith.constant 0 : i32
    %14 = vector.broadcast %c0_i32_10 : i32 to vector<8x128xi32>
    %15 = arith.cmpi slt, %11, %14 : vector<8x128xi32>
    %c0_i32_11 = arith.constant 0 : i32
    %16 = arith.cmpi slt, %9, %c0_i32_11 : i32
    %17 = vector.broadcast %16 : i1 to vector<8x128xi1>
    %18 = vector.broadcast %17 : vector<8x128xi1> to vector<8x128xi1>
    %19 = arith.xori %15, %18 : vector<8x128xi1>
    %20 = arith.andi %19, %13 : vector<8x128xi1>
    %21 = vector.broadcast %9 : i32 to vector<8x128xi32>
    %22 = arith.addi %11, %21 : vector<8x128xi32>
    %23 = arith.select %20, %22, %11 : vector<8x128xi1>, vector<8x128xi32>
    %c0_i32_12 = arith.constant 0 : i32
    %24 = vector.broadcast %c0_i32_12 : i32 to vector<8x128xi32>
    %25 = arith.cmpi eq, %23, %24 : vector<8x128xi32>
    %c1_i32_13 = arith.constant 1 : i32
    %26 = tpu.dynamic_rotate %6 by %c1_i32_13 dim 0 : vector<8x128xf32>, i32 -> vector<8x128xf32>
    %cst_14 = arith.constant 0.000000e+00 : f32
    %27 = vector.broadcast %cst_14 : f32 to vector<8x128xf32>
    %28 = arith.select %25, %27, %26 : vector<8x128xi1>, vector<8x128xf32>
    %c3_i32 = arith.constant 3 : i32
    %29 = vector.broadcast %c3_i32 : i32 to vector<8x128xi32>
    %30 = arith.cmpi eq, %23, %29 : vector<8x128xi32>
    %c7_i32 = arith.constant 7 : i32
    %31 = tpu.dynamic_rotate %6 by %c7_i32 dim 0 : vector<8x128xf32>, i32 -> vector<8x128xf32>
    %cst_15 = arith.constant 0.000000e+00 : f32
    %32 = vector.broadcast %cst_15 : f32 to vector<8x128xf32>
    %33 = arith.select %30, %32, %31 : vector<8x128xi1>, vector<8x128xf32>
    %c0_i32_16 = arith.constant 0 : i32
    %34 = arith.cmpi eq, %arg0, %c0_i32_16 : i32
    %35 = arith.select %34, %28, %33 : vector<8x128xf32>
    %36 = arith.addf %3, %35 : vector<8x128xf32>
    %c0_17 = arith.constant 0 : index
    %c0_18 = arith.constant 0 : index
    %37 = vector.load %arg4[%c0_17, %c0_18] : memref<1x128xf32, #tpu.memory_space<vmem>>, vector<1x128xf32>
    %38 = vector.broadcast %37 : vector<1x128xf32> to vector<8x128xf32>
    %39 = arith.addf %36, %38 : vector<8x128xf32>
    %cst_19 = arith.constant 0.000000e+00 : f32
    %40 = vector.broadcast %cst_19 : f32 to vector<8x128xf32>
    %41 = arith.cmpf oge, %39, %40 : vector<8x128xf32>
    %cst_20 = arith.constant 2.000000e-01 : f32
    %42 = vector.broadcast %cst_20 : f32 to vector<8x128xf32>
    %43 = arith.mulf %42, %39 : vector<8x128xf32>
    %44 = arith.select %41, %39, %43 : vector<8x128xi1>, vector<8x128xf32>
    %c0_21 = arith.constant 0 : index
    %c0_22 = arith.constant 0 : index
    %45 = vector.load %arg5[%c0_21, %c0_22] : memref<8x128xbf16, #tpu.memory_space<vmem>>, vector<8x128xbf16>
    %46 = arith.extf %45 : vector<8x128xbf16> to vector<8x128xf32>
    %47 = arith.addf %44, %46 : vector<8x128xf32>
    %48 = arith.truncf %47 : vector<8x128xf32> to vector<8x128xbf16>
    %c0_23 = arith.constant 0 : index
    %c0_24 = arith.constant 0 : index
    %49 = vector.load %arg6[%c0_23, %c0_24] : memref<8x128xbf16, #tpu.memory_space<vmem>>, vector<8x128xbf16>
    tpu.vector_store %arg6[%c0_23, %c0_24], %48 {strides = array<i32>} : memref<8x128xbf16, #tpu.memory_space<vmem>>, vector<8x128xbf16>,
    return
  }
  func.func @transform_0(%arg0: i32, %arg1: i32) -> (i32, i32) {
    %c0_i32 = arith.constant 0 : i32
    %c0_i32_0 = arith.constant 0 : i32
    %c0_i32_1 = arith.constant 0 : i32
    return %c0_i32, %c0_i32_0 : i32, i32
  }
  func.func @transform_1(%arg0: i32, %arg1: i32) -> (i32, i32, i32, i32) {
    %c0_i32 = arith.constant 0 : i32
    %c0_i32_0 = arith.constant 0 : i32
    %c0_i32_1 = arith.constant 0 : i32
    return %arg0, %c0_i32, %c0_i32_0, %arg1 : i32, i32, i32, i32
  }
  func.func @transform_2(%arg0: i32, %arg1: i32) -> (i32, i32) {
    %c0_i32 = arith.constant 0 : i32
    %c0_i32_0 = arith.constant 0 : i32
    return %c0_i32, %arg1 : i32, i32
  }
  func.func @transform_3(%arg0: i32, %arg1: i32) -> (i32, i32) {
    %c1_i32 = arith.constant 1 : i32
    %0 = arith.muli %arg0, %c1_i32 : i32
    %1 = arith.addi %0, %arg1 : i32
    %c0_i32 = arith.constant 0 : i32
    %c0_i32_0 = arith.constant 0 : i32
    return %c0_i32, %1 : i32, i32
  }
  func.func @transform_4(%arg0: i32, %arg1: i32) -> (i32, i32) {
    %c1_i32 = arith.constant 1 : i32
    %0 = arith.muli %arg0, %c1_i32 : i32
    %1 = arith.addi %0, %arg1 : i32
    %c0_i32 = arith.constant 0 : i32
    %c0_i32_0 = arith.constant 0 : i32
    return %c0_i32, %1 : i32, i32
  }
}

module attributes {stable_mosaic.version = 11 : i64} {
  func.func @kernel(%arg0: i32, %arg1: i32, %arg2: memref<16x128xbf16, #tpu.memory_space<vmem>>, %arg3: memref<1x2x128x128xbf16, #tpu.memory_space<vmem>>, %arg4: memref<1x128xf32, #tpu.memory_space<vmem>>, %arg5: memref<16x128xbf16, #tpu.memory_space<vmem>>, %arg6: memref<16x128xbf16, #tpu.memory_space<vmem>>) attributes {dimension_semantics = [#tpu.dimension_semantics<parallel>, #tpu.dimension_semantics<parallel>], iteration_bounds = array<i64: 2, 1>, scalar_prefetch = 0 : i64, scratch_operands = 0 : i64, tpu.core_type = #tpu.core_type<tc>, window_params = [{pipeline_mode = #tpu.pipeline_mode<synchronous>, transform_indices = @transform_0, window_bounds = array<i64: 16, 128>}, {transform_indices = @transform_1, window_bounds = array<i64: 1, 2, 128, 128>}, {transform_indices = @transform_2, window_bounds = array<i64: 1, 128>}, {transform_indices = @transform_3, window_bounds = array<i64: 16, 128>}, {transform_indices = @transform_4, window_bounds = array<i64: 16, 128>}]} {
    %c0 = arith.constant 0 : index
    %c0_0 = arith.constant 0 : index
    %0 = vector.load %arg2[%c0, %c0_0] : memref<16x128xbf16, #tpu.memory_space<vmem>>, vector<16x128xbf16>
    %c0_1 = arith.constant 0 : index
    %c0_2 = arith.constant 0 : index
    %c0_3 = arith.constant 0 : index
    %c0_4 = arith.constant 0 : index
    %1 = vector.load %arg3[%c0_1, %c0_2, %c0_3, %c0_4] : memref<1x2x128x128xbf16, #tpu.memory_space<vmem>>, vector<1x1x128x128xbf16>
    %2 = vector.shape_cast %1 : vector<1x1x128x128xbf16> to vector<128x128xbf16>
    %cst = arith.constant dense<0.000000e+00> : vector<16x128xf32>
    %3 = tpu.matmul %0, %2, %cst {dimension_numbers = #tpu.dot_dimension_numbers<[1], [0], [0], [1], [0, 0, 1, 1], [], []>} : vector<16x128xbf16>, vector<128x128xbf16>, vector<16x128xf32> -> vector<16x128xf32>
    %c0_5 = arith.constant 0 : index
    %c1 = arith.constant 1 : index
    %c0_6 = arith.constant 0 : index
    %c0_7 = arith.constant 0 : index
    %4 = vector.load %arg3[%c0_5, %c1, %c0_6, %c0_7] : memref<1x2x128x128xbf16, #tpu.memory_space<vmem>>, vector<1x1x128x128xbf16>
    %5 = vector.shape_cast %4 : vector<1x1x128x128xbf16> to vector<128x128xbf16>
    %cst_8 = arith.constant dense<0.000000e+00> : vector<16x128xf32>
    %6 = tpu.matmul %0, %5, %cst_8 {dimension_numbers = #tpu.dot_dimension_numbers<[1], [0], [0], [1], [0, 0, 1, 1], [], []>} : vector<16x128xbf16>, vector<128x128xbf16>, vector<16x128xf32> -> vector<16x128xf32>
    %7 = tpu.iota {dimensions = array<i32: 0>} : vector<16x128xi32>
    %c8_i32 = arith.constant 8 : i32
    %c0_i32 = arith.constant 0 : i32
    %8 = arith.cmpi eq, %c8_i32, %c0_i32 : i32
    %c1_i32 = arith.constant 1 : i32
    %9 = arith.select %8, %c1_i32, %c8_i32 : i32
    %10 = vector.broadcast %9 : i32 to vector<16x128xi32>
    %11 = arith.remsi %7, %10 : vector<16x128xi32>
    %c0_i32_9 = arith.constant 0 : i32
    %12 = vector.broadcast %c0_i32_9 : i32 to vector<16x128xi32>
    %13 = arith.cmpi ne, %11, %12 : vector<16x128xi32>
    %c0_i32_10 = arith.constant 0 : i32
    %14 = vector.broadcast %c0_i32_10 : i32 to vector<16x128xi32>
    %15 = arith.cmpi slt, %11, %14 : vector<16x128xi32>
    %c0_i32_11 = arith.constant 0 : i32
    %16 = arith.cmpi slt, %9, %c0_i32_11 : i32
    %17 = vector.broadcast %16 : i1 to vector<16x128xi1>
    %18 = vector.broadcast %17 : vector<16x128xi1> to vector<16x128xi1>
    %19 = arith.xori %15, %18 : vector<16x128xi1>
    %20 = arith.andi %19, %13 : vector<16x128xi1>
    %21 = vector.broadcast %9 : i32 to vector<16x128xi32>
    %22 = arith.addi %11, %21 : vector<16x128xi32>
    %23 = arith.select %20, %22, %11 : vector<16x128xi1>, vector<16x128xi32>
    %c0_i32_12 = arith.constant 0 : i32
    %24 = vector.broadcast %c0_i32_12 : i32 to vector<16x128xi32>
    %25 = arith.cmpi eq, %23, %24 : vector<16x128xi32>
    %c1_i32_13 = arith.constant 1 : i32
    %26 = tpu.dynamic_rotate %6 by %c1_i32_13 dim 0 : vector<16x128xf32>, i32 -> vector<16x128xf32>
    %cst_14 = arith.constant 0.000000e+00 : f32
    %27 = vector.broadcast %cst_14 : f32 to vector<16x128xf32>
    %28 = arith.select %25, %27, %26 : vector<16x128xi1>, vector<16x128xf32>
    %c7_i32 = arith.constant 7 : i32
    %29 = vector.broadcast %c7_i32 : i32 to vector<16x128xi32>
    %30 = arith.cmpi eq, %23, %29 : vector<16x128xi32>
    %c15_i32 = arith.constant 15 : i32
    %31 = tpu.dynamic_rotate %6 by %c15_i32 dim 0 : vector<16x128xf32>, i32 -> vector<16x128xf32>
    %cst_15 = arith.constant 0.000000e+00 : f32
    %32 = vector.broadcast %cst_15 : f32 to vector<16x128xf32>
    %33 = arith.select %30, %32, %31 : vector<16x128xi1>, vector<16x128xf32>
    %c0_i32_16 = arith.constant 0 : i32
    %34 = arith.cmpi eq, %arg0, %c0_i32_16 : i32
    %35 = arith.select %34, %28, %33 : vector<16x128xf32>
    %36 = arith.addf %3, %35 : vector<16x128xf32>
    %c0_17 = arith.constant 0 : index
    %c0_18 = arith.constant 0 : index
    %37 = vector.load %arg4[%c0_17, %c0_18] : memref<1x128xf32, #tpu.memory_space<vmem>>, vector<1x128xf32>
    %38 = vector.broadcast %37 : vector<1x128xf32> to vector<16x128xf32>
    %39 = arith.addf %36, %38 : vector<16x128xf32>
    %cst_19 = arith.constant 0.000000e+00 : f32
    %40 = vector.broadcast %cst_19 : f32 to vector<16x128xf32>
    %41 = arith.cmpf oge, %39, %40 : vector<16x128xf32>
    %cst_20 = arith.constant 2.000000e-01 : f32
    %42 = vector.broadcast %cst_20 : f32 to vector<16x128xf32>
    %43 = arith.mulf %42, %39 : vector<16x128xf32>
    %44 = arith.select %41, %39, %43 : vector<16x128xi1>, vector<16x128xf32>
    %c0_21 = arith.constant 0 : index
    %c0_22 = arith.constant 0 : index
    %45 = vector.load %arg5[%c0_21, %c0_22] : memref<16x128xbf16, #tpu.memory_space<vmem>>, vector<16x128xbf16>
    %46 = arith.extf %45 : vector<16x128xbf16> to vector<16x128xf32>
    %47 = arith.addf %44, %46 : vector<16x128xf32>
    %48 = arith.truncf %47 : vector<16x128xf32> to vector<16x128xbf16>
    %c0_23 = arith.constant 0 : index
    %c0_24 = arith.constant 0 : index
    %49 = vector.load %arg6[%c0_23, %c0_24] : memref<16x128xbf16, #tpu.memory_space<vmem>>, vector<16x128xbf16>
    tpu.vector_store %arg6[%c0_23, %c0_24], %48 {strides = array<i32>} : memref<16x128xbf16, #tpu.memory_space<vmem>>, vector<16x128xbf16>,
    return
  }
  func.func @transform_0(%arg0: i32, %arg1: i32) -> (i32, i32) {
    %c0_i32 = arith.constant 0 : i32
    %c0_i32_0 = arith.constant 0 : i32
    %c0_i32_1 = arith.constant 0 : i32
    return %c0_i32, %c0_i32_0 : i32, i32
  }
  func.func @transform_1(%arg0: i32, %arg1: i32) -> (i32, i32, i32, i32) {
    %c0_i32 = arith.constant 0 : i32
    %c0_i32_0 = arith.constant 0 : i32
    %c0_i32_1 = arith.constant 0 : i32
    return %arg0, %c0_i32, %c0_i32_0, %arg1 : i32, i32, i32, i32
  }
  func.func @transform_2(%arg0: i32, %arg1: i32) -> (i32, i32) {
    %c0_i32 = arith.constant 0 : i32
    %c0_i32_0 = arith.constant 0 : i32
    return %c0_i32, %arg1 : i32, i32
  }
  func.func @transform_3(%arg0: i32, %arg1: i32) -> (i32, i32) {
    %c1_i32 = arith.constant 1 : i32
    %0 = arith.muli %arg0, %c1_i32 : i32
    %1 = arith.addi %0, %arg1 : i32
    %c0_i32 = arith.constant 0 : i32
    %c0_i32_0 = arith.constant 0 : i32
    return %c0_i32, %1 : i32, i32
  }
  func.func @transform_4(%arg0: i32, %arg1: i32) -> (i32, i32) {
    %c1_i32 = arith.constant 1 : i32
    %0 = arith.muli %arg0, %c1_i32 : i32
    %1 = arith.addi %0, %arg1 : i32
    %c0_i32 = arith.constant 0 : i32
    %c0_i32_0 = arith.constant 0 : i32
    return %c0_i32, %1 : i32, i32
  }
}

module attributes {stable_mosaic.version = 11 : i64} {
  func.func @kernel(%arg0: i32, %arg1: i32, %arg2: memref<32x128xbf16, #tpu.memory_space<vmem>>, %arg3: memref<1x2x128x128xbf16, #tpu.memory_space<vmem>>, %arg4: memref<1x128xf32, #tpu.memory_space<vmem>>, %arg5: memref<32x128xbf16, #tpu.memory_space<vmem>>) attributes {dimension_semantics = [#tpu.dimension_semantics<parallel>, #tpu.dimension_semantics<parallel>], iteration_bounds = array<i64: 2, 1>, scalar_prefetch = 0 : i64, scratch_operands = 0 : i64, tpu.core_type = #tpu.core_type<tc>, window_params = [{pipeline_mode = #tpu.pipeline_mode<synchronous>, transform_indices = @transform_0, window_bounds = array<i64: 32, 128>}, {transform_indices = @transform_1, window_bounds = array<i64: 1, 2, 128, 128>}, {transform_indices = @transform_2, window_bounds = array<i64: 1, 128>}, {transform_indices = @transform_3, window_bounds = array<i64: 32, 128>}]} {
    %c0 = arith.constant 0 : index
    %c0_0 = arith.constant 0 : index
    %0 = vector.load %arg2[%c0, %c0_0] : memref<32x128xbf16, #tpu.memory_space<vmem>>, vector<32x128xbf16>
    %c0_1 = arith.constant 0 : index
    %c0_2 = arith.constant 0 : index
    %c0_3 = arith.constant 0 : index
    %c0_4 = arith.constant 0 : index
    %1 = vector.load %arg3[%c0_1, %c0_2, %c0_3, %c0_4] : memref<1x2x128x128xbf16, #tpu.memory_space<vmem>>, vector<1x1x128x128xbf16>
    %2 = vector.shape_cast %1 : vector<1x1x128x128xbf16> to vector<128x128xbf16>
    %cst = arith.constant dense<0.000000e+00> : vector<32x128xf32>
    %3 = tpu.matmul %0, %2, %cst {dimension_numbers = #tpu.dot_dimension_numbers<[1], [0], [0], [1], [0, 0, 1, 1], [], []>} : vector<32x128xbf16>, vector<128x128xbf16>, vector<32x128xf32> -> vector<32x128xf32>
    %c0_5 = arith.constant 0 : index
    %c1 = arith.constant 1 : index
    %c0_6 = arith.constant 0 : index
    %c0_7 = arith.constant 0 : index
    %4 = vector.load %arg3[%c0_5, %c1, %c0_6, %c0_7] : memref<1x2x128x128xbf16, #tpu.memory_space<vmem>>, vector<1x1x128x128xbf16>
    %5 = vector.shape_cast %4 : vector<1x1x128x128xbf16> to vector<128x128xbf16>
    %cst_8 = arith.constant dense<0.000000e+00> : vector<32x128xf32>
    %6 = tpu.matmul %0, %5, %cst_8 {dimension_numbers = #tpu.dot_dimension_numbers<[1], [0], [0], [1], [0, 0, 1, 1], [], []>} : vector<32x128xbf16>, vector<128x128xbf16>, vector<32x128xf32> -> vector<32x128xf32>
    %7 = tpu.iota {dimensions = array<i32: 0>} : vector<32x128xi32>
    %c16_i32 = arith.constant 16 : i32
    %c0_i32 = arith.constant 0 : i32
    %8 = arith.cmpi eq, %c16_i32, %c0_i32 : i32
    %c1_i32 = arith.constant 1 : i32
    %9 = arith.select %8, %c1_i32, %c16_i32 : i32
    %10 = vector.broadcast %9 : i32 to vector<32x128xi32>
    %11 = arith.remsi %7, %10 : vector<32x128xi32>
    %c0_i32_9 = arith.constant 0 : i32
    %12 = vector.broadcast %c0_i32_9 : i32 to vector<32x128xi32>
    %13 = arith.cmpi ne, %11, %12 : vector<32x128xi32>
    %c0_i32_10 = arith.constant 0 : i32
    %14 = vector.broadcast %c0_i32_10 : i32 to vector<32x128xi32>
    %15 = arith.cmpi slt, %11, %14 : vector<32x128xi32>
    %c0_i32_11 = arith.constant 0 : i32
    %16 = arith.cmpi slt, %9, %c0_i32_11 : i32
    %17 = vector.broadcast %16 : i1 to vector<32x128xi1>
    %18 = vector.broadcast %17 : vector<32x128xi1> to vector<32x128xi1>
    %19 = arith.xori %15, %18 : vector<32x128xi1>
    %20 = arith.andi %19, %13 : vector<32x128xi1>
    %21 = vector.broadcast %9 : i32 to vector<32x128xi32>
    %22 = arith.addi %11, %21 : vector<32x128xi32>
    %23 = arith.select %20, %22, %11 : vector<32x128xi1>, vector<32x128xi32>
    %c0_i32_12 = arith.constant 0 : i32
    %24 = vector.broadcast %c0_i32_12 : i32 to vector<32x128xi32>
    %25 = arith.cmpi eq, %23, %24 : vector<32x128xi32>
    %c1_i32_13 = arith.constant 1 : i32
    %26 = tpu.dynamic_rotate %6 by %c1_i32_13 dim 0 : vector<32x128xf32>, i32 -> vector<32x128xf32>
    %cst_14 = arith.constant 0.000000e+00 : f32
    %27 = vector.broadcast %cst_14 : f32 to vector<32x128xf32>
    %28 = arith.select %25, %27, %26 : vector<32x128xi1>, vector<32x128xf32>
    %c15_i32 = arith.constant 15 : i32
    %29 = vector.broadcast %c15_i32 : i32 to vector<32x128xi32>
    %30 = arith.cmpi eq, %23, %29 : vector<32x128xi32>
    %c31_i32 = arith.constant 31 : i32
    %31 = tpu.dynamic_rotate %6 by %c31_i32 dim 0 : vector<32x128xf32>, i32 -> vector<32x128xf32>
    %cst_15 = arith.constant 0.000000e+00 : f32
    %32 = vector.broadcast %cst_15 : f32 to vector<32x128xf32>
    %33 = arith.select %30, %32, %31 : vector<32x128xi1>, vector<32x128xf32>
    %c0_i32_16 = arith.constant 0 : i32
    %34 = arith.cmpi eq, %arg0, %c0_i32_16 : i32
    %35 = arith.select %34, %28, %33 : vector<32x128xf32>
    %36 = arith.addf %3, %35 : vector<32x128xf32>
    %c0_17 = arith.constant 0 : index
    %c0_18 = arith.constant 0 : index
    %37 = vector.load %arg4[%c0_17, %c0_18] : memref<1x128xf32, #tpu.memory_space<vmem>>, vector<1x128xf32>
    %38 = vector.broadcast %37 : vector<1x128xf32> to vector<32x128xf32>
    %39 = arith.addf %36, %38 : vector<32x128xf32>
    %cst_19 = arith.constant 0.000000e+00 : f32
    %40 = vector.broadcast %cst_19 : f32 to vector<32x128xf32>
    %41 = arith.cmpf oge, %39, %40 : vector<32x128xf32>
    %cst_20 = arith.constant 2.000000e-01 : f32
    %42 = vector.broadcast %cst_20 : f32 to vector<32x128xf32>
    %43 = arith.mulf %42, %39 : vector<32x128xf32>
    %44 = arith.select %41, %39, %43 : vector<32x128xi1>, vector<32x128xf32>
    %45 = arith.truncf %44 : vector<32x128xf32> to vector<32x128xbf16>
    %c0_21 = arith.constant 0 : index
    %c0_22 = arith.constant 0 : index
    %46 = vector.load %arg5[%c0_21, %c0_22] : memref<32x128xbf16, #tpu.memory_space<vmem>>, vector<32x128xbf16>
    tpu.vector_store %arg5[%c0_21, %c0_22], %45 {strides = array<i32>} : memref<32x128xbf16, #tpu.memory_space<vmem>>, vector<32x128xbf16>,
    return
  }
  func.func @transform_0(%arg0: i32, %arg1: i32) -> (i32, i32) {
    %c0_i32 = arith.constant 0 : i32
    %c0_i32_0 = arith.constant 0 : i32
    %c0_i32_1 = arith.constant 0 : i32
    return %c0_i32, %c0_i32_0 : i32, i32
  }
  func.func @transform_1(%arg0: i32, %arg1: i32) -> (i32, i32, i32, i32) {
    %c0_i32 = arith.constant 0 : i32
    %c0_i32_0 = arith.constant 0 : i32
    %c0_i32_1 = arith.constant 0 : i32
    return %arg0, %c0_i32, %c0_i32_0, %arg1 : i32, i32, i32, i32
  }
  func.func @transform_2(%arg0: i32, %arg1: i32) -> (i32, i32) {
    %c0_i32 = arith.constant 0 : i32
    %c0_i32_0 = arith.constant 0 : i32
    return %c0_i32, %arg1 : i32, i32
  }
  func.func @transform_3(%arg0: i32, %arg1: i32) -> (i32, i32) {
    %c1_i32 = arith.constant 1 : i32
    %0 = arith.muli %arg0, %c1_i32 : i32
    %1 = arith.addi %0, %arg1 : i32
    %c0_i32 = arith.constant 0 : i32
    %c0_i32_0 = arith.constant 0 : i32
    return %c0_i32, %1 : i32, i32
  }
}

module attributes {stable_mosaic.version = 11 : i64} {
  func.func @kernel(%arg0: i32, %arg1: i32, %arg2: memref<1x64x128xbf16, #tpu.memory_space<vmem>>, %arg3: memref<128x512xbf16, #tpu.memory_space<vmem>>, %arg4: memref<1x512xf32, #tpu.memory_space<vmem>>, %arg5: memref<1x64x512xf32, #tpu.memory_space<vmem>>) attributes {dimension_semantics = [#tpu.dimension_semantics<parallel>, #tpu.dimension_semantics<parallel>], iteration_bounds = array<i64: 1, 1>, scalar_prefetch = 0 : i64, scratch_operands = 0 : i64, tpu.core_type = #tpu.core_type<tc>, window_params = [{transform_indices = @transform_0, window_bounds = array<i64: 1, 64, 128>}, {transform_indices = @transform_1, window_bounds = array<i64: 128, 512>}, {transform_indices = @transform_2, window_bounds = array<i64: 1, 512>}, {transform_indices = @transform_3, window_bounds = array<i64: 1, 64, 512>}]} {
    %c0 = arith.constant 0 : index
    %c0_0 = arith.constant 0 : index
    %c0_1 = arith.constant 0 : index
    %0 = vector.load %arg2[%c0, %c0_0, %c0_1] : memref<1x64x128xbf16, #tpu.memory_space<vmem>>, vector<1x64x128xbf16>
    %1 = vector.shape_cast %0 : vector<1x64x128xbf16> to vector<64x128xbf16>
    %c0_2 = arith.constant 0 : index
    %c0_3 = arith.constant 0 : index
    %2 = vector.load %arg3[%c0_2, %c0_3] : memref<128x512xbf16, #tpu.memory_space<vmem>>, vector<128x512xbf16>
    %cst = arith.constant dense<0.000000e+00> : vector<64x512xf32>
    %3 = tpu.matmul %1, %2, %cst {dimension_numbers = #tpu.dot_dimension_numbers<[1], [0], [0], [1], [0, 0, 1, 1], [], []>} : vector<64x128xbf16>, vector<128x512xbf16>, vector<64x512xf32> -> vector<64x512xf32>
    %c0_4 = arith.constant 0 : index
    %c0_5 = arith.constant 0 : index
    %4 = vector.load %arg4[%c0_4, %c0_5] : memref<1x512xf32, #tpu.memory_space<vmem>>, vector<1x512xf32>
    %5 = vector.broadcast %4 : vector<1x512xf32> to vector<64x512xf32>
    %6 = arith.addf %3, %5 : vector<64x512xf32>
    %c0_6 = arith.constant 0 : index
    %c0_7 = arith.constant 0 : index
    %c0_8 = arith.constant 0 : index
    %7 = vector.load %arg5[%c0_6, %c0_7, %c0_8] : memref<1x64x512xf32, #tpu.memory_space<vmem>>, vector<1x64x512xf32>
    %8 = vector.shape_cast %7 : vector<1x64x512xf32> to vector<64x512xf32>
    %9 = vector.shape_cast %6 : vector<64x512xf32> to vector<1x64x512xf32>
    tpu.vector_store %arg5[%c0_6, %c0_7, %c0_8], %9 {strides = array<i32>} : memref<1x64x512xf32, #tpu.memory_space<vmem>>, vector<1x64x512xf32>,
    return
  }
  func.func @transform_0(%arg0: i32, %arg1: i32) -> (i32, i32, i32) {
    %c0_i32 = arith.constant 0 : i32
    %c0_i32_0 = arith.constant 0 : i32
    %c0_i32_1 = arith.constant 0 : i32
    return %arg1, %c0_i32, %c0_i32_0 : i32, i32, i32
  }
  func.func @transform_1(%arg0: i32, %arg1: i32) -> (i32, i32) {
    %c0_i32 = arith.constant 0 : i32
    %c0_i32_0 = arith.constant 0 : i32
    return %c0_i32, %arg0 : i32, i32
  }
  func.func @transform_2(%arg0: i32, %arg1: i32) -> (i32, i32) {
    %c0_i32 = arith.constant 0 : i32
    %c0_i32_0 = arith.constant 0 : i32
    return %c0_i32, %arg0 : i32, i32
  }
  func.func @transform_3(%arg0: i32, %arg1: i32) -> (i32, i32, i32) {
    %c0_i32 = arith.constant 0 : i32
    %c0_i32_0 = arith.constant 0 : i32
    return %arg1, %c0_i32, %arg0 : i32, i32, i32
  }
}

</mosaic_0001>

<bundles_post_ra>
// kernel: unet_forward.12
= control target key start
LH: loop header
LB: loop body
LE: loop exit
PB: predicated region body
PF: predicated region fallthrough
CT: control target
= control target key end

     0   :  { %s664_s15 = smov 0   ;;  %s666_s16 = smov 0   ;;  %s739_s0 = inlined_call_operand.vmem [shape: bf16[2,32,128], index: 0, kind: input, shape index: {}]   ;;  %s740_s1 = inlined_call_operand.vmem [shape: bf16[128,128], index: 1, kind: input, shape index: {}]   ;;  %s741_s2 = inlined_call_operand.vmem [shape: f32[1,128], index: 2, kind: input, shape index: {}]   ;;  %s742_s3 = inlined_call_operand.vmem [shape: f32[1,32,128], index: 3, kind: input, shape index: {}]   ;;  %s743_s4 = inlined_call_operand.vmem [shape: bf16[2,32,128], index: 4, kind: output, shape index: {}]  }
   0x1   :  { %s668_s17 = smov 0  }
   0x2 LB: > { %s23_s18 = sadd.s32 1, %s633_s16  ;;  %p512_p0 = scmp.ge.s32.totalorder %s637_s17, 1  ;;  %s637_s17 = sphi %s668_s17, %s14_s17   ;;  %s633_s16 = sphi %s666_s16, %s745_s16   ;;  %s629_s15 = sphi %s664_s15, %s744_s15  }
   0x3   : > { %p24_p1 = scmp.ge.s32.totalorder %s23_s18, 2  ;;  %p202_p2 = scmp.lt.s32.totalorder %s637_s17, 3 }
   0x5   : > { %s747_s18 = smov (%p24_p1, %s23_s18), 0  ;;  %p203_p3 = pnand %p512_p0, %p202_p2 }
   0x6   : > { %p242_p4 = scmp.lt.s32.totalorder (!%p203_p3), %s629_s15, 1 }
   0x7   : > { %206 = sbr.rel (%p203_p3) target bundleno = 186 (0xba), region = 36 }
   0xc   : > { %v570_v0 = vld [vmem:[%s740_s1 + $0x38] sm:$0xff]  ;;  %v569_v1 = vld [vmem:[%s740_s1 + $0x30] sm:$0xff]  ;;  %v568_v2 = vld [vmem:[%s740_s1 + $0x28] sm:$0xff]  ;;  %s749_s15 = smov (!%p242_p4, %s629_s15), 1 }
   0xd   : > { %350 = vmatpush.bf16.msra.mxu0 %v570_v0  ;;  %582 = vmatpush.bf16.msra.mxu1 %v570_v0  ;;  %v567_v3 = vld [vmem:[%s740_s1 + $0x20] sm:$0xff]  ;;  %v566_v4 = vld [vmem:[%s740_s1 + $0x18] sm:$0xff]  ;;  %v565_v5 = vld [vmem:[%s740_s1 + $0x10] sm:$0xff]  ;;  %s559_s7 = sshll.u32 %s749_s15, 4 }
   0xe   : > { %v564_v6 = vld [vmem:[%s740_s1 + $0x8] sm:$0xff]  ;;  %v563_v7 = vld [vmem:[%s740_s1] sm:$0xff]  ;;  %s246_s12 = scalar_lea.vmem %s739_s0, %s559_s7  ;;  %v371_v16 = vld [vmem:[%s742_s3 + $0x10] sm:$0xff]  ;;  %s265_s28 = scalar_lea.vmem %s743_s4, %s559_s7 }
   0xf   : > { %v561_v8 = vld [vmem:[%s246_s12] sm:$0xff]  ;;  %v562_v9 = vld [vmem:[%s246_s12 + $0x8] sm:$0xff]  ;;  %v372_v20 = vld [vmem:[%s742_s3 + $0x18] sm:$0xff] }
  0x10   : > { %v614_v12 = vld [vmem:[%s741_s2] ss:$0 sm:$0xff]  ;;  %v370_v18 = vld [vmem:[%s742_s3 + $0x8] sm:$0xff] }
  0x11   : > { %351 = vmatpush.bf16.msra.mxu0 %v569_v1  ;;  %583 = vmatpush.bf16.msra.mxu1 %v569_v1  ;;  %v369_v14 = vld [vmem:[%s742_s3] sm:$0xff] }
  0x15   : > { %352 = vmatpush.bf16.msra.mxu0 %v568_v2  ;;  %584 = vmatpush.bf16.msra.mxu1 %v568_v2 }
  0x19   : > { %353 = vmatpush.bf16.msra.mxu0 %v567_v3  ;;  %585 = vmatpush.bf16.msra.mxu1 %v567_v3 }
  0x1d   : > { %354 = vmatpush.bf16.msra.mxu0 %v566_v4  ;;  %586 = vmatpush.bf16.msra.mxu1 %v566_v4 }
  0x21   : > { %355 = vmatpush.bf16.msra.mxu0 %v565_v5  ;;  %587 = vmatpush.bf16.msra.mxu1 %v565_v5 }
  0x25   : > { %356 = vmatpush.bf16.msra.mxu0 %v564_v6  ;;  %588 = vmatpush.bf16.msra.mxu1 %v564_v6 }
  0x29   : > { %357 = vmatpush.bf16.msra.mxu0 %v563_v7  ;;  %589 = vmatpush.bf16.msra.mxu1 %v563_v7 }
  0x2c   : > { %358 = vmatmul.bf16.vlgmr.msra.gmra.mxu0 %v561_v8  ;;  %363 = vmatmul.bf16.vlgmr.msra.gmra.mxu1 %v562_v9 }
  0xa9   : > { %v359_v10 = vpop.f32.mrf.mxu0  ;;  %v364_v11 = vpop.f32.mrf.mxu1 }
  0xaa   : > { %v360_v13 = vadd.f32 %v614_v12, %v359_v10  ;;  %v365_v15 = vadd.f32 %v614_v12, %v364_v11 }
  0xac   : > { %v373_v23 = vadd.f32 %v369_v14, %v360_v13  ;;  %v375_v24 = vadd.f32 %v371_v16, %v365_v15 }
  0xb1   : > { %v361_v17 = vpop.f32.mrf.mxu0  ;;  %v366_v19 = vpop.f32.mrf.mxu1 }
  0xb2   : > { %v362_v21 = vadd.f32 %v614_v12, %v361_v17  ;;  %v367_v22 = vadd.f32 %v614_v12, %v366_v19 }
  0xb4   : > { %v374_v25 = vadd.f32 %v370_v18, %v362_v21  ;;  %v376_v26 = vadd.f32 %v372_v20, %v367_v22 }
  0xb6   : > { %v574_v27 = vpack.c.bf16 %v374_v25, %v373_v23  ;;  %v579_v28 = vpack.c.bf16 %v376_v26, %v375_v24 }
  0xb8   : > { %575 = vst [vmem:[%s265_s28] sm:$0xff] %v574_v27  }
  0xb9   : > { %581 = vst [vmem:[%s265_s28 + $0x8] sm:$0xff] %v579_v28  }
  0xba PF: > { %s14_s17 = sadd.s32 1, %s637_s17   ;;  %s744_s15 = smov %s633_s16 }
  0xbb   : > { %p11_p5 = scmp.ge.s32.totalorder %s14_s17, 4   ;;  %s745_s16 = smov %s747_s18 }
  0xbd   :  { %13 = sbr.rel (!%p11_p5) target bundleno = 2 (0x2), region = 75 }

// kernel: unet_forward.15
= control target key start
LH: loop header
LB: loop body
LE: loop exit
PB: predicated region body
PF: predicated region fallthrough
CT: control target
= control target key end

     0   :  { %v252_v27 = vlaneseq  ;;  %s538_s1 = inlined_call_operand.vmem [shape: bf16[3,128,128], index: 1, kind: input, shape index: {}]   ;;  %s539_s0 = inlined_call_operand.vmem [shape: bf16[8,256], index: 0, kind: input, shape index: {}]   ;;  %s540_s2 = inlined_call_operand.vmem [shape: f32[1,128], index: 2, kind: input, shape index: {}]   ;;  %s541_s3 = inlined_call_operand.vmem [shape: bf16[8,128], index: 3, kind: output, shape index: {}]  }
   0x1   :  { %v427_v0 = vld [vmem:[%s538_s1 + $0xb8] sm:$0xff]  ;;  %v426_v3 = vld [vmem:[%s538_s1 + $0xb0] sm:$0xff]  ;;  %v425_v6 = vld [vmem:[%s538_s1 + $0xa8] sm:$0xff] }
   0x2   :  { %v419_v1 = vld [vmem:[%s538_s1 + $0x78] sm:$0xff]  ;;  %101 = vmatpush.bf16.msra.mxu0 %v427_v0  ;;  %v418_v4 = vld [vmem:[%s538_s1 + $0x70] sm:$0xff]  ;;  %v417_v7 = vld [vmem:[%s538_s1 + $0x68] sm:$0xff]  ;;  %v253_v28 = vshrl.u32 %v252_v27, 7 }
   0x3   :  { %v435_v2 = vld [vmem:[%s538_s1 + $0x38] sm:$0xff]  ;;  %162 = vmatpush.bf16.msra.mxu1 %v419_v1  ;;  %v434_v5 = vld [vmem:[%s538_s1 + $0x30] sm:$0xff]  ;;  %v433_v8 = vld [vmem:[%s538_s1 + $0x28] sm:$0xff] }
   0x4   :  { %239 = vmatpush.bf16.msra.mxu2 %v435_v2  ;;  %v424_v9 = vld [vmem:[%s538_s1 + $0xa0] sm:$0xff]  ;;  %v423_v12 = vld [vmem:[%s538_s1 + $0x98] sm:$0xff]  ;;  %v422_v15 = vld [vmem:[%s538_s1 + $0x90] sm:$0xff]  ;;  %v258_v31 = vand.u32 3, %v253_v28 }
   0x5   :  { %v416_v10 = vld [vmem:[%s538_s1 + $0x60] sm:$0xff]  ;;  %v415_v13 = vld [vmem:[%s538_s1 + $0x58] sm:$0xff]  ;;  %v414_v16 = vld [vmem:[%s538_s1 + $0x50] sm:$0xff] }
   0x6   :  { %102 = vmatpush.bf16.msra.mxu0 %v426_v3  ;;  %v432_v11 = vld [vmem:[%s538_s1 + $0x20] sm:$0xff]  ;;  %v431_v14 = vld [vmem:[%s538_s1 + $0x18] sm:$0xff]  ;;  %v430_v17 = vld [vmem:[%s538_s1 + $0x10] sm:$0xff]  ;;  %vm266_vm0 = vcmp.eq.s32.totalorder %v258_v31, 0 }
   0x7   :  { %163 = vmatpush.bf16.msra.mxu1 %v418_v4  ;;  %v421_v18 = vld [vmem:[%s538_s1 + $0x88] sm:$0xff]  ;;  %v14_v20 = vld [vmem:[%s539_s0] sm:$0xff] }
   0x8   :  { %240 = vmatpush.bf16.msra.mxu2 %v434_v5  ;;  %v413_v19 = vld [vmem:[%s538_s1 + $0x48] sm:$0xff]  ;;  %v50_v22 = vunpack.c.h.b16 %v14_v20  ;;  %v420_v23 = vld [vmem:[%s538_s1 + $0x80] sm:$0xff] }
   0x9   :  { %v429_v21 = vld [vmem:[%s538_s1 + $0x8] sm:$0xff]  ;;  %v412_v24 = vld [vmem:[%s538_s1 + $0x40] sm:$0xff] }
   0xa   :  { %103 = vmatpush.bf16.msra.mxu0 %v425_v6  ;;  %v428_v25 = vld [vmem:[%s538_s1] sm:$0xff]  ;;  %v51_v26 = vpack.c.b16 %v50_v22, %v50_v22 }
   0xb   :  { %164 = vmatpush.bf16.msra.mxu1 %v417_v7  ;;  %v436_v37 = vld [vmem:[%s540_s2] ss:$0 sm:$0xff] }
   0xc   :  { %241 = vmatpush.bf16.msra.mxu2 %v433_v8 }
   0xe   :  { %104 = vmatpush.bf16.msra.mxu0 %v424_v9 }
   0xf   :  { %165 = vmatpush.bf16.msra.mxu1 %v416_v10 }
  0x10   :  { %242 = vmatpush.bf16.msra.mxu2 %v432_v11 }
  0x12   :  { %105 = vmatpush.bf16.msra.mxu0 %v423_v12 }
  0x13   :  { %166 = vmatpush.bf16.msra.mxu1 %v415_v13 }
  0x14   :  { %243 = vmatpush.bf16.msra.mxu2 %v431_v14 }
  0x16   :  { %106 = vmatpush.bf16.msra.mxu0 %v422_v15 }
  0x17   :  { %167 = vmatpush.bf16.msra.mxu1 %v414_v16 }
  0x18   :  { %244 = vmatpush.bf16.msra.mxu2 %v430_v17 }
  0x1a   :  { %107 = vmatpush.bf16.msra.mxu0 %v421_v18 }
  0x1b   :  { %168 = vmatpush.bf16.msra.mxu1 %v413_v19 }
  0x1c   :  { %245 = vmatpush.bf16.msra.mxu2 %v429_v21 }
  0x1e   :  { %108 = vmatpush.bf16.msra.mxu0 %v420_v23 }
  0x1f   :  { %169 = vmatpush.bf16.msra.mxu1 %v412_v24 }
  0x20   :  { %246 = vmatpush.bf16.msra.mxu2 %v428_v25 }
  0x21   :  { %109 = vmatmul.bf16.vlgmr.msra.gmra.mxu0 %v51_v26 }
  0x22   :  { %170 = vmatmul.bf16.vlgmr.msra.gmra.mxu1 %v14_v20 }
  0x23   :  { %247 = vmatmul.bf16.vlgmr.msra.gmra.mxu2 %v51_v26 }
  0x9e   :  { %v110_v29 = vpop.f32.mrf.mxu0 }
  0x9f   :  { %v171_v30 = vpop.f32.mrf.mxu1 }
  0xa0   :  { %v172_v32 = vadd.f32 %v171_v30, %v110_v29 }
  0xa6   :  { %v248_v33 = vpop.f32.mrf.mxu2  ;;  %v112_v35 = vpop.f32.mrf.mxu0 }
  0xa7   :  { %v267_v34 = vrot.slane %v248_v33, 7  ;;  %v173_v36 = vpop.f32.mrf.mxu1 }
  0xa9   :  { %v268_v38 = vsel %vm266_vm0, 0.0, %v267_v34 }
  0xaa   :  { %v269_v39 = vadd.f32 %v268_v38, %v172_v32 }
  0xac   :  { %v274_v40 = vadd.f32 %v436_v37, %v269_v39 }
  0xae   :  { %vm275_vm1 = vcmp.ge.f32.partialorder %v274_v40, 0.0  ;;  %v276_v41 = vmul.f32 0.2, %v274_v40  ;;  %v250_v42 = vpop.f32.mrf.mxu2 }
  0xb0   :  { %v277_v43 = vsel %vm275_vm1, %v274_v40, %v276_v41 }
  0xb1   :  { %v278_v44 = vpack.c.bf16 %v277_v43, %v277_v43 }
  0xb3   :  { %279 = vst [vmem:[%s541_s3] sm:$0xf] %v278_v44 }

// kernel: unet_forward.13
= control target key start
LH: loop header
LB: loop body
LE: loop exit
PB: predicated region body
PF: predicated region fallthrough
CT: control target
= control target key end

     0   :  { %v289_v39 = vlaneseq  ;;  %s716_s1 = inlined_call_operand.vmem [shape: bf16[3,128,128], index: 1, kind: input, shape index: {}]   ;;  %s717_s0 = inlined_call_operand.vmem [shape: bf16[32,256], index: 0, kind: input, shape index: {}]   ;;  %s718_s2 = inlined_call_operand.vmem [shape: f32[1,128], index: 2, kind: input, shape index: {}]   ;;  %s719_s3 = inlined_call_operand.vmem [shape: bf16[32,128], index: 3, kind: output, shape index: {}]  }
   0x1   :  { %v558_v0 = vld [vmem:[%s716_s1 + $0xb8] sm:$0xff]  ;;  %v557_v3 = vld [vmem:[%s716_s1 + $0xb0] sm:$0xff]  ;;  %v556_v6 = vld [vmem:[%s716_s1 + $0xa8] sm:$0xff] }
   0x2   :  { %v550_v1 = vld [vmem:[%s716_s1 + $0x78] sm:$0xff]  ;;  %112 = vmatpush.bf16.msra.mxu0 %v558_v0  ;;  %v549_v4 = vld [vmem:[%s716_s1 + $0x70] sm:$0xff]  ;;  %578 = vmatpush.bf16.msra.mxu3 %v558_v0  ;;  %v548_v7 = vld [vmem:[%s716_s1 + $0x68] sm:$0xff]  ;;  %v290_v40 = vshrl.u32 %v289_v39, 7 }
   0x3   :  { %v566_v2 = vld [vmem:[%s716_s1 + $0x38] sm:$0xff]  ;;  %187 = vmatpush.bf16.msra.mxu1 %v550_v1  ;;  %v565_v5 = vld [vmem:[%s716_s1 + $0x30] sm:$0xff]  ;;  %v564_v8 = vld [vmem:[%s716_s1 + $0x28] sm:$0xff] }
   0x4   :  { %270 = vmatpush.bf16.msra.mxu2 %v566_v2  ;;  %v555_v9 = vld [vmem:[%s716_s1 + $0xa0] sm:$0xff]  ;;  %v554_v12 = vld [vmem:[%s716_s1 + $0x98] sm:$0xff]  ;;  %v553_v15 = vld [vmem:[%s716_s1 + $0x90] sm:$0xff]  ;;  %v292_v43 = vadd.s32 16, %v290_v40  ;;  %vm350_vm0 = vcmp.lt.s32.totalorder %v290_v40, 1  ;;  %v298_v57 = vand.u32 15, %v290_v40 }
   0x5   :  { %v547_v10 = vld [vmem:[%s716_s1 + $0x60] sm:$0xff]  ;;  %v546_v13 = vld [vmem:[%s716_s1 + $0x58] sm:$0xff]  ;;  %v545_v16 = vld [vmem:[%s716_s1 + $0x50] sm:$0xff] }
   0x6   :  { %113 = vmatpush.bf16.msra.mxu0 %v557_v3  ;;  %579 = vmatpush.bf16.msra.mxu3 %v557_v3  ;;  %v563_v11 = vld [vmem:[%s716_s1 + $0x20] sm:$0xff]  ;;  %v562_v14 = vld [vmem:[%s716_s1 + $0x18] sm:$0xff]  ;;  %v561_v17 = vld [vmem:[%s716_s1 + $0x10] sm:$0xff]  ;;  %v312_v46 = vand.u32 15, %v292_v43  ;;  %vm342_vm2 = vcmp.eq.s32.totalorder %v298_v57, 0 }
   0x7   :  { %188 = vmatpush.bf16.msra.mxu1 %v549_v4  ;;  %v552_v18 = vld [vmem:[%s716_s1 + $0x88] sm:$0xff]  ;;  %v551_v21 = vld [vmem:[%s716_s1 + $0x80] sm:$0xff]  ;;  %v541_v28 = vld [vmem:[%s717_s0 + $0x14] sm:$0xf] }
   0x8   :  { %271 = vmatpush.bf16.msra.mxu2 %v565_v5  ;;  %v544_v19 = vld [vmem:[%s716_s1 + $0x48] sm:$0xff]  ;;  %v543_v22 = vld [vmem:[%s716_s1 + $0x40] sm:$0xff]  ;;  %v431_v29 = vld [vmem:[%s717_s0 + $0x18] sm:$0xf0]  ;;  %vm344_vm1 = vcmp.eq.s32.totalorder %v312_v46, 0 }
   0x9   :  { %v560_v20 = vld [vmem:[%s716_s1 + $0x8] sm:$0xff]  ;;  %v539_v23 = vld [vmem:[%s717_s0 + $0x4] sm:$0xf]  ;;  %v469_v25 = vld [vmem:[%s717_s0] sm:$0xf]  ;;  %v434_v32 = vor.u32 %v541_v28, %v431_v29 }
   0xa   :  { %114 = vmatpush.bf16.msra.mxu0 %v556_v6  ;;  %580 = vmatpush.bf16.msra.mxu3 %v556_v6  ;;  %v427_v24 = vld [vmem:[%s717_s0 + $0x8] sm:$0xf0]  ;;  %v540_v26 = vld [vmem:[%s717_s0 + $0x4] sm:$0xf0]  ;;  %v559_v27 = vld [vmem:[%s716_s1] sm:$0xff] }
   0xb   :  { %189 = vmatpush.bf16.msra.mxu1 %v548_v7  ;;  %v430_v30 = vor.u32 %v539_v23, %v427_v24  ;;  %v470_v31 = vor.u32 %v540_v26, %v469_v25  ;;  %v473_v33 = vld [vmem:[%s717_s0 + $0x10] sm:$0xf]  ;;  %v542_v34 = vld [vmem:[%s717_s0 + $0x14] sm:$0xf0]  ;;  %v586_v60 = vld [vmem:[%s718_s2] ss:$0 sm:$0xff] }
   0xc   :  { %272 = vmatpush.bf16.msra.mxu2 %v564_v8  ;;  %v474_v35 = vor.u32 %v542_v34, %v473_v33 }
   0xe   :  { %115 = vmatpush.bf16.msra.mxu0 %v555_v9  ;;  %581 = vmatpush.bf16.msra.mxu3 %v555_v9 }
   0xf   :  { %190 = vmatpush.bf16.msra.mxu1 %v547_v10 }
  0x10   :  { %273 = vmatpush.bf16.msra.mxu2 %v563_v11 }
  0x12   :  { %116 = vmatpush.bf16.msra.mxu0 %v554_v12  ;;  %582 = vmatpush.bf16.msra.mxu3 %v554_v12 }
  0x13   :  { %191 = vmatpush.bf16.msra.mxu1 %v546_v13 }
  0x14   :  { %274 = vmatpush.bf16.msra.mxu2 %v562_v14 }
  0x16   :  { %117 = vmatpush.bf16.msra.mxu0 %v553_v15  ;;  %583 = vmatpush.bf16.msra.mxu3 %v553_v15 }
  0x17   :  { %192 = vmatpush.bf16.msra.mxu1 %v545_v16 }
  0x18   :  { %275 = vmatpush.bf16.msra.mxu2 %v561_v17 }
  0x1a   :  { %118 = vmatpush.bf16.msra.mxu0 %v552_v18  ;;  %584 = vmatpush.bf16.msra.mxu3 %v552_v18 }
  0x1b   :  { %193 = vmatpush.bf16.msra.mxu1 %v544_v19 }
  0x1c   :  { %276 = vmatpush.bf16.msra.mxu2 %v560_v20 }
  0x1e   :  { %119 = vmatpush.bf16.msra.mxu0 %v551_v21  ;;  %585 = vmatpush.bf16.msra.mxu3 %v551_v21 }
  0x1f   :  { %194 = vmatpush.bf16.msra.mxu1 %v543_v22 }
  0x20   :  { %277 = vmatpush.bf16.msra.mxu2 %v559_v27 }
  0x21   :  { %120 = vmatmul.bf16.vlgmr.msra.gmra.mxu0 %v430_v30  ;;  %125 = vmatmul.bf16.vlgmr.msra.gmra.mxu3 %v434_v32 }
  0x22   :  { %195 = vmatmul.bf16.vlgmr.msra.gmra.mxu1 %v470_v31 }
  0x23   :  { %278 = vmatmul.bf16.vlgmr.msra.gmra.mxu2 %v430_v30 }
  0x32   :  { %200 = vmatmul.bf16.gmra.mxu1 %v474_v35 }
  0x33   :  { %283 = vmatmul.bf16.gmra.mxu2 %v434_v32 }
  0x9e   :  { %v121_v41 = vpop.f32.mrf.mxu0 }
  0x9f   :  { %v196_v36 = vpop.f32.mrf.mxu1 }
  0xa0   :  { %v197_v3 = vadd.f32 %v196_v36, %v121_v41 }
  0xa4   :  { %v126_v44 = vpop.f32.mrf.mxu3 }
  0xa6   :  { %v279_v37 = vpop.f32.mrf.mxu2  ;;  %v123_v51 = vpop.f32.mrf.mxu0 }
  0xa7   :  { %v198_v38 = vpop.f32.mrf.mxu1  ;;  %v346_v50 = vrot.slane %v279_v37, 7 }
  0xa8   :  { %v199_v56 = vadd.f32 %v198_v38, %v123_v51 }
  0xac   :  { %v128_v61 = vpop.f32.mrf.mxu3 }
  0xae   :  { %v281_v42 = vpop.f32.mrf.mxu2 }
  0xaf   :  { %v201_v45 = vpop.f32.mrf.mxu1  ;;  %v347_v47 = vrot.slane %v281_v42, 7 }
  0xb0   :  { %v202_v52 = vadd.f32 %v201_v45, %v126_v44 }
  0xb1   :  { %v353_v54 = vsel %vm350_vm0, %v346_v50, %v347_v47 }
  0xb2   :  { %v360_v59 = vadd.f32 %v353_v54, %v199_v56 }
  0xb4   :  { %v368_v4 = vadd.f32 %v586_v60, %v360_v59 }
  0xb6   :  { %v284_v48 = vpop.f32.mrf.mxu2  ;;  %v376_v12 = vmul.f32 0.2, %v368_v4  ;;  %vm372_vm4 = vcmp.ge.f32.partialorder %v368_v4, 0.0 }
  0xb7   :  { %v348_v49 = vrot.slane %v284_v48, 7  ;;  %v203_v62 = vpop.f32.mrf.mxu1 }
  0xb8   :  { %v204_v2 = vadd.f32 %v203_v62, %v128_v61  ;;  %v380_v18 = vsel %vm372_vm4, %v368_v4, %v376_v12 }
  0xb9   :  { %v352_v53 = vsel %vm350_vm0, %v347_v47, %v348_v49 }
  0xba   :  { %v357_v55 = vsel %vm344_vm1, 0.0, %v352_v53 }
  0xbb   :  { %v361_v58 = vadd.f32 %v357_v55, %v202_v52 }
  0xbd   :  { %v369_v1 = vadd.f32 %v586_v60, %v361_v58 }
  0xbe   :  { %v286_v63 = vpop.f32.mrf.mxu2 }
  0xbf   :  { %v349_v0 = vrot.slane %v286_v63, 7  ;;  %v377_v10 = vmul.f32 0.2, %v369_v1  ;;  %vm373_vm3 = vcmp.ge.f32.partialorder %v369_v1, 0.0 }
  0xc1   :  { %v351_v5 = vsel %vm350_vm0, %v348_v49, %v349_v0  ;;  %v354_v6 = vsel %vm350_vm0, %v349_v0, %v346_v50  ;;  %v381_v16 = vsel %vm373_vm3, %v369_v1, %v377_v10 }
  0xc2   :  { %v355_v7 = vsel %vm342_vm2, 0.0, %v354_v6  ;;  %v362_v8 = vadd.f32 %v351_v5, %v204_v2 }
  0xc3   :  { %v359_v9 = vadd.f32 %v355_v7, %v197_v3 }
  0xc4   :  { %v370_v11 = vadd.f32 %v586_v60, %v362_v8 }
  0xc5   :  { %v367_v13 = vadd.f32 %v586_v60, %v359_v9 }
  0xc6   :  { %vm374_vm5 = vcmp.ge.f32.partialorder %v370_v11, 0.0  ;;  %v378_v14 = vmul.f32 0.2, %v370_v11 }
  0xc7   :  { %vm371_vm6 = vcmp.ge.f32.partialorder %v367_v13, 0.0  ;;  %v375_v15 = vmul.f32 0.2, %v367_v13 }
  0xc8   :  { %v382_v17 = vsel %vm374_vm5, %v370_v11, %v378_v14 }
  0xc9   :  { %v379_v19 = vsel %vm371_vm6, %v367_v13, %v375_v15  ;;  %v575_v20 = vpack.c.bf16 %v382_v17, %v381_v16 }
  0xca   :  { %v570_v21 = vpack.c.bf16 %v380_v18, %v379_v19 }
  0xcb   :  { %577 = vst [vmem:[%s719_s3 + $0x8] sm:$0xff] %v575_v20  }
  0xcc   :  { %571 = vst [vmem:[%s719_s3] sm:$0xff] %v570_v21  }

// kernel: unet_forward.14
= control target key start
LH: loop header
LB: loop body
LE: loop exit
PB: predicated region body
PF: predicated region fallthrough
CT: control target
= control target key end

     0   :  { %v262_v30 = vlaneseq  ;;  %s598_s1 = inlined_call_operand.vmem [shape: bf16[3,128,128], index: 1, kind: input, shape index: {}]   ;;  %s599_s0 = inlined_call_operand.vmem [shape: bf16[16,256], index: 0, kind: input, shape index: {}]   ;;  %s600_s2 = inlined_call_operand.vmem [shape: f32[1,128], index: 2, kind: input, shape index: {}]   ;;  %s601_s3 = inlined_call_operand.vmem [shape: bf16[16,128], index: 3, kind: output, shape index: {}]  }
   0x1   :  { %v473_v0 = vld [vmem:[%s598_s1 + $0xb8] sm:$0xff]  ;;  %v472_v3 = vld [vmem:[%s598_s1 + $0xb0] sm:$0xff]  ;;  %v471_v6 = vld [vmem:[%s598_s1 + $0xa8] sm:$0xff] }
   0x2   :  { %v465_v1 = vld [vmem:[%s598_s1 + $0x78] sm:$0xff]  ;;  %104 = vmatpush.bf16.msra.mxu0 %v473_v0  ;;  %v464_v4 = vld [vmem:[%s598_s1 + $0x70] sm:$0xff]  ;;  %v463_v7 = vld [vmem:[%s598_s1 + $0x68] sm:$0xff]  ;;  %v263_v32 = vshrl.u32 %v262_v30, 7 }
   0x3   :  { %v481_v2 = vld [vmem:[%s598_s1 + $0x38] sm:$0xff]  ;;  %170 = vmatpush.bf16.msra.mxu1 %v465_v1  ;;  %v480_v5 = vld [vmem:[%s598_s1 + $0x30] sm:$0xff]  ;;  %v479_v8 = vld [vmem:[%s598_s1 + $0x28] sm:$0xff] }
   0x4   :  { %248 = vmatpush.bf16.msra.mxu2 %v481_v2  ;;  %v470_v9 = vld [vmem:[%s598_s1 + $0xa0] sm:$0xff]  ;;  %v469_v12 = vld [vmem:[%s598_s1 + $0x98] sm:$0xff]  ;;  %v468_v15 = vld [vmem:[%s598_s1 + $0x90] sm:$0xff]  ;;  %v264_v35 = vadd.s32 8, %v263_v32  ;;  %v269_v36 = vand.u32 7, %v263_v32  ;;  %vm293_vm0 = vcmp.lt.s32.totalorder %v263_v32, 1 }
   0x5   :  { %v462_v10 = vld [vmem:[%s598_s1 + $0x60] sm:$0xff]  ;;  %v461_v13 = vld [vmem:[%s598_s1 + $0x58] sm:$0xff]  ;;  %v460_v16 = vld [vmem:[%s598_s1 + $0x50] sm:$0xff] }
   0x6   :  { %105 = vmatpush.bf16.msra.mxu0 %v472_v3  ;;  %v478_v11 = vld [vmem:[%s598_s1 + $0x20] sm:$0xff]  ;;  %v477_v14 = vld [vmem:[%s598_s1 + $0x18] sm:$0xff]  ;;  %v476_v17 = vld [vmem:[%s598_s1 + $0x10] sm:$0xff]  ;;  %v276_v37 = vand.u32 7, %v264_v35  ;;  %vm289_vm1 = vcmp.eq.s32.totalorder %v269_v36, 0 }
   0x7   :  { %171 = vmatpush.bf16.msra.mxu1 %v464_v4  ;;  %v467_v18 = vld [vmem:[%s598_s1 + $0x88] sm:$0xff]  ;;  %v466_v21 = vld [vmem:[%s598_s1 + $0x80] sm:$0xff] }
   0x8   :  { %249 = vmatpush.bf16.msra.mxu2 %v480_v5  ;;  %v459_v19 = vld [vmem:[%s598_s1 + $0x48] sm:$0xff]  ;;  %v458_v22 = vld [vmem:[%s598_s1 + $0x40] sm:$0xff]  ;;  %vm290_vm2 = vcmp.eq.s32.totalorder %v276_v37, 0 }
   0x9   :  { %v475_v20 = vld [vmem:[%s598_s1 + $0x8] sm:$0xff]  ;;  %v456_v23 = vld [vmem:[%s599_s0 + $0x4] sm:$0xf]  ;;  %v390_v25 = vld [vmem:[%s599_s0] sm:$0xf] }
   0xa   :  { %106 = vmatpush.bf16.msra.mxu0 %v471_v6  ;;  %v352_v24 = vld [vmem:[%s599_s0 + $0x8] sm:$0xf0]  ;;  %v457_v26 = vld [vmem:[%s599_s0 + $0x4] sm:$0xf0]  ;;  %v474_v27 = vld [vmem:[%s598_s1] sm:$0xff] }
   0xb   :  { %172 = vmatpush.bf16.msra.mxu1 %v463_v7  ;;  %v355_v28 = vor.u32 %v456_v23, %v352_v24  ;;  %v391_v29 = vor.u32 %v457_v26, %v390_v25  ;;  %v487_v47 = vld [vmem:[%s600_s2] ss:$0 sm:$0xff] }
   0xc   :  { %250 = vmatpush.bf16.msra.mxu2 %v479_v8 }
   0xe   :  { %107 = vmatpush.bf16.msra.mxu0 %v470_v9 }
   0xf   :  { %173 = vmatpush.bf16.msra.mxu1 %v462_v10 }
  0x10   :  { %251 = vmatpush.bf16.msra.mxu2 %v478_v11 }
  0x12   :  { %108 = vmatpush.bf16.msra.mxu0 %v469_v12 }
  0x13   :  { %174 = vmatpush.bf16.msra.mxu1 %v461_v13 }
  0x14   :  { %252 = vmatpush.bf16.msra.mxu2 %v477_v14 }
  0x16   :  { %109 = vmatpush.bf16.msra.mxu0 %v468_v15 }
  0x17   :  { %175 = vmatpush.bf16.msra.mxu1 %v460_v16 }
  0x18   :  { %253 = vmatpush.bf16.msra.mxu2 %v476_v17 }
  0x1a   :  { %110 = vmatpush.bf16.msra.mxu0 %v467_v18 }
  0x1b   :  { %176 = vmatpush.bf16.msra.mxu1 %v459_v19 }
  0x1c   :  { %254 = vmatpush.bf16.msra.mxu2 %v475_v20 }
  0x1e   :  { %111 = vmatpush.bf16.msra.mxu0 %v466_v21 }
  0x1f   :  { %177 = vmatpush.bf16.msra.mxu1 %v458_v22 }
  0x20   :  { %255 = vmatpush.bf16.msra.mxu2 %v474_v27 }
  0x21   :  { %112 = vmatmul.bf16.vlgmr.msra.gmra.mxu0 %v355_v28 }
  0x22   :  { %178 = vmatmul.bf16.vlgmr.msra.gmra.mxu1 %v391_v29 }
  0x23   :  { %256 = vmatmul.bf16.vlgmr.msra.gmra.mxu2 %v355_v28 }
  0x9e   :  { %v113_v31 = vpop.f32.mrf.mxu0 }
  0x9f   :  { %v179_v33 = vpop.f32.mrf.mxu1 }
  0xa0   :  { %v180_v43 = vadd.f32 %v179_v33, %v113_v31 }
  0xa6   :  { %v257_v34 = vpop.f32.mrf.mxu2  ;;  %v115_v38 = vpop.f32.mrf.mxu0 }
  0xa7   :  { %v181_v39 = vpop.f32.mrf.mxu1  ;;  %v291_v41 = vrot.slane %v257_v34, 7 }
  0xa8   :  { %v182_v44 = vadd.f32 %v181_v39, %v115_v38 }
  0xae   :  { %v259_v40 = vpop.f32.mrf.mxu2 }
  0xaf   :  { %v292_v42 = vrot.slane %v259_v40, 7 }
  0xb1   :  { %v294_v45 = vsel %vm293_vm0, %v291_v41, %v292_v42  ;;  %v295_v46 = vsel %vm293_vm0, %v292_v42, %v291_v41 }
  0xb2   :  { %v296_v48 = vsel %vm289_vm1, 0.0, %v295_v46  ;;  %v297_v49 = vsel %vm290_vm2, 0.0, %v294_v45 }
  0xb3   :  { %v298_v50 = vadd.f32 %v296_v48, %v180_v43  ;;  %v299_v51 = vadd.f32 %v297_v49, %v182_v44 }
  0xb5   :  { %v304_v52 = vadd.f32 %v487_v47, %v298_v50  ;;  %v305_v53 = vadd.f32 %v487_v47, %v299_v51 }
  0xb7   :  { %vm306_vm3 = vcmp.ge.f32.partialorder %v304_v52, 0.0  ;;  %vm307_vm4 = vcmp.ge.f32.partialorder %v305_v53, 0.0  ;;  %v308_v54 = vmul.f32 0.2, %v304_v52  ;;  %v309_v55 = vmul.f32 0.2, %v305_v53 }
  0xb9   :  { %v310_v56 = vsel %vm306_vm3, %v304_v52, %v308_v54  ;;  %v311_v57 = vsel %vm307_vm4, %v305_v53, %v309_v55 }
  0xba   :  { %v485_v58 = vpack.c.bf16 %v311_v57, %v310_v56 }
  0xbc   :  { %486 = vst [vmem:[%s601_s3] sm:$0xff] %v485_v58  }

// kernel: unet_forward.16
= control target key start
LH: loop header
LB: loop body
LE: loop exit
PB: predicated region body
PF: predicated region fallthrough
CT: control target
= control target key end

     0   :  { %v255_v28 = vlaneseq  ;;  %vm270_vm0 = vcmask 1047556   ;;  %s548_s1 = inlined_call_operand.vmem [shape: bf16[3,128,128], index: 1, kind: input, shape index: {}]   ;;  %s549_s0 = inlined_call_operand.vmem [shape: bf16[4,256], index: 0, kind: input, shape index: {}]   ;;  %s550_s2 = inlined_call_operand.vmem [shape: f32[1,128], index: 2, kind: input, shape index: {}]   ;;  %s551_s3 = inlined_call_operand.vmem [shape: bf16[4,128], index: 3, kind: output, shape index: {}]  }
   0x1   :  { %v445_v0 = vld [vmem:[%s548_s1 + $0x38] sm:$0xff]  ;;  %v444_v3 = vld [vmem:[%s548_s1 + $0x30] sm:$0xff]  ;;  %v443_v6 = vld [vmem:[%s548_s1 + $0x28] sm:$0xff] }
   0x2   :  { %v437_v1 = vld [vmem:[%s548_s1 + $0xb8] sm:$0xff]  ;;  %242 = vmatpush.bf16.msra.mxu2 %v445_v0  ;;  %v436_v4 = vld [vmem:[%s548_s1 + $0xb0] sm:$0xff]  ;;  %v435_v7 = vld [vmem:[%s548_s1 + $0xa8] sm:$0xff]  ;;  %v256_v30 = vshrl.u32 %v255_v28, 7 }
   0x3   :  { %v429_v2 = vld [vmem:[%s548_s1 + $0x78] sm:$0xff]  ;;  %101 = vmatpush.bf16.msra.mxu0 %v437_v1  ;;  %v428_v5 = vld [vmem:[%s548_s1 + $0x70] sm:$0xff]  ;;  %v427_v8 = vld [vmem:[%s548_s1 + $0x68] sm:$0xff] }
   0x4   :  { %162 = vmatpush.bf16.msra.mxu1 %v429_v2  ;;  %v14_v9 = vld [vmem:[%s549_s0] sm:$0xf]  ;;  %v441_v13 = vld [vmem:[%s548_s1 + $0x18] sm:$0xff]  ;;  %v440_v17 = vld [vmem:[%s548_s1 + $0x10] sm:$0xff]  ;;  %v261_v33 = vand.u32 1, %v256_v30 }
   0x5   :  { %50 = vst [vmem:[#allocation1] ss:$4 sm:$0xff] %v14_v9  ;;  %v442_v10 = vld [vmem:[%s548_s1 + $0x20] sm:$0xff]  ;;  %v433_v14 = vld [vmem:[%s548_s1 + $0x98] sm:$0xff]  ;;  %v432_v18 = vld [vmem:[%s548_s1 + $0x90] sm:$0xff] }
   0x6   :  { %243 = vmatpush.bf16.msra.mxu2 %v444_v3  ;;  %v434_v11 = vld [vmem:[%s548_s1 + $0xa0] sm:$0xff]  ;;  %v425_v15 = vld [vmem:[%s548_s1 + $0x58] sm:$0xff]  ;;  %v424_v19 = vld [vmem:[%s548_s1 + $0x50] sm:$0xff]  ;;  %vm269_vm1 = vcmp.eq.s32.totalorder %v261_v33, 0 }
   0x7   :  { %102 = vmatpush.bf16.msra.mxu0 %v436_v4  ;;  %v426_v12 = vld [vmem:[%s548_s1 + $0x60] sm:$0xff]  ;;  %v439_v20 = vld [vmem:[%s548_s1 + $0x8] sm:$0xff] }
   0x8   :  { %163 = vmatpush.bf16.msra.mxu1 %v428_v5  ;;  %v431_v21 = vld [vmem:[%s548_s1 + $0x88] sm:$0xff]  ;;  %v438_v23 = vld [vmem:[%s548_s1] sm:$0xff] }
   0x9   :  { %v423_v22 = vld [vmem:[%s548_s1 + $0x48] sm:$0xff]  ;;  %v430_v24 = vld [vmem:[%s548_s1 + $0x80] sm:$0xff] }
   0xa   :  { %244 = vmatpush.bf16.msra.mxu2 %v443_v6  ;;  %v422_v25 = vld [vmem:[%s548_s1 + $0x40] sm:$0xff] }
   0xb   :  { %103 = vmatpush.bf16.msra.mxu0 %v435_v7  ;;  %v446_v41 = vld [vmem:[%s550_s2] ss:$0 sm:$0xff] }
   0xc   :  { %164 = vmatpush.bf16.msra.mxu1 %v427_v8  ;;  %v51_v16 = vld.sshfl [vmem:[#allocation1 + $0x8] sm:$0xff pattern:$0x73625140] }
   0xd   :  { %191 = vst [vmem:[#allocation1] ss:$4 sm:$0xff] %v14_v9 }
   0xe   :  { %245 = vmatpush.bf16.msra.mxu2 %v442_v10 }
   0xf   :  { %104 = vmatpush.bf16.msra.mxu0 %v434_v11 }
  0x10   :  { %165 = vmatpush.bf16.msra.mxu1 %v426_v12 }
  0x12   :  { %246 = vmatpush.bf16.msra.mxu2 %v441_v13 }
  0x13   :  { %105 = vmatpush.bf16.msra.mxu0 %v433_v14 }
  0x14   :  { %166 = vmatpush.bf16.msra.mxu1 %v425_v15  ;;  %v192_v26 = vld.sshfl [vmem:[#allocation1 + $0x8] sm:$0xff pattern:$0x73625140] }
  0x16   :  { %247 = vmatpush.bf16.msra.mxu2 %v440_v17 }
  0x17   :  { %106 = vmatpush.bf16.msra.mxu0 %v432_v18 }
  0x18   :  { %167 = vmatpush.bf16.msra.mxu1 %v424_v19 }
  0x1a   :  { %248 = vmatpush.bf16.msra.mxu2 %v439_v20 }
  0x1b   :  { %107 = vmatpush.bf16.msra.mxu0 %v431_v21 }
  0x1c   :  { %168 = vmatpush.bf16.msra.mxu1 %v423_v22 }
  0x1e   :  { %249 = vmatpush.bf16.msra.mxu2 %v438_v23 }
  0x1f   :  { %108 = vmatpush.bf16.msra.mxu0 %v430_v24 }
  0x20   :  { %169 = vmatpush.bf16.msra.mxu1 %v422_v25 }
  0x21   :  { %250 = vmatmul.bf16.vlgmr.msra.gmra.mxu2 %v192_v26 }
  0x22   :  { %109 = vmatmul.bf16.vlgmr.msra.gmra.mxu0 %v51_v16 }
  0x23   :  { %170 = vmatmul.bf16.vlgmr.msra.gmra.mxu1 %v14_v9 }
  0x9f   :  { %v110_v27 = vpop.f32.mrf.mxu0 }
  0xa0   :  { %v171_v29 = vpop.f32.mrf.mxu1 }
  0xa1   :  { %v172_v38 = vadd.f32 %v171_v29, %v110_v27 }
  0xa4   :  { %v251_v31 = vpop.f32.mrf.mxu2 }
  0xa5   :  { %v271_v32 = vrot.slane %v251_v31, 4 }
  0xa7   :  { %v112_v34 = vpop.f32.mrf.mxu0  ;;  %v272_v35 = vsel %vm270_vm0, %v271_v32, %v251_v31 }
  0xa8   :  { %v173_v36 = vpop.f32.mrf.mxu1  ;;  %v273_v37 = vrot.slane %v272_v35, 4 }
  0xaa   :  { %v274_v39 = vsel %vm270_vm0, %v273_v37, %v251_v31 }
  0xab   :  { %v276_v40 = vrot.slane %v274_v39, 3 }
  0xac   :  { %v253_v42 = vpop.f32.mrf.mxu2 }
  0xad   :  { %v278_v43 = vsel %vm269_vm1, 0.0, %v276_v40 }
  0xae   :  { %v279_v44 = vadd.f32 %v278_v43, %v172_v38 }
  0xb0   :  { %v284_v45 = vadd.f32 %v446_v41, %v279_v44 }
  0xb2   :  { %vm285_vm2 = vcmp.ge.f32.partialorder %v284_v45, 0.0  ;;  %v286_v46 = vmul.f32 0.2, %v284_v45 }
  0xb4   :  { %v287_v47 = vsel %vm285_vm2, %v284_v45, %v286_v46 }
  0xb5   :  { %v288_v48 = vpack.c.bf16 %v287_v47, %v287_v47 }
  0xb7   :  { %289 = vst [vmem:[%s551_s3] sm:$0x3] %v288_v48 }

// kernel: unet_forward.18
= control target key start
LH: loop header
LB: loop body
LE: loop exit
PB: predicated region body
PF: predicated region fallthrough
CT: control target
= control target key end

     0   :  { %s558_s15 = smov 0   ;;  %s560_s16 = smov 0   ;;  %s605_s0 = inlined_call_operand.vmem [shape: bf16[2,128], index: 0, kind: input, shape index: {}]   ;;  %s606_s1 = inlined_call_operand.vmem [shape: bf16[2,2,128,128], index: 1, kind: input, shape index: {}]   ;;  %s607_s2 = inlined_call_operand.vmem [shape: f32[1,128], index: 2, kind: input, shape index: {}]   ;;  %s608_s3 = inlined_call_operand.vmem [shape: bf16[2,256], index: 3, kind: input, shape index: {}]   ;;  %s609_s4 = inlined_call_operand.vmem [shape: bf16[2,256], index: 4, kind: output, shape index: {}]  }
   0x1   :  { %s562_s17 = smov 0  }
   0x2 LB: > { %s26_s18 = sadd.s32 1, %s527_s16  ;;  %p438_p0 = scmp.ge.s32.totalorder %s531_s17, 1  ;;  %s531_s17 = sphi %s562_s17, %s14_s17   ;;  %s527_s16 = sphi %s560_s16, %s611_s16   ;;  %s523_s15 = sphi %s558_s15, %s610_s15  }
   0x3   : > { %p28_p1 = scmp.ge.s32.totalorder %s26_s18, 2  ;;  %p201_p2 = scmp.lt.s32.totalorder %s531_s17, 3 }
   0x5   : > { %s613_s18 = smov (%p28_p1, %s26_s18), 0  ;;  %p202_p3 = pnand %p438_p0, %p201_p2 }
   0x6   : > { %p236_p4 = scmp.lt.s32.totalorder (!%p202_p3), %s523_s15, 1 }
   0x7   : > { %205 = sbr.rel (%p202_p3) target bundleno = 183 (0xb7), region = 36 }
   0xc   : > { %s615_s15 = smov (!%p236_p4, %s523_s15), 1  ;;  %v257_v8 = vld [vmem:[%s605_s0] sm:$0x1] }
   0xd   : > { %s475_s19 = sshll.u32 %s615_s15, 7  ;;  %s250_s27 = scalar_lea.vmem %s608_s3, %s615_s15  ;;  %v508_v9 = vld [vmem:[%s607_s2] ss:$0 sm:$0xff] }
   0xe   : > { %s243_s22 = scalar_lea.vmem %s606_s1, %s475_s19  ;;  %v342_v10 = vld [vmem:[%s250_s27] sm:$0x1]  ;;  %s255_s6 = scalar_lea.vmem %s609_s4, %s615_s15 }
   0xf   : > { %v483_v0 = vld [vmem:[%s243_s22 + $0x38] sm:$0xff]  ;;  %v482_v1 = vld [vmem:[%s243_s22 + $0x30] sm:$0xff]  ;;  %v481_v2 = vld [vmem:[%s243_s22 + $0x28] sm:$0xff]  ;;  %v343_v13 = vunpack.c.l.bf16 %v342_v10 }
  0x10   : > { %326 = vmatpush.bf16.msra.mxu0 %v483_v0  ;;  %v480_v3 = vld [vmem:[%s243_s22 + $0x20] sm:$0xff]  ;;  %v479_v4 = vld [vmem:[%s243_s22 + $0x18] sm:$0xff]  ;;  %v478_v5 = vld [vmem:[%s243_s22 + $0x10] sm:$0xff] }
  0x11   : > { %v477_v6 = vld [vmem:[%s243_s22 + $0x8] sm:$0xff]  ;;  %v476_v7 = vld [vmem:[%s243_s22] sm:$0xff] }
  0x14   : > { %327 = vmatpush.bf16.msra.mxu0 %v482_v1 }
  0x18   : > { %328 = vmatpush.bf16.msra.mxu0 %v481_v2 }
  0x1c   : > { %329 = vmatpush.bf16.msra.mxu0 %v480_v3 }
  0x20   : > { %330 = vmatpush.bf16.msra.mxu0 %v479_v4 }
  0x24   : > { %331 = vmatpush.bf16.msra.mxu0 %v478_v5 }
  0x28   : > { %332 = vmatpush.bf16.msra.mxu0 %v477_v6 }
  0x2c   : > { %333 = vmatpush.bf16.msra.mxu0 %v476_v7 }
  0x2f   : > { %334 = vmatmul.bf16.vlgmr.msra.gmra.mxu0 %v257_v8 }
  0xac   : > { %v335_v11 = vpop.f32.mrf.mxu0 }
  0xad   : > { %v336_v12 = vadd.f32 %v508_v9, %v335_v11 }
  0xaf   : > { %vm339_vm0 = vcmp.ge.f32.partialorder %v336_v12, 0.0  ;;  %v340_v14 = vmul.f32 0.2, %v336_v12 }
  0xb1   : > { %v341_v15 = vsel %vm339_vm0, %v336_v12, %v340_v14 }
  0xb2   : > { %v344_v16 = vadd.f32 %v343_v13, %v341_v15 }
  0xb4   : > { %v345_v17 = vpack.c.bf16 %v344_v16, %v344_v16  ;;  %v337_v18 = vpop.f32.mrf.mxu0 }
  0xb6   : > { %346 = vst [vmem:[%s255_s6] sm:$0x1] %v345_v17 }
  0xb7 PF: > { %s14_s17 = sadd.s32 1, %s531_s17   ;;  %s610_s15 = smov %s527_s16 }
  0xb8   : > { %p11_p5 = scmp.ge.s32.totalorder %s14_s17, 4   ;;  %s611_s16 = smov %s613_s18 }
  0xba   :  { %13 = sbr.rel (!%p11_p5) target bundleno = 2 (0x2), region = 72 }

// kernel: unet_forward.17
= control target key start
LH: loop header
LB: loop body
LE: loop exit
PB: predicated region body
PF: predicated region fallthrough
CT: control target
= control target key end

     0   :  { %s379_s1 = inlined_call_operand.vmem [shape: bf16[3,128,128], index: 1, kind: input, shape index: {}]   ;;  %s380_s0 = inlined_call_operand.vmem [shape: bf16[2,256], index: 0, kind: input, shape index: {}]   ;;  %s381_s2 = inlined_call_operand.vmem [shape: f32[1,128], index: 2, kind: input, shape index: {}]   ;;  %s382_s3 = inlined_call_operand.vmem [shape: bf16[2,128], index: 3, kind: output, shape index: {}]  }
   0x1   :  { %v300_v0 = vld [vmem:[%s379_s1 + $0xb8] sm:$0xff]  ;;  %v299_v2 = vld [vmem:[%s379_s1 + $0xb0] sm:$0xff]  ;;  %v14_v4 = vld [vmem:[%s380_s0] sm:$0x3] }
   0x2   :  { %v292_v1 = vld [vmem:[%s379_s1 + $0x78] sm:$0xff]  ;;  %101 = vmatpush.bf16.msra.mxu0 %v300_v0  ;;  %v291_v3 = vld [vmem:[%s379_s1 + $0x70] sm:$0xff]  ;;  %v298_v5 = vld [vmem:[%s379_s1 + $0xa8] sm:$0xff]  ;;  %50 = vst [vmem:[#allocation1] ss:$9 sm:$0xff] %v14_v4 }
   0x3   :  { %162 = vmatpush.bf16.msra.mxu1 %v292_v1  ;;  %v290_v6 = vld [vmem:[%s379_s1 + $0x68] sm:$0xff]  ;;  %v297_v7 = vld [vmem:[%s379_s1 + $0xa0] sm:$0xff]  ;;  %v296_v9 = vld [vmem:[%s379_s1 + $0x98] sm:$0xff] }
   0x4   :  { %v289_v8 = vld [vmem:[%s379_s1 + $0x60] sm:$0xff]  ;;  %v288_v10 = vld [vmem:[%s379_s1 + $0x58] sm:$0xff]  ;;  %v295_v11 = vld [vmem:[%s379_s1 + $0x90] sm:$0xff] }
   0x5   :  { %v287_v12 = vld [vmem:[%s379_s1 + $0x50] sm:$0xff]  ;;  %v294_v13 = vld [vmem:[%s379_s1 + $0x88] sm:$0xff]  ;;  %v293_v15 = vld [vmem:[%s379_s1 + $0x80] sm:$0xff] }
   0x6   :  { %102 = vmatpush.bf16.msra.mxu0 %v299_v2  ;;  %v286_v14 = vld [vmem:[%s379_s1 + $0x48] sm:$0xff]  ;;  %v285_v16 = vld [vmem:[%s379_s1 + $0x40] sm:$0xff] }
   0x7   :  { %163 = vmatpush.bf16.msra.mxu1 %v291_v3  ;;  %v301_v18 = vld [vmem:[%s381_s2] ss:$0 sm:$0xff] }
   0x9   :  { %v51_v17 = vld [vmem:[#allocation1 + $0x9] sm:$0xff] }
   0xa   :  { %103 = vmatpush.bf16.msra.mxu0 %v298_v5 }
   0xb   :  { %164 = vmatpush.bf16.msra.mxu1 %v290_v6 }
   0xe   :  { %104 = vmatpush.bf16.msra.mxu0 %v297_v7 }
   0xf   :  { %165 = vmatpush.bf16.msra.mxu1 %v289_v8 }
  0x12   :  { %105 = vmatpush.bf16.msra.mxu0 %v296_v9 }
  0x13   :  { %166 = vmatpush.bf16.msra.mxu1 %v288_v10 }
  0x16   :  { %106 = vmatpush.bf16.msra.mxu0 %v295_v11 }
  0x17   :  { %167 = vmatpush.bf16.msra.mxu1 %v287_v12 }
  0x1a   :  { %107 = vmatpush.bf16.msra.mxu0 %v294_v13 }
  0x1b   :  { %168 = vmatpush.bf16.msra.mxu1 %v286_v14 }
  0x1e   :  { %108 = vmatpush.bf16.msra.mxu0 %v293_v15 }
  0x1f   :  { %169 = vmatpush.bf16.msra.mxu1 %v285_v16 }
  0x21   :  { %109 = vmatmul.bf16.vlgmr.msra.gmra.mxu0 %v51_v17 }
  0x22   :  { %170 = vmatmul.bf16.vlgmr.msra.gmra.mxu1 %v14_v4 }
  0x9e   :  { %v110_v19 = vpop.f32.mrf.mxu0 }
  0x9f   :  { %v171_v20 = vpop.f32.mrf.mxu1 }
  0xa0   :  { %v172_v21 = vadd.f32 %v171_v20, %v110_v19 }
  0xa2   :  { %v179_v22 = vadd.f32 %v301_v18, %v172_v21 }
  0xa4   :  { %vm180_vm0 = vcmp.ge.f32.partialorder %v179_v22, 0.0  ;;  %v181_v23 = vmul.f32 0.2, %v179_v22 }
  0xa6   :  { %v182_v24 = vsel %vm180_vm0, %v179_v22, %v181_v23  ;;  %v112_v26 = vpop.f32.mrf.mxu0 }
  0xa7   :  { %v183_v25 = vpack.c.bf16 %v182_v24, %v182_v24  ;;  %v173_v27 = vpop.f32.mrf.mxu1 }
  0xa9   :  { %184 = vst [vmem:[%s382_s3] sm:$0x1] %v183_v25 }

// kernel: unet_forward.19
= control target key start
LH: loop header
LB: loop body
LE: loop exit
PB: predicated region body
PF: predicated region fallthrough
CT: control target
= control target key end

     0   :  { %s742_s15 = smov 0   ;;  %s744_s16 = smov 0   ;;  %s793_s0 = inlined_call_operand.vmem [shape: bf16[4,128], index: 0, kind: input, shape index: {}]   ;;  %s794_s1 = inlined_call_operand.vmem [shape: bf16[2,2,128,128], index: 1, kind: input, shape index: {}]   ;;  %s795_s2 = inlined_call_operand.vmem [shape: f32[1,128], index: 2, kind: input, shape index: {}]   ;;  %s796_s3 = inlined_call_operand.vmem [shape: bf16[4,256], index: 3, kind: input, shape index: {}]   ;;  %s797_s4 = inlined_call_operand.vmem [shape: bf16[4,256], index: 4, kind: output, shape index: {}]  }
   0x1   :  { %s746_s17 = smov 0  }
   0x2 LB: > { %s26_s18 = sadd.s32 1, %s711_s16  ;;  %p564_p0 = scmp.ge.s32.totalorder %s715_s17, 1  ;;  %s715_s17 = sphi %s746_s17, %s14_s17   ;;  %s711_s16 = sphi %s744_s16, %s799_s16   ;;  %s707_s15 = sphi %s742_s15, %s798_s15  }
   0x3   : > { %p28_p1 = scmp.ge.s32.totalorder %s26_s18, 2  ;;  %p202_p2 = scmp.lt.s32.totalorder %s715_s17, 3 }
   0x5   : > { %s801_s18 = smov (%p28_p1, %s26_s18), 0  ;;  %p203_p3 = pnand %p564_p0, %p202_p2 }
   0x6   : > { %p239_p4 = scmp.lt.s32.totalorder (!%p203_p3), %s707_s15, 1  ;;  %p385_p5 = scmp.eq.s32.totalorder (!%p203_p3), %s707_s15, 0 }
   0x7   : > { %206 = sbr.rel (%p203_p3) target bundleno = 196 (0xc4), region = 36 }
   0xc   : > { %s764_s19 = scalar_select %p239_p4, %s707_s15, 1  ;;  %v262_v16 = vld [vmem:[%s793_s0] sm:$0x3]  ;;  %v357_v17 = vlaneseq  ;;  %vm372_vm0 = vcmask 1047556  }
   0xd   : > { %s386_s26 = scalar_select %p385_p5, 1, 0  ;;  %v692_v33 = vld [vmem:[%s795_s2] ss:$0 sm:$0xff] }
   0xe   : > { %s651_s20 = sshll.u32 %s764_s19, 7  ;;  %v358_v18 = vshrl.u32 %v357_v17, 7  ;;  %s567_s27 = sshll.u32 %s764_s19, 1 }
   0xf   : > { %s246_s23 = scalar_lea.vmem %s794_s1, %s651_s20  ;;  %v387_v25 = vstv %s386_s26  ;;  %s254_s30 = scalar_lea.vmem %s796_s3, %s567_s27 }
  0x10   : > { %v667_v0 = vld [vmem:[%s246_s23 + $0x78] sm:$0xff]  ;;  %v666_v2 = vld [vmem:[%s246_s23 + $0x70] sm:$0xff]  ;;  %v665_v4 = vld [vmem:[%s246_s23 + $0x68] sm:$0xff]  ;;  %v363_v22 = vand.u32 1, %v358_v18  ;;  %vm388_vm3 = vcmp.eq.s32.totalorder %v387_v25, 1  ;;  %s260_s9 = scalar_lea.vmem %s797_s4, %s567_s27 }
  0x11   : > { %v659_v1 = vld [vmem:[%s246_s23 + $0x38] sm:$0xff]  ;;  %344 = vmatpush.bf16.msra.mxu0 %v667_v0  ;;  %v658_v3 = vld [vmem:[%s246_s23 + $0x30] sm:$0xff]  ;;  %v657_v5 = vld [vmem:[%s246_s23 + $0x28] sm:$0xff] }
  0x12   : > { %438 = vmatpush.bf16.msra.mxu1 %v659_v1  ;;  %v664_v6 = vld [vmem:[%s246_s23 + $0x60] sm:$0xff]  ;;  %v663_v8 = vld [vmem:[%s246_s23 + $0x58] sm:$0xff]  ;;  %v662_v10 = vld [vmem:[%s246_s23 + $0x50] sm:$0xff]  ;;  %vm371_vm1 = vcmp.eq.s32.totalorder %v363_v22, 0  ;;  %vm381_vm2 = vcmp.eq.s32.totalorder %v363_v22, 1 }
  0x13   : > { %v656_v7 = vld [vmem:[%s246_s23 + $0x20] sm:$0xff]  ;;  %v655_v9 = vld [vmem:[%s246_s23 + $0x18] sm:$0xff]  ;;  %v654_v11 = vld [vmem:[%s246_s23 + $0x10] sm:$0xff] }
  0x14   : > { %v661_v12 = vld [vmem:[%s246_s23 + $0x48] sm:$0xff]  ;;  %v660_v14 = vld [vmem:[%s246_s23 + $0x40] sm:$0xff] }
  0x15   : > { %345 = vmatpush.bf16.msra.mxu0 %v666_v2  ;;  %v653_v13 = vld [vmem:[%s246_s23 + $0x8] sm:$0xff]  ;;  %v652_v15 = vld [vmem:[%s246_s23] sm:$0xff] }
  0x16   : > { %439 = vmatpush.bf16.msra.mxu1 %v658_v3  ;;  %v459_v36 = vld [vmem:[%s254_s30] sm:$0x3] }
  0x17   : > { %v460_v38 = vunpack.c.l.bf16 %v459_v36 }
  0x19   : > { %346 = vmatpush.bf16.msra.mxu0 %v665_v4 }
  0x1a   : > { %440 = vmatpush.bf16.msra.mxu1 %v657_v5 }
  0x1d   : > { %347 = vmatpush.bf16.msra.mxu0 %v664_v6 }
  0x1e   : > { %441 = vmatpush.bf16.msra.mxu1 %v656_v7 }
  0x21   : > { %348 = vmatpush.bf16.msra.mxu0 %v663_v8 }
  0x22   : > { %442 = vmatpush.bf16.msra.mxu1 %v655_v9 }
  0x25   : > { %349 = vmatpush.bf16.msra.mxu0 %v662_v10 }
  0x26   : > { %443 = vmatpush.bf16.msra.mxu1 %v654_v11 }
  0x29   : > { %350 = vmatpush.bf16.msra.mxu0 %v661_v12 }
  0x2a   : > { %444 = vmatpush.bf16.msra.mxu1 %v653_v13 }
  0x2d   : > { %351 = vmatpush.bf16.msra.mxu0 %v660_v14 }
  0x2e   : > { %445 = vmatpush.bf16.msra.mxu1 %v652_v15 }
  0x30   : > { %352 = vmatmul.bf16.vlgmr.msra.gmra.mxu0 %v262_v16 }
  0x31   : > { %446 = vmatmul.bf16.vlgmr.msra.gmra.mxu1 %v262_v16 }
  0xad   : > { %v353_v19 = vpop.f32.mrf.mxu0 }
  0xae   : > { %v447_v20 = vpop.f32.mrf.mxu1  ;;  %v373_v21 = vrot.slane %v353_v19, 4 }
  0xb0   : > { %v374_v23 = vsel %vm372_vm0, %v373_v21, %v353_v19 }
  0xb1   : > { %v375_v24 = vrot.slane %v374_v23, 4 }
  0xb3   : > { %v376_v26 = vsel %vm372_vm0, %v375_v24, %v353_v19 }
  0xb4   : > { %v378_v27 = vrot.slane %v376_v26, 3  ;;  %v382_v28 = vrot.slane %v376_v26, 1 }
  0xb5   : > { %v355_v29 = vpop.f32.mrf.mxu0 }
  0xb6   : > { %v449_v30 = vpop.f32.mrf.mxu1  ;;  %v380_v31 = vsel %vm371_vm1, 0.0, %v378_v27  ;;  %v384_v32 = vsel %vm381_vm2, 0.0, %v382_v28 }
  0xb7   : > { %v389_v34 = vsel %vm388_vm3, %v380_v31, %v384_v32 }
  0xb8   : > { %v448_v35 = vadd.f32 %v447_v20, %v389_v34 }
  0xba   : > { %v455_v37 = vadd.f32 %v692_v33, %v448_v35 }
  0xbc   : > { %vm456_vm4 = vcmp.ge.f32.partialorder %v455_v37, 0.0  ;;  %v457_v39 = vmul.f32 0.2, %v455_v37 }
  0xbe   : > { %v458_v40 = vsel %vm456_vm4, %v455_v37, %v457_v39 }
  0xbf   : > { %v461_v41 = vadd.f32 %v460_v38, %v458_v40 }
  0xc1   : > { %v462_v42 = vpack.c.bf16 %v461_v41, %v461_v41 }
  0xc3   : > { %463 = vst [vmem:[%s260_s9] sm:$0x3] %v462_v42 }
  0xc4 PF: > { %s14_s17 = sadd.s32 1, %s715_s17   ;;  %s798_s15 = smov %s711_s16 }
  0xc5   : > { %p11_p6 = scmp.ge.s32.totalorder %s14_s17, 4   ;;  %s799_s16 = smov %s801_s18 }
  0xc7   :  { %13 = sbr.rel (!%p11_p6) target bundleno = 2 (0x2), region = 73 }

// kernel: unet_forward.20
= control target key start
LH: loop header
LB: loop body
LE: loop exit
PB: predicated region body
PF: predicated region fallthrough
CT: control target
= control target key end

     0   :  { %s734_s15 = smov 0   ;;  %s736_s16 = smov 0   ;;  %s785_s0 = inlined_call_operand.vmem [shape: bf16[8,128], index: 0, kind: input, shape index: {}]   ;;  %s786_s1 = inlined_call_operand.vmem [shape: bf16[2,2,128,128], index: 1, kind: input, shape index: {}]   ;;  %s787_s2 = inlined_call_operand.vmem [shape: f32[1,128], index: 2, kind: input, shape index: {}]   ;;  %s788_s3 = inlined_call_operand.vmem [shape: bf16[8,256], index: 3, kind: input, shape index: {}]   ;;  %s789_s4 = inlined_call_operand.vmem [shape: bf16[8,256], index: 4, kind: output, shape index: {}]  }
   0x1   :  { %s738_s17 = smov 0  }
   0x2 LB: > { %s26_s18 = sadd.s32 1, %s703_s16  ;;  %p556_p0 = scmp.ge.s32.totalorder %s707_s17, 1  ;;  %s707_s17 = sphi %s738_s17, %s14_s17   ;;  %s703_s16 = sphi %s736_s16, %s791_s16   ;;  %s699_s15 = sphi %s734_s15, %s790_s15  }
   0x3   : > { %p28_p1 = scmp.ge.s32.totalorder %s26_s18, 2  ;;  %p202_p2 = scmp.lt.s32.totalorder %s707_s17, 3 }
   0x5   : > { %s793_s18 = smov (%p28_p1, %s26_s18), 0  ;;  %p203_p3 = pnand %p556_p0, %p202_p2 }
   0x6   : > { %p239_p4 = scmp.lt.s32.totalorder (!%p203_p3), %s699_s15, 1  ;;  %p377_p5 = scmp.eq.s32.totalorder (!%p203_p3), %s699_s15, 0 }
   0x7   : > { %206 = sbr.rel (%p203_p3) target bundleno = 190 (0xbe), region = 36 }
   0xc   : > { %s756_s19 = scalar_select %p239_p4, %s699_s15, 1  ;;  %v262_v16 = vld [vmem:[%s785_s0] sm:$0xf]  ;;  %v357_v17 = vlaneseq }
   0xd   : > { %s378_s26 = scalar_select %p377_p5, 1, 0  ;;  %v684_v27 = vld [vmem:[%s787_s2] ss:$0 sm:$0xff] }
   0xe   : > { %s643_s20 = sshll.u32 %s756_s19, 7  ;;  %v358_v18 = vshrl.u32 %v357_v17, 7  ;;  %s559_s27 = sshll.u32 %s756_s19, 2 }
   0xf   : > { %s246_s23 = scalar_lea.vmem %s786_s1, %s643_s20  ;;  %v379_v20 = vstv %s378_s26  ;;  %s254_s30 = scalar_lea.vmem %s788_s3, %s559_s27 }
  0x10   : > { %v659_v0 = vld [vmem:[%s246_s23 + $0x78] sm:$0xff]  ;;  %v658_v2 = vld [vmem:[%s246_s23 + $0x70] sm:$0xff]  ;;  %v657_v4 = vld [vmem:[%s246_s23 + $0x68] sm:$0xff]  ;;  %v363_v19 = vand.u32 3, %v358_v18  ;;  %vm380_vm2 = vcmp.eq.s32.totalorder %v379_v20, 1  ;;  %s260_s9 = scalar_lea.vmem %s789_s4, %s559_s27 }
  0x11   : > { %v651_v1 = vld [vmem:[%s246_s23 + $0x38] sm:$0xff]  ;;  %344 = vmatpush.bf16.msra.mxu0 %v659_v0  ;;  %v650_v3 = vld [vmem:[%s246_s23 + $0x30] sm:$0xff]  ;;  %v649_v5 = vld [vmem:[%s246_s23 + $0x28] sm:$0xff] }
  0x12   : > { %430 = vmatpush.bf16.msra.mxu1 %v651_v1  ;;  %v656_v6 = vld [vmem:[%s246_s23 + $0x60] sm:$0xff]  ;;  %v655_v8 = vld [vmem:[%s246_s23 + $0x58] sm:$0xff]  ;;  %v654_v10 = vld [vmem:[%s246_s23 + $0x50] sm:$0xff]  ;;  %vm371_vm0 = vcmp.eq.s32.totalorder %v363_v19, 0  ;;  %vm374_vm1 = vcmp.eq.s32.totalorder %v363_v19, 3 }
  0x13   : > { %v648_v7 = vld [vmem:[%s246_s23 + $0x20] sm:$0xff]  ;;  %v647_v9 = vld [vmem:[%s246_s23 + $0x18] sm:$0xff]  ;;  %v646_v11 = vld [vmem:[%s246_s23 + $0x10] sm:$0xff] }
  0x14   : > { %v653_v12 = vld [vmem:[%s246_s23 + $0x48] sm:$0xff]  ;;  %v652_v14 = vld [vmem:[%s246_s23 + $0x40] sm:$0xff] }
  0x15   : > { %345 = vmatpush.bf16.msra.mxu0 %v658_v2  ;;  %v645_v13 = vld [vmem:[%s246_s23 + $0x8] sm:$0xff]  ;;  %v644_v15 = vld [vmem:[%s246_s23] sm:$0xff] }
  0x16   : > { %431 = vmatpush.bf16.msra.mxu1 %v650_v3  ;;  %v451_v30 = vld [vmem:[%s254_s30] sm:$0xf] }
  0x17   : > { %v452_v32 = vunpack.c.l.bf16 %v451_v30 }
  0x19   : > { %346 = vmatpush.bf16.msra.mxu0 %v657_v4 }
  0x1a   : > { %432 = vmatpush.bf16.msra.mxu1 %v649_v5 }
  0x1d   : > { %347 = vmatpush.bf16.msra.mxu0 %v656_v6 }
  0x1e   : > { %433 = vmatpush.bf16.msra.mxu1 %v648_v7 }
  0x21   : > { %348 = vmatpush.bf16.msra.mxu0 %v655_v8 }
  0x22   : > { %434 = vmatpush.bf16.msra.mxu1 %v647_v9 }
  0x25   : > { %349 = vmatpush.bf16.msra.mxu0 %v654_v10 }
  0x26   : > { %435 = vmatpush.bf16.msra.mxu1 %v646_v11 }
  0x29   : > { %350 = vmatpush.bf16.msra.mxu0 %v653_v12 }
  0x2a   : > { %436 = vmatpush.bf16.msra.mxu1 %v645_v13 }
  0x2d   : > { %351 = vmatpush.bf16.msra.mxu0 %v652_v14 }
  0x2e   : > { %437 = vmatpush.bf16.msra.mxu1 %v644_v15 }
  0x30   : > { %352 = vmatmul.bf16.vlgmr.msra.gmra.mxu0 %v262_v16 }
  0x31   : > { %438 = vmatmul.bf16.vlgmr.msra.gmra.mxu1 %v262_v16 }
  0xad   : > { %v353_v21 = vpop.f32.mrf.mxu0 }
  0xae   : > { %v439_v22 = vpop.f32.mrf.mxu1  ;;  %v372_v23 = vrot.slane %v353_v21, 7  ;;  %v375_v24 = vrot.slane %v353_v21, 1 }
  0xb0   : > { %v373_v25 = vsel %vm371_vm0, 0.0, %v372_v23  ;;  %v376_v26 = vsel %vm374_vm1, 0.0, %v375_v24 }
  0xb1   : > { %v381_v28 = vsel %vm380_vm2, %v373_v25, %v376_v26 }
  0xb2   : > { %v440_v29 = vadd.f32 %v439_v22, %v381_v28 }
  0xb4   : > { %v447_v31 = vadd.f32 %v684_v27, %v440_v29 }
  0xb5   : > { %v355_v33 = vpop.f32.mrf.mxu0 }
  0xb6   : > { %v441_v34 = vpop.f32.mrf.mxu1  ;;  %vm448_vm3 = vcmp.ge.f32.partialorder %v447_v31, 0.0  ;;  %v449_v35 = vmul.f32 0.2, %v447_v31 }
  0xb8   : > { %v450_v36 = vsel %vm448_vm3, %v447_v31, %v449_v35 }
  0xb9   : > { %v453_v37 = vadd.f32 %v452_v32, %v450_v36 }
  0xbb   : > { %v454_v38 = vpack.c.bf16 %v453_v37, %v453_v37 }
  0xbd   : > { %455 = vst [vmem:[%s260_s9] sm:$0xf] %v454_v38 }
  0xbe PF: > { %s14_s17 = sadd.s32 1, %s707_s17   ;;  %s790_s15 = smov %s703_s16 }
  0xbf   : > { %p11_p6 = scmp.ge.s32.totalorder %s14_s17, 4   ;;  %s791_s16 = smov %s793_s18 }
  0xc1   :  { %13 = sbr.rel (!%p11_p6) target bundleno = 2 (0x2), region = 73 }

// kernel: unet_forward.21
= control target key start
LH: loop header
LB: loop body
LE: loop exit
PB: predicated region body
PF: predicated region fallthrough
CT: control target
= control target key end

     0   :  { %s926_s15 = smov 0   ;;  %s928_s16 = smov 0   ;;  %s1038_s0 = inlined_call_operand.vmem [shape: bf16[16,128], index: 0, kind: input, shape index: {}]   ;;  %s1039_s1 = inlined_call_operand.vmem [shape: bf16[2,2,128,128], index: 1, kind: input, shape index: {}]   ;;  %s1040_s2 = inlined_call_operand.vmem [shape: f32[1,128], index: 2, kind: input, shape index: {}]   ;;  %s1041_s3 = inlined_call_operand.vmem [shape: bf16[16,256], index: 3, kind: input, shape index: {}]   ;;  %s1042_s4 = inlined_call_operand.vmem [shape: bf16[16,256], index: 4, kind: output, shape index: {}]  }
   0x1   :  { %s930_s17 = smov 0   ;;  %s932_s18 = smov 0  }
   0x2   :  { %s934_s19 = smov 0  }
   0x3 LB: > { %s26_s20 = sadd.s32 1, %s895_s18  ;;  %s693_s21 = sadd.s32 4294967295, %s899_s19   ;;  %s899_s19 = sphi %s934_s19, %s14_s19   ;;  %s895_s18 = sphi %s932_s18, %s1055_s18   ;;  %s891_s17 = sphi %s930_s17, %s1054_s17   ;;  %s887_s16 = sphi %s928_s16, %s1053_s16   ;;  %s883_s15 = sphi %s926_s15, %s1052_s15  }
   0x4   : > { %p28_p0 = scmp.ge.s32.totalorder %s26_s20, 2  ;;  %p117_p1 = scmp.ne.s32.totalorder %s887_s16, %s883_s15 }
   0x5   : > { %p118_p2 = scmp.eq.s32.totalorder %s899_s19, 0  ;;  %p149_p4 = scmp.eq.s32.totalorder %s693_s21, 1 }
   0x6   : > { %s1057_s20 = smov (%p28_p0, %s26_s20), 0  ;;  %s110_s23 = sadd.s32 1, %s887_s16 }
   0x7   : > { %p119_p3 = por %p118_p2, %p117_p1  ;;  %s107_s22 = ssub.s32 %s895_s18, %s1057_s20 }
   0x8   : > { %p108_p5 = scmp.eq.s32.totalorder %s107_s22, 0  ;;  %p961_p6 = por %p149_p4, %p117_p1 }
   0x9   : > { %p697_p7 = scmp.ge.s32.totalorder %s899_s19, 2 }
   0xa   : > { %s966_s25 = scalar_select %p108_p5, %s887_s16, %s110_s23  }
   0xb   : > { %180 = sbr.rel (%p697_p7) target bundleno = 22 (0x16), region = 24 }
  0x10   : > { %194 = sbr.rel (!%p119_p3) target bundleno = 22 (0x16), region = 32  ;;  %s196_s26 = sand.u32 (%p119_p3), 1, %s887_s16  }
  0x11   : > { %s699_s27 = sshll.u32 (%p119_p3), %s895_s18, 2  ;;  %s698_s28 = sshll.u32 (%p119_p3), %s196_s26, 3 }
  0x12   : > { %s201_s5 = scalar_lea.vmem (%p119_p3), %s1041_s3, %s699_s27  ;;  %s198_s6 = scalar_lea.vmem (%p119_p3), [#allocation2], %s698_s28 }
  0x13   : > { %v218_v0 = vld [vmem:[%s201_s5] sm:$0xf] (%p119_p3)  ;;  %v220_v1 = vld [vmem:[%s201_s5 + $0x8] sm:$0xf] (%p119_p3) }
  0x14   : > { %219 = vst [vmem:[%s198_s6] sm:$0xf] (%p119_p3), %v218_v0 }
  0x15   : > { %221 = vst [vmem:[%s198_s6 + $0x4] sm:$0xf] %v220_v1 }
  0x16 PF: > { %p700_p8 = scmp.ge.s32.totalorder %s899_s19, 1  ;;  %p248_p9 = scmp.lt.s32.totalorder %s899_s19, 3 }
  0x18   : > { %p249_p10 = pnand %p700_p8, %p248_p9 }
  0x19   : > { %p290_p11 = scmp.lt.s32.totalorder (!%p249_p10), %s891_s17, 1  ;;  %p451_p12 = scmp.eq.s32.totalorder (!%p249_p10), %s891_s17, 0 }
  0x1a   : > { %252 = sbr.rel (%p249_p10) target bundleno = 227 (0xe3), region = 73  ;;  %s255_s21 = sand.u32 (!%p249_p10), 1, %s883_s15  }
  0x1b   : > { %s994_s22 = sshll.u32 (!%p249_p10), %s255_s21, 3 }
  0x1c   : > { %s257_s26 = scalar_lea.vmem (!%p249_p10), [#allocation2], %s994_s22  ;;  %s289_s27 = scalar_lea.vmem (!%p249_p10), [#allocation3], %s994_s22 }
  0x1f   : > { %s291_s7 = scalar_select %p290_p11, %s891_s17, 1  ;;  %v794_v18 = vld [vmem:[%s1038_s0] sm:$0xff]  ;;  %v406_v19 = vlaneseq }
  0x20   : > { %s452_s14 = scalar_select %p451_p12, 1, 0  ;;  %v860_v44 = vld [vmem:[%s1040_s2] ss:$0 sm:$0xff] }
  0x21   : > { %s793_s8 = sshll.u32 %s291_s7, 7  ;;  %v407_v20 = vshrl.u32 %v406_v19, 7  ;;  %v812_v50 = vld [vmem:[%s257_s26] sm:$0xff]   ;;  %s790_s28 = sshll.u32 (%p961_p6), %s891_s17, 2 }
  0x22   : > { %s297_s11 = scalar_lea.vmem %s1039_s1, %s793_s8  ;;  %v453_v27 = vstv %s452_s14  ;;  %v813_v53 = vunpack.c.l.bf16 %v812_v50  ;;  %v814_v54 = vunpack.c.h.bf16 %v812_v50  ;;  %s550_s5 = scalar_lea.vmem (%p961_p6), %s1042_s4, %s790_s28 }
  0x23   : > { %v810_v2 = vld [vmem:[%s297_s11 + $0x78] sm:$0xff]  ;;  %v809_v4 = vld [vmem:[%s297_s11 + $0x70] sm:$0xff]  ;;  %v808_v6 = vld [vmem:[%s297_s11 + $0x68] sm:$0xff]  ;;  %v408_v22 = vadd.s32 8, %v407_v20  ;;  %v413_v24 = vand.u32 7, %v407_v20  ;;  %vm437_vm1 = vcmp.lt.s32.totalorder %v407_v20, 1 }
  0x24   : > { %v802_v3 = vld [vmem:[%s297_s11 + $0x38] sm:$0xff]  ;;  %392 = vmatpush.bf16.msra.mxu0 %v810_v2  ;;  %v801_v5 = vld [vmem:[%s297_s11 + $0x30] sm:$0xff]  ;;  %v800_v7 = vld [vmem:[%s297_s11 + $0x28] sm:$0xff]  ;;  %vm446_vm3 = vcmp.lt.s32.totalorder %v407_v20, 7  ;;  %vm454_vm6 = vcmp.eq.s32.totalorder %v453_v27, 1 }
  0x25   : > { %505 = vmatpush.bf16.msra.mxu1 %v802_v3  ;;  %v807_v8 = vld [vmem:[%s297_s11 + $0x60] sm:$0xff]  ;;  %v806_v10 = vld [vmem:[%s297_s11 + $0x58] sm:$0xff]  ;;  %v805_v12 = vld [vmem:[%s297_s11 + $0x50] sm:$0xff]  ;;  %v420_v25 = vand.u32 7, %v408_v22  ;;  %vm986_vm0 = vcmp.eq.s32.totalorder %v413_v24, 0  ;;  %vm990_vm2 = vcmp.eq.s32.totalorder %v413_v24, 7 }
  0x26   : > { %v799_v9 = vld [vmem:[%s297_s11 + $0x20] sm:$0xff]  ;;  %v798_v11 = vld [vmem:[%s297_s11 + $0x18] sm:$0xff]  ;;  %v797_v13 = vld [vmem:[%s297_s11 + $0x10] sm:$0xff] }
  0x27   : > { %v804_v14 = vld [vmem:[%s297_s11 + $0x48] sm:$0xff]  ;;  %v803_v16 = vld [vmem:[%s297_s11 + $0x40] sm:$0xff]  ;;  %vm996_vm4 = vcmp.eq.s32.totalorder %v420_v25, 0  ;;  %vm1000_vm5 = vcmp.eq.s32.totalorder %v420_v25, 7 }
  0x28   : > { %393 = vmatpush.bf16.msra.mxu0 %v809_v4  ;;  %v796_v15 = vld [vmem:[%s297_s11 + $0x8] sm:$0xff]  ;;  %v795_v17 = vld [vmem:[%s297_s11] sm:$0xff] }
  0x29   : > { %506 = vmatpush.bf16.msra.mxu1 %v801_v5 }
  0x2c   : > { %394 = vmatpush.bf16.msra.mxu0 %v808_v6 }
  0x2d   : > { %507 = vmatpush.bf16.msra.mxu1 %v800_v7 }
  0x30   : > { %395 = vmatpush.bf16.msra.mxu0 %v807_v8 }
  0x31   : > { %508 = vmatpush.bf16.msra.mxu1 %v799_v9 }
  0x34   : > { %396 = vmatpush.bf16.msra.mxu0 %v806_v10 }
  0x35   : > { %509 = vmatpush.bf16.msra.mxu1 %v798_v11 }
  0x38   : > { %397 = vmatpush.bf16.msra.mxu0 %v805_v12 }
  0x39   : > { %510 = vmatpush.bf16.msra.mxu1 %v797_v13 }
  0x3c   : > { %398 = vmatpush.bf16.msra.mxu0 %v804_v14 }
  0x3d   : > { %511 = vmatpush.bf16.msra.mxu1 %v796_v15 }
  0x40   : > { %399 = vmatpush.bf16.msra.mxu0 %v803_v16 }
  0x41   : > { %512 = vmatpush.bf16.msra.mxu1 %v795_v17 }
  0x43   : > { %400 = vmatmul.bf16.vlgmr.msra.gmra.mxu0 %v794_v18 }
  0x44   : > { %513 = vmatmul.bf16.vlgmr.msra.gmra.mxu1 %v794_v18 }
  0xc0   : > { %v401_v21 = vpop.f32.mrf.mxu0 }
  0xc1   : > { %v514_v23 = vpop.f32.mrf.mxu1  ;;  %v435_v32 = vrot.slane %v401_v21, 7  ;;  %v444_v33 = vrot.slane %v401_v21, 1 }
  0xc8   : > { %v403_v28 = vpop.f32.mrf.mxu0 }
  0xc9   : > { %v436_v34 = vrot.slane %v403_v28, 7  ;;  %v445_v35 = vrot.slane %v403_v28, 1  ;;  %v516_v47 = vpop.f32.mrf.mxu1 }
  0xcb   : > { %v439_v36 = vsel %vm437_vm1, %v436_v34, %v435_v32  ;;  %v447_v37 = vsel %vm446_vm3, %v444_v33, %v445_v35  ;;  %v438_v38 = vsel %vm437_vm1, %v435_v32, %v436_v34  ;;  %v448_v39 = vsel %vm446_vm3, %v445_v35, %v444_v33 }
  0xcc   : > { %v440_v40 = vsel %vm986_vm0, 0.0, %v439_v36  ;;  %v449_v41 = vsel %vm990_vm2, 0.0, %v447_v37  ;;  %v441_v42 = vsel %vm996_vm4, 0.0, %v438_v38  ;;  %v450_v43 = vsel %vm1000_vm5, 0.0, %v448_v39 }
  0xcd   : > { %v455_v45 = vsel %vm454_vm6, %v440_v40, %v449_v41  ;;  %v456_v46 = vsel %vm454_vm6, %v441_v42, %v450_v43 }
  0xce   : > { %v515_v48 = vadd.f32 %v514_v23, %v455_v45  ;;  %v517_v49 = vadd.f32 %v516_v47, %v456_v46 }
  0xd0   : > { %v523_v51 = vadd.f32 %v860_v44, %v515_v48  ;;  %v524_v52 = vadd.f32 %v860_v44, %v517_v49 }
  0xd2   : > { %vm525_vm7 = vcmp.ge.f32.partialorder %v523_v51, 0.0  ;;  %vm526_vm8 = vcmp.ge.f32.partialorder %v524_v52, 0.0  ;;  %v527_v55 = vmul.f32 0.2, %v523_v51  ;;  %v528_v56 = vmul.f32 0.2, %v524_v52 }
  0xd4   : > { %v529_v57 = vsel %vm525_vm7, %v523_v51, %v527_v55  ;;  %v530_v58 = vsel %vm526_vm8, %v524_v52, %v528_v56 }
  0xd5   : > { %v535_v59 = vadd.f32 %v813_v53, %v529_v57  ;;  %v536_v60 = vadd.f32 %v814_v54, %v530_v58  ;;  %547 = sbr.rel (!%p961_p6) target bundleno = 227 (0xe3), region = 81 }
  0xd7   : > { %v818_v61 = vpack.c.bf16 %v536_v60, %v535_v59 }
  0xd9   : > { %819 = vst [vmem:[%s289_s27] sm:$0xff] %v818_v61  }
  0xe0   : > { %v567_v62 = vld [vmem:[%s289_s27] sm:$0xf]  ;;  %v569_v63 = vld [vmem:[%s289_s27 + $0x4] sm:$0xf] }
  0xe1   : > { %568 = vst [vmem:[%s550_s5] sm:$0xf] %v567_v62 }
  0xe2   : > { %570 = vst [vmem:[%s550_s5 + $0x8] sm:$0xf] %v569_v63 }
  0xe3 PF: > { %s14_s19 = sadd.s32 1, %s899_s19   ;;  %s1052_s15 = smov %s887_s16 }
  0xe4   : > { %p11_p13 = scmp.ge.s32.totalorder %s14_s19, 4   ;;  %s1053_s16 = smov %s966_s25 }
  0xe5   : > { %s1054_s17 = smov %s895_s18  ;;  %s1055_s18 = smov %s1057_s20 }
  0xe6   :  { %13 = sbr.rel (!%p11_p13) target bundleno = 3 (0x3), region = 160 }

// kernel: unet_forward.23
= control target key start
LH: loop header
LB: loop body
LE: loop exit
PB: predicated region body
PF: predicated region fallthrough
CT: control target
= control target key end

     0   :  { %s897_s0 = inlined_call_operand.vmem [shape: bf16[1,64,128], index: 0, kind: input, shape index: {}]   ;;  %s898_s1 = inlined_call_operand.vmem [shape: bf16[128,512], index: 1, kind: input, shape index: {}]   ;;  %s899_s2 = inlined_call_operand.vmem [shape: f32[1,512], index: 2, kind: input, shape index: {}]   ;;  %s900_s3 = inlined_call_operand.hbm [shape: f32[1,64,512], index: 3, kind: output, shape index: {}]  }
   0x1   :  { %v545_v0 = vld [vmem:[%s898_s1 + $0xe0] sm:$0xf]  ;;  %v593_v1 = vld [vmem:[%s898_s1 + $0xec] sm:$0xf0]  ;;  %v591_v2 = vld [vmem:[%s898_s1 + $0xe4] sm:$0xf] }
   0x2   :  { %v546_v3 = vor.u32 %v593_v1, %v545_v0  ;;  %v547_v4 = vld [vmem:[%s898_s1 + $0xf0] sm:$0xf0]  ;;  %v553_v5 = vld [vmem:[%s898_s1 + $0xe8] sm:$0xf]  ;;  %v594_v6 = vld [vmem:[%s898_s1 + $0xf4] sm:$0xf0] }
   0x3   :  { %v550_v7 = vor.u32 %v591_v2, %v547_v4  ;;  %v554_v8 = vor.u32 %v594_v6, %v553_v5  ;;  %v592_v9 = vld [vmem:[%s898_s1 + $0xec] sm:$0xf]  ;;  %v555_v10 = vld [vmem:[%s898_s1 + $0xf8] sm:$0xf0]  ;;  %v529_v11 = vld [vmem:[%s898_s1 + $0xc0] sm:$0xf] }
   0x4   :  { %249 = vmatpush.bf16.msra.mxu0 %v546_v3  ;;  %v558_v12 = vor.u32 %v592_v9, %v555_v10  ;;  %v589_v13 = vld [vmem:[%s898_s1 + $0xcc] sm:$0xf0]  ;;  %v587_v14 = vld [vmem:[%s898_s1 + $0xc4] sm:$0xf]  ;;  %v531_v15 = vld [vmem:[%s898_s1 + $0xd0] sm:$0xf0] }
   0x5   :  { %278 = vmatpush.bf16.msra.mxu1 %v550_v7  ;;  %307 = vmatpush.bf16.msra.mxu2 %v554_v8  ;;  %v530_v16 = vor.u32 %v589_v13, %v529_v11  ;;  %v534_v17 = vor.u32 %v587_v14, %v531_v15  ;;  %v537_v18 = vld [vmem:[%s898_s1 + $0xc8] sm:$0xf]  ;;  %v590_v19 = vld [vmem:[%s898_s1 + $0xd4] sm:$0xf0]  ;;  %v588_v20 = vld [vmem:[%s898_s1 + $0xcc] sm:$0xf] }
   0x6   :  { %336 = vmatpush.bf16.msra.mxu3 %v558_v12  ;;  %v538_v21 = vor.u32 %v590_v19, %v537_v18  ;;  %v539_v22 = vld [vmem:[%s898_s1 + $0xd8] sm:$0xf0]  ;;  %v513_v23 = vld [vmem:[%s898_s1 + $0xa0] sm:$0xf]  ;;  %v585_v24 = vld [vmem:[%s898_s1 + $0xac] sm:$0xf0] }
   0x7   :  { %v542_v25 = vor.u32 %v588_v20, %v539_v22  ;;  %v583_v26 = vld [vmem:[%s898_s1 + $0xa4] sm:$0xf]  ;;  %v515_v27 = vld [vmem:[%s898_s1 + $0xb0] sm:$0xf0]  ;;  %v521_v28 = vld [vmem:[%s898_s1 + $0xa8] sm:$0xf]  ;;  %v514_v29 = vor.u32 %v585_v24, %v513_v23 }
   0x8   :  { %250 = vmatpush.bf16.msra.mxu0 %v530_v16  ;;  %v586_v30 = vld [vmem:[%s898_s1 + $0xb4] sm:$0xf0]  ;;  %v584_v31 = vld [vmem:[%s898_s1 + $0xac] sm:$0xf]  ;;  %v523_v32 = vld [vmem:[%s898_s1 + $0xb8] sm:$0xf0]  ;;  %v518_v33 = vor.u32 %v583_v26, %v515_v27 }
   0x9   :  { %279 = vmatpush.bf16.msra.mxu1 %v534_v17  ;;  %308 = vmatpush.bf16.msra.mxu2 %v538_v21  ;;  %v522_v34 = vor.u32 %v586_v30, %v521_v28  ;;  %v497_v35 = vld [vmem:[%s898_s1 + $0x80] sm:$0xf]  ;;  %v581_v36 = vld [vmem:[%s898_s1 + $0x8c] sm:$0xf0]  ;;  %v579_v37 = vld [vmem:[%s898_s1 + $0x84] sm:$0xf]  ;;  %v526_v38 = vor.u32 %v584_v31, %v523_v32 }
   0xa   :  { %337 = vmatpush.bf16.msra.mxu3 %v542_v25  ;;  %v499_v39 = vld [vmem:[%s898_s1 + $0x90] sm:$0xf0]  ;;  %v505_v40 = vld [vmem:[%s898_s1 + $0x88] sm:$0xf]  ;;  %v582_v41 = vld [vmem:[%s898_s1 + $0x94] sm:$0xf0]  ;;  %v498_v44 = vor.u32 %v581_v36, %v497_v35 }
   0xb   :  { %v580_v42 = vld [vmem:[%s898_s1 + $0x8c] sm:$0xf]  ;;  %v507_v43 = vld [vmem:[%s898_s1 + $0x98] sm:$0xf0]  ;;  %v502_v45 = vor.u32 %v579_v37, %v499_v39  ;;  %v506_v46 = vor.u32 %v582_v41, %v505_v40  ;;  %v481_v47 = vld [vmem:[%s898_s1 + $0x60] sm:$0xf] }
   0xc   :  { %251 = vmatpush.bf16.msra.mxu0 %v514_v29  ;;  %v577_v48 = vld [vmem:[%s898_s1 + $0x6c] sm:$0xf0]  ;;  %v575_v49 = vld [vmem:[%s898_s1 + $0x64] sm:$0xf]  ;;  %v510_v50 = vor.u32 %v580_v42, %v507_v43  ;;  %v483_v51 = vld [vmem:[%s898_s1 + $0x70] sm:$0xf0] }
   0xd   :  { %280 = vmatpush.bf16.msra.mxu1 %v518_v33  ;;  %309 = vmatpush.bf16.msra.mxu2 %v522_v34  ;;  %v489_v52 = vld [vmem:[%s898_s1 + $0x68] sm:$0xf]  ;;  %v578_v53 = vld [vmem:[%s898_s1 + $0x74] sm:$0xf0]  ;;  %v576_v54 = vld [vmem:[%s898_s1 + $0x6c] sm:$0xf]  ;;  %v482_v56 = vor.u32 %v577_v48, %v481_v47  ;;  %v486_v57 = vor.u32 %v575_v49, %v483_v51 }
   0xe   :  { %338 = vmatpush.bf16.msra.mxu3 %v526_v38  ;;  %v491_v55 = vld [vmem:[%s898_s1 + $0x78] sm:$0xf0]  ;;  %v490_v58 = vor.u32 %v578_v53, %v489_v52  ;;  %v465_v59 = vld [vmem:[%s898_s1 + $0x40] sm:$0xf]  ;;  %v573_v60 = vld [vmem:[%s898_s1 + $0x4c] sm:$0xf0] }
   0xf   :  { %v571_v61 = vld [vmem:[%s898_s1 + $0x44] sm:$0xf]  ;;  %v494_v62 = vor.u32 %v576_v54, %v491_v55  ;;  %v467_v63 = vld [vmem:[%s898_s1 + $0x50] sm:$0xf0]  ;;  %v473_v0 = vld [vmem:[%s898_s1 + $0x48] sm:$0xf]  ;;  %v466_v4 = vor.u32 %v573_v60, %v465_v59 }
  0x10   :  { %252 = vmatpush.bf16.msra.mxu0 %v498_v44  ;;  %v574_v1 = vld [vmem:[%s898_s1 + $0x54] sm:$0xf0]  ;;  %v572_v2 = vld [vmem:[%s898_s1 + $0x4c] sm:$0xf]  ;;  %v475_v3 = vld [vmem:[%s898_s1 + $0x58] sm:$0xf0]  ;;  %v470_v5 = vor.u32 %v571_v61, %v467_v63 }
  0x11   :  { %281 = vmatpush.bf16.msra.mxu1 %v502_v45  ;;  %310 = vmatpush.bf16.msra.mxu2 %v506_v46  ;;  %v474_v6 = vor.u32 %v574_v1, %v473_v0  ;;  %v449_v7 = vld [vmem:[%s898_s1 + $0x20] sm:$0xf]  ;;  %v569_v8 = vld [vmem:[%s898_s1 + $0x2c] sm:$0xf0]  ;;  %v567_v9 = vld [vmem:[%s898_s1 + $0x24] sm:$0xf]  ;;  %v478_v10 = vor.u32 %v572_v2, %v475_v3 }
  0x12   :  { %339 = vmatpush.bf16.msra.mxu3 %v510_v50  ;;  %v451_v11 = vld [vmem:[%s898_s1 + $0x30] sm:$0xf0]  ;;  %v457_v12 = vld [vmem:[%s898_s1 + $0x28] sm:$0xf]  ;;  %v570_v13 = vld [vmem:[%s898_s1 + $0x34] sm:$0xf0] }
  0x13   :  { %v568_v14 = vld [vmem:[%s898_s1 + $0x2c] sm:$0xf]  ;;  %v459_v15 = vld [vmem:[%s898_s1 + $0x38] sm:$0xf0] }
  0x14   :  { %253 = vmatpush.bf16.msra.mxu0 %v482_v56 }
  0x15   :  { %282 = vmatpush.bf16.msra.mxu1 %v486_v57  ;;  %311 = vmatpush.bf16.msra.mxu2 %v490_v58 }
  0x16   :  { %340 = vmatpush.bf16.msra.mxu3 %v494_v62 }
  0x17   :  { %8 = vsyncpa [#allocation3], 0  ;;  %v450_v16 = vor.u32 %v569_v8, %v449_v7  ;;  %v454_v17 = vor.u32 %v567_v9, %v451_v11  ;;  %v458_v18 = vor.u32 %v570_v13, %v457_v12  ;;  %v433_v19 = vld [vmem:[%s898_s1] sm:$0xf]  ;;  %v565_v20 = vld [vmem:[%s898_s1 + $0xc] sm:$0xf0]  ;;  %v462_v22 = vor.u32 %v568_v14, %v459_v15 }
  0x18   :  { %254 = vmatpush.bf16.msra.mxu0 %v466_v4  ;;  %v563_v21 = vld [vmem:[%s898_s1 + $0x4] sm:$0xf]  ;;  %v435_v23 = vld [vmem:[%s898_s1 + $0x10] sm:$0xf0]  ;;  %v441_v24 = vld [vmem:[%s898_s1 + $0x8] sm:$0xf]  ;;  %v434_v28 = vor.u32 %v565_v20, %v433_v19 }
  0x19   :  { %283 = vmatpush.bf16.msra.mxu1 %v470_v5  ;;  %312 = vmatpush.bf16.msra.mxu2 %v474_v6  ;;  %v566_v25 = vld [vmem:[%s898_s1 + $0x14] sm:$0xf0]  ;;  %v564_v26 = vld [vmem:[%s898_s1 + $0xc] sm:$0xf]  ;;  %v443_v27 = vld [vmem:[%s898_s1 + $0x18] sm:$0xf0]  ;;  %v438_v29 = vor.u32 %v563_v21, %v435_v23 }
  0x1a   :  { %341 = vmatpush.bf16.msra.mxu3 %v478_v10  ;;  %v442_v30 = vor.u32 %v566_v25, %v441_v24  ;;  %v446_v31 = vor.u32 %v564_v26, %v443_v27  ;;  %v559_v32 = vld [vmem:[%s897_s0] sm:$0xff]  ;;  %v560_v33 = vld [vmem:[%s897_s0 + $0x8] sm:$0xff]  ;;  %v561_v34 = vld [vmem:[%s897_s0 + $0x10] sm:$0xff]  ;;  %s403_s16 = sshll.u32 %s900_s3, 4  ;;  %s625_s17 = smov 512   ;;  %s404_s16 = int_to_ptr.hbm [resolvable:$true] %s403_s16 }
  0x1b   :  { %v562_v35 = vld [vmem:[%s897_s0 + $0x18] sm:$0xff]  ;;  %v55_v36 = vld [vmem:[%s899_s2] sm:$0xf]  ;;  %s624_s0 = smov [#allocation2]   ;;  %s626_s18 = smov 32  }
  0x1c   :  { %255 = vmatpush.bf16.msra.mxu0 %v450_v16  ;;  %v854_v37 = vperm.slane %v55_v36, 0  ;;  %v856_v38 = vperm.slane %v55_v36, 1  ;;  %v860_v43 = vperm.slane %v55_v36, 2  ;;  %v862_v44 = vperm.slane %v55_v36, 3  ;;  %s401_s2 = sshll.u32 %s624_s0, 4  ;;  %s402_s2 = int_to_ptr.vmem [resolvable:$true] %s401_s2 }
  0x1d   :  { %284 = vmatpush.bf16.msra.mxu1 %v454_v17  ;;  %313 = vmatpush.bf16.msra.mxu2 %v458_v18 }
  0x1e   :  { %342 = vmatpush.bf16.msra.mxu3 %v462_v22 }
  0x20   :  { %256 = vmatpush.bf16.msra.mxu0 %v434_v28 }
  0x21   :  { %285 = vmatpush.bf16.msra.mxu1 %v438_v29  ;;  %314 = vmatpush.bf16.msra.mxu2 %v442_v30 }
  0x22   :  { %343 = vmatpush.bf16.msra.mxu3 %v446_v31 }
  0x23   :  { %257 = vmatmul.bf16.vlgmr.msra.gmra.mxu0 %v559_v32 }
  0x24   :  { %286 = vmatmul.bf16.vlgmr.msra.gmra.mxu1 %v559_v32  ;;  %315 = vmatmul.bf16.vlgmr.msra.gmra.mxu2 %v559_v32 }
  0x25   :  { %344 = vmatmul.bf16.vlgmr.msra.gmra.mxu3 %v559_v32 }
  0x33   :  { %262 = vmatmul.bf16.gmra.mxu0 %v560_v33 }
  0x34   :  { %291 = vmatmul.bf16.gmra.mxu1 %v560_v33  ;;  %320 = vmatmul.bf16.gmra.mxu2 %v560_v33 }
  0x35   :  { %349 = vmatmul.bf16.gmra.mxu3 %v560_v33 }
  0x43   :  { %267 = vmatmul.bf16.gmra.mxu0 %v561_v34 }
  0x44   :  { %296 = vmatmul.bf16.gmra.mxu1 %v561_v34  ;;  %325 = vmatmul.bf16.gmra.mxu2 %v561_v34 }
  0x45   :  { %354 = vmatmul.bf16.gmra.mxu3 %v561_v34 }
  0x53   :  { %272 = vmatmul.bf16.gmra.mxu0 %v562_v35 }
  0x54   :  { %301 = vmatmul.bf16.gmra.mxu1 %v562_v35  ;;  %330 = vmatmul.bf16.gmra.mxu2 %v562_v35 }
  0x55   :  { %359 = vmatmul.bf16.gmra.mxu3 %v562_v35 }
  0xa0   :  { %v258_v39 = vpop.f32.mrf.mxu0 }
  0xa1   :  { %v259_v40 = vadd.f32 %v258_v39, %v854_v37  ;;  %v287_v41 = vpop.f32.mrf.mxu1 }
  0xa2   :  { %v288_v42 = vadd.f32 %v287_v41, %v856_v38 }
  0xa3   :  { %365 = vst [vmem:[#allocation2] sm:$0xff] %v259_v40 }
  0xa4   :  { %366 = vst [vmem:[#allocation2 + $0x8] sm:$0xff] %v288_v42 }
  0xa7   :  { %v316_v45 = vpop.f32.mrf.mxu2 }
  0xa8   :  { %v317_v46 = vadd.f32 %v316_v45, %v860_v43  ;;  %v345_v47 = vpop.f32.mrf.mxu3  ;;  %v260_v48 = vpop.f32.mrf.mxu0 }
  0xa9   :  { %v346_v49 = vadd.f32 %v345_v47, %v862_v44  ;;  %v261_v50 = vadd.f32 %v260_v48, %v854_v37  ;;  %v289_v51 = vpop.f32.mrf.mxu1 }
  0xaa   :  { %367 = vst [vmem:[#allocation2 + $0x10] sm:$0xff] %v317_v46  ;;  %v290_v52 = vadd.f32 %v289_v51, %v856_v38 }
  0xab   :  { %368 = vst [vmem:[#allocation2 + $0x18] sm:$0xff] %v346_v49 }
  0xac   :  { %369 = vst [vmem:[#allocation2 + $0x20] sm:$0xff] %v261_v50 }
  0xad   :  { %370 = vst [vmem:[#allocation2 + $0x28] sm:$0xff] %v290_v52 }
  0xaf   :  { %v318_v53 = vpop.f32.mrf.mxu2 }
  0xb0   :  { %v319_v54 = vadd.f32 %v318_v53, %v860_v43  ;;  %v347_v55 = vpop.f32.mrf.mxu3  ;;  %v263_v56 = vpop.f32.mrf.mxu0 }
  0xb1   :  { %v348_v57 = vadd.f32 %v347_v55, %v862_v44  ;;  %v264_v58 = vadd.f32 %v263_v56, %v854_v37  ;;  %v292_v59 = vpop.f32.mrf.mxu1 }
  0xb2   :  { %371 = vst [vmem:[#allocation2 + $0x30] sm:$0xff] %v319_v54  ;;  %v293_v60 = vadd.f32 %v292_v59, %v856_v38 }
  0xb3   :  { %372 = vst [vmem:[#allocation2 + $0x38] sm:$0xff] %v348_v57 }
  0xb4   :  { %373 = vst [vmem:[#allocation2 + $0x40] sm:$0xff] %v264_v58 }
  0xb5   :  { %374 = vst [vmem:[#allocation2 + $0x48] sm:$0xff] %v293_v60 }
  0xb7   :  { %v321_v61 = vpop.f32.mrf.mxu2 }
  0xb8   :  { %v322_v62 = vadd.f32 %v321_v61, %v860_v43  ;;  %v350_v63 = vpop.f32.mrf.mxu3  ;;  %v265_v0 = vpop.f32.mrf.mxu0 }
  0xb9   :  { %v351_v1 = vadd.f32 %v350_v63, %v862_v44  ;;  %v266_v2 = vadd.f32 %v265_v0, %v854_v37  ;;  %v294_v3 = vpop.f32.mrf.mxu1 }
  0xba   :  { %375 = vst [vmem:[#allocation2 + $0x50] sm:$0xff] %v322_v62  ;;  %v295_v4 = vadd.f32 %v294_v3, %v856_v38 }
  0xbb   :  { %376 = vst [vmem:[#allocation2 + $0x58] sm:$0xff] %v351_v1 }
  0xbc   :  { %377 = vst [vmem:[#allocation2 + $0x60] sm:$0xff] %v266_v2 }
  0xbd   :  { %378 = vst [vmem:[#allocation2 + $0x68] sm:$0xff] %v295_v4 }
  0xbf   :  { %v323_v5 = vpop.f32.mrf.mxu2 }
  0xc0   :  { %v324_v6 = vadd.f32 %v323_v5, %v860_v43  ;;  %v352_v7 = vpop.f32.mrf.mxu3  ;;  %v268_v8 = vpop.f32.mrf.mxu0 }
  0xc1   :  { %v353_v9 = vadd.f32 %v352_v7, %v862_v44  ;;  %v269_v10 = vadd.f32 %v268_v8, %v854_v37  ;;  %v297_v11 = vpop.f32.mrf.mxu1 }
  0xc2   :  { %379 = vst [vmem:[#allocation2 + $0x70] sm:$0xff] %v324_v6  ;;  %v298_v12 = vadd.f32 %v297_v11, %v856_v38 }
  0xc3   :  { %380 = vst [vmem:[#allocation2 + $0x78] sm:$0xff] %v353_v9 }
  0xc4   :  { %381 = vst [vmem:[#allocation2 + $0x80] sm:$0xff] %v269_v10 }
  0xc5   :  { %382 = vst [vmem:[#allocation2 + $0x88] sm:$0xff] %v298_v12 }
  0xc7   :  { %v326_v13 = vpop.f32.mrf.mxu2 }
  0xc8   :  { %v327_v14 = vadd.f32 %v326_v13, %v860_v43  ;;  %v355_v15 = vpop.f32.mrf.mxu3  ;;  %v270_v16 = vpop.f32.mrf.mxu0 }
  0xc9   :  { %v356_v17 = vadd.f32 %v355_v15, %v862_v44  ;;  %v271_v18 = vadd.f32 %v270_v16, %v854_v37  ;;  %v299_v19 = vpop.f32.mrf.mxu1 }
  0xca   :  { %383 = vst [vmem:[#allocation2 + $0x90] sm:$0xff] %v327_v14  ;;  %v300_v20 = vadd.f32 %v299_v19, %v856_v38 }
  0xcb   :  { %384 = vst [vmem:[#allocation2 + $0x98] sm:$0xff] %v356_v17 }
  0xcc   :  { %385 = vst [vmem:[#allocation2 + $0xa0] sm:$0xff] %v271_v18 }
  0xcd   :  { %386 = vst [vmem:[#allocation2 + $0xa8] sm:$0xff] %v300_v20 }
  0xcf   :  { %v328_v21 = vpop.f32.mrf.mxu2 }
  0xd0   :  { %v329_v22 = vadd.f32 %v328_v21, %v860_v43  ;;  %v357_v23 = vpop.f32.mrf.mxu3  ;;  %v273_v24 = vpop.f32.mrf.mxu0 }
  0xd1   :  { %v358_v25 = vadd.f32 %v357_v23, %v862_v44  ;;  %v274_v26 = vadd.f32 %v273_v24, %v854_v37  ;;  %v302_v27 = vpop.f32.mrf.mxu1 }
  0xd2   :  { %387 = vst [vmem:[#allocation2 + $0xb0] sm:$0xff] %v329_v22  ;;  %v303_v28 = vadd.f32 %v302_v27, %v856_v38 }
  0xd3   :  { %388 = vst [vmem:[#allocation2 + $0xb8] sm:$0xff] %v358_v25 }
  0xd4   :  { %389 = vst [vmem:[#allocation2 + $0xc0] sm:$0xff] %v274_v26 }
  0xd5   :  { %390 = vst [vmem:[#allocation2 + $0xc8] sm:$0xff] %v303_v28 }
  0xd7   :  { %v331_v29 = vpop.f32.mrf.mxu2 }
  0xd8   :  { %v332_v30 = vadd.f32 %v331_v29, %v860_v43  ;;  %v360_v31 = vpop.f32.mrf.mxu3  ;;  %v275_v32 = vpop.f32.mrf.mxu0 }
  0xd9   :  { %v361_v33 = vadd.f32 %v360_v31, %v862_v44  ;;  %v276_v34 = vadd.f32 %v275_v32, %v854_v37  ;;  %v304_v35 = vpop.f32.mrf.mxu1 }
  0xda   :  { %391 = vst [vmem:[#allocation2 + $0xd0] sm:$0xff] %v332_v30  ;;  %v305_v36 = vadd.f32 %v304_v35, %v856_v38 }
  0xdb   :  { %392 = vst [vmem:[#allocation2 + $0xd8] sm:$0xff] %v361_v33 }
  0xdc   :  { %393 = vst [vmem:[#allocation2 + $0xe0] sm:$0xff] %v276_v34 }
  0xdd   :  { %394 = vst [vmem:[#allocation2 + $0xe8] sm:$0xff] %v305_v36 }
  0xdf   :  { %v333_v39 = vpop.f32.mrf.mxu2 }
  0xe0   :  { %v334_v40 = vadd.f32 %v333_v39, %v860_v43  ;;  %v362_v41 = vpop.f32.mrf.mxu3 }
  0xe1   :  { %v363_v37 = vadd.f32 %v362_v41, %v862_v44 }
  0xe2   :  { %395 = vst [vmem:[#allocation2 + $0xf0] sm:$0xff] %v334_v40 }
  0xe3   :  { %396 = vst [vmem:[#allocation2 + $0xf8] sm:$0xff] %v363_v37 }
  0xe4   :  { %409 = dma.vmem_to_hbm [thread:$0]  %s402_s2, 4096, %s404_s16, [#allocation3], %s625_s17, %s625_s17, %s626_s18  }
  0xe5   :  { %622 = dma.done.wait [#allocation3], 4096  }
  0xe6   :  { %623 = vsyncadd [#allocation3], 4294963200 }
  0xe7   :  { %414 = vsyncpa [#allocation3], 1 }

// kernel: unet_forward.22
= control target key start
LH: loop header
LB: loop body
LE: loop exit
PB: predicated region body
PF: predicated region fallthrough
CT: control target
= control target key end

     0   :  { %s900_s12 = smov 0   ;;  %s902_s13 = smov 0   ;;  %s1030_s0 = inlined_call_operand.vmem [shape: bf16[32,128], index: 0, kind: input, shape index: {}]   ;;  %s1031_s1 = inlined_call_operand.vmem [shape: bf16[2,2,128,128], index: 1, kind: input, shape index: {}]   ;;  %s1032_s2 = inlined_call_operand.vmem [shape: f32[1,128], index: 2, kind: input, shape index: {}]   ;;  %s1033_s3 = inlined_call_operand.vmem [shape: bf16[32,256], index: 3, kind: output, shape index: {}]  }
   0x1   :  { %s904_s14 = smov 0   ;;  %s906_s15 = smov 0  }
   0x2   :  { %s908_s16 = smov 0  }
   0x3 LB: > { %s652_s17 = sadd.s32 4294967295, %s878_s16   ;;  %s25_s18 = sadd.s32 1, %s874_s15  ;;  %s878_s16 = sphi %s908_s16, %s13_s16   ;;  %s874_s15 = sphi %s906_s15, %s1044_s15   ;;  %s870_s14 = sphi %s904_s14, %s1043_s14   ;;  %s866_s13 = sphi %s902_s13, %s1042_s13   ;;  %s862_s12 = sphi %s900_s12, %s1041_s12  }
   0x4   : > { %p27_p0 = scmp.ge.s32.totalorder %s25_s18, 2  ;;  %s109_s19 = sadd.s32 1, %s866_s13 }
   0x5   : > { %p119_p1 = scmp.ne.s32.totalorder %s866_s13, %s862_s12  ;;  %p120_p2 = scmp.eq.s32.totalorder %s652_s17, 1 }
   0x6   : > { %s1046_s18 = smov (%p27_p0, %s25_s18), 0  ;;  %p657_p4 = scmp.ge.s32.totalorder %s878_s16, 1 }
   0x7   : > { %p932_p3 = por %p120_p2, %p119_p1  ;;  %s106_s21 = ssub.s32 %s874_s15, %s1046_s18 }
   0x8   : > { %p164_p5 = scmp.lt.s32.totalorder %s878_s16, 3  ;;  %p107_p6 = scmp.eq.s32.totalorder %s106_s21, 0 }
   0xa   : > { %p165_p7 = pnand %p657_p4, %p164_p5 }
   0xb   : > { %s941_s22 = scalar_select %p107_p6, %s866_s13, %s109_s19  }
   0xc   : > { %168 = sbr.rel (%p165_p7) target bundleno = 219 (0xdb), region = 32  ;;  %p193_p8 = scmp.lt.s32.totalorder (!%p165_p7), %s870_s14, 1 }
   0xd   : > { %p408_p9 = scmp.eq.s32.totalorder (!%p165_p7), %s870_s14, 0  ;;  %s190_s8 = sand.u32 (!%p165_p7), 1, %s862_s12  }
   0xe   : > { %s658_s9 = sshll.u32 (!%p165_p7), %s190_s8, 4 }
   0xf   : > { %s192_s10 = scalar_lea.vmem (!%p165_p7), [#allocation2], %s658_s9 }
  0x11   : > { %s194_s23 = scalar_select %p193_p8, %s870_s14, 1  ;;  %v754_v16 = vld [vmem:[%s1030_s0] sm:$0xff]  ;;  %v755_v17 = vld [vmem:[%s1030_s0 + $0x8] sm:$0xff]  ;;  %v321_v18 = vlaneseq }
  0x12   : > { %s409_s5 = scalar_select %p408_p9, 1, 0  ;;  %v839_v48 = vld [vmem:[%s1032_s2] ss:$0 sm:$0xff] }
  0x13   : > { %s753_s24 = sshll.u32 %s194_s23, 7  ;;  %v322_v19 = vshrl.u32 %v321_v18, 7  ;;  %s750_s11 = sshll.u32 (%p932_p3), %s870_s14, 2 }
  0x14   : > { %s948_s27 = scalar_lea.vmem %s1031_s1, %s753_s24  ;;  %v410_v26 = vstv %s409_s5  ;;  %s520_s19 = scalar_lea.vmem (%p932_p3), %s1033_s3, %s750_s11 }
  0x15   : > { %v771_v0 = vld [vmem:[%s948_s27 + $0x78] sm:$0xff]  ;;  %v770_v2 = vld [vmem:[%s948_s27 + $0x70] sm:$0xff]  ;;  %v769_v4 = vld [vmem:[%s948_s27 + $0x68] sm:$0xff]  ;;  %v323_v21 = vadd.s32 8, %v322_v19  ;;  %v324_v23 = vadd.s32 16, %v322_v19  ;;  %vm382_vm0 = vcmp.lt.s32.totalorder %v322_v19, 1 }
  0x16   : > { %v763_v1 = vld [vmem:[%s948_s27 + $0x38] sm:$0xff]  ;;  %302 = vmatpush.bf16.msra.mxu0 %v771_v0  ;;  %783 = vmatpush.bf16.msra.mxu2 %v771_v0  ;;  %v762_v3 = vld [vmem:[%s948_s27 + $0x30] sm:$0xff]  ;;  %v761_v5 = vld [vmem:[%s948_s27 + $0x28] sm:$0xff]  ;;  %vm399_vm1 = vcmp.lt.s32.totalorder %v322_v19, 7  ;;  %v325_v30 = vadd.s32 24, %v322_v19  ;;  %vm977_vm3 = vcmp.eq.s32.totalorder %v410_v26, 1 }
  0x17   : > { %791 = vmatpush.bf16.msra.mxu3 %v763_v1  ;;  %464 = vmatpush.bf16.msra.mxu1 %v763_v1  ;;  %v768_v6 = vld [vmem:[%s948_s27 + $0x60] sm:$0xff]  ;;  %v767_v8 = vld [vmem:[%s948_s27 + $0x58] sm:$0xff]  ;;  %v766_v10 = vld [vmem:[%s948_s27 + $0x50] sm:$0xff]  ;;  %v337_v24 = vand.u32 15, %v323_v21  ;;  %v344_v28 = vand.u32 15, %v324_v23  ;;  %v330_v40 = vand.u32 15, %v322_v19 }
  0x18   : > { %v760_v7 = vld [vmem:[%s948_s27 + $0x20] sm:$0xff]  ;;  %v759_v9 = vld [vmem:[%s948_s27 + $0x18] sm:$0xff]  ;;  %v758_v11 = vld [vmem:[%s948_s27 + $0x10] sm:$0xff]  ;;  %v351_v42 = vand.u32 15, %v325_v30 }
  0x19   : > { %v765_v12 = vld [vmem:[%s948_s27 + $0x48] sm:$0xff]  ;;  %v764_v14 = vld [vmem:[%s948_s27 + $0x40] sm:$0xff]  ;;  %vm973_vm2 = vcmp.eq.s32.totalorder %v337_v24, 15  ;;  %vm985_vm4 = vcmp.eq.s32.totalorder %v344_v28, 0  ;;  %vm374_vm5 = vcmp.eq.s32.totalorder %v330_v40, 0 }
  0x1a   : > { %303 = vmatpush.bf16.msra.mxu0 %v770_v2  ;;  %784 = vmatpush.bf16.msra.mxu2 %v770_v2  ;;  %v757_v13 = vld [vmem:[%s948_s27 + $0x8] sm:$0xff]  ;;  %v756_v15 = vld [vmem:[%s948_s27] sm:$0xff]  ;;  %vm394_vm6 = vcmp.eq.s32.totalorder %v351_v42, 15 }
  0x1b   : > { %792 = vmatpush.bf16.msra.mxu3 %v762_v3  ;;  %465 = vmatpush.bf16.msra.mxu1 %v762_v3 }
  0x1e   : > { %304 = vmatpush.bf16.msra.mxu0 %v769_v4  ;;  %785 = vmatpush.bf16.msra.mxu2 %v769_v4 }
  0x1f   : > { %793 = vmatpush.bf16.msra.mxu3 %v761_v5  ;;  %466 = vmatpush.bf16.msra.mxu1 %v761_v5 }
  0x22   : > { %305 = vmatpush.bf16.msra.mxu0 %v768_v6  ;;  %786 = vmatpush.bf16.msra.mxu2 %v768_v6 }
  0x23   : > { %794 = vmatpush.bf16.msra.mxu3 %v760_v7  ;;  %467 = vmatpush.bf16.msra.mxu1 %v760_v7 }
  0x26   : > { %306 = vmatpush.bf16.msra.mxu0 %v767_v8  ;;  %787 = vmatpush.bf16.msra.mxu2 %v767_v8 }
  0x27   : > { %795 = vmatpush.bf16.msra.mxu3 %v759_v9  ;;  %468 = vmatpush.bf16.msra.mxu1 %v759_v9 }
  0x2a   : > { %307 = vmatpush.bf16.msra.mxu0 %v766_v10  ;;  %788 = vmatpush.bf16.msra.mxu2 %v766_v10 }
  0x2b   : > { %796 = vmatpush.bf16.msra.mxu3 %v758_v11  ;;  %469 = vmatpush.bf16.msra.mxu1 %v758_v11 }
  0x2e   : > { %308 = vmatpush.bf16.msra.mxu0 %v765_v12  ;;  %789 = vmatpush.bf16.msra.mxu2 %v765_v12 }
  0x2f   : > { %797 = vmatpush.bf16.msra.mxu3 %v757_v13  ;;  %470 = vmatpush.bf16.msra.mxu1 %v757_v13 }
  0x32   : > { %309 = vmatpush.bf16.msra.mxu0 %v764_v14  ;;  %790 = vmatpush.bf16.msra.mxu2 %v764_v14 }
  0x33   : > { %798 = vmatpush.bf16.msra.mxu3 %v756_v15  ;;  %471 = vmatpush.bf16.msra.mxu1 %v756_v15 }
  0x35   : > { %310 = vmatmul.bf16.vlgmr.msra.gmra.mxu0 %v754_v16  ;;  %315 = vmatmul.bf16.vlgmr.msra.gmra.mxu2 %v755_v17 }
  0x36   : > { %477 = vmatmul.bf16.vlgmr.msra.gmra.mxu3 %v755_v17  ;;  %472 = vmatmul.bf16.vlgmr.msra.gmra.mxu1 %v754_v16 }
  0xb2   : > { %v311_v20 = vpop.f32.mrf.mxu0 }
  0xb3   : > { %v473_v22 = vpop.f32.mrf.mxu1  ;;  %v378_v31 = vrot.slane %v311_v20, 7  ;;  %v395_v50 = vrot.slane %v311_v20, 1 }
  0xb8   : > { %v316_v25 = vpop.f32.mrf.mxu2 }
  0xb9   : > { %v397_v32 = vrot.slane %v316_v25, 1  ;;  %v478_v35 = vpop.f32.mrf.mxu3  ;;  %v380_v37 = vrot.slane %v316_v25, 7 }
  0xba   : > { %v313_v27 = vpop.f32.mrf.mxu0 }
  0xbb   : > { %v379_v33 = vrot.slane %v313_v27, 7  ;;  %v396_v34 = vrot.slane %v313_v27, 1  ;;  %v475_v46 = vpop.f32.mrf.mxu1 }
  0xbd   : > { %v385_v38 = vsel %vm382_vm0, %v378_v31, %v379_v33  ;;  %v401_v39 = vsel %vm399_vm1, %v396_v34, %v397_v32  ;;  %v384_v44 = vsel %vm382_vm0, %v379_v33, %v380_v37  ;;  %v402_v58 = vsel %vm399_vm1, %v395_v50, %v396_v34 }
  0xbe   : > { %v405_v41 = vsel %vm973_vm2, 0.0, %v401_v39  ;;  %v389_v53 = vsel %vm985_vm4, 0.0, %v384_v44 }
  0xbf   : > { %v413_v45 = vsel %vm977_vm3, %v385_v38, %v405_v41 }
  0xc0   : > { %v476_v47 = vadd.f32 %v475_v46, %v413_v45  ;;  %v318_v49 = vpop.f32.mrf.mxu2 }
  0xc1   : > { %v381_v51 = vrot.slane %v318_v49, 7  ;;  %v398_v52 = vrot.slane %v318_v49, 1  ;;  %v480_v3 = vpop.f32.mrf.mxu3 }
  0xc2   : > { %v488_v59 = vadd.f32 %v839_v48, %v476_v47 }
  0xc3   : > { %v386_v54 = vsel %vm382_vm0, %v381_v51, %v378_v31  ;;  %v400_v55 = vsel %vm399_vm1, %v397_v32, %v398_v52  ;;  %v383_v56 = vsel %vm382_vm0, %v380_v37, %v381_v51  ;;  %v403_v57 = vsel %vm399_vm1, %v398_v52, %v395_v50 }
  0xc4   : > { %v387_v60 = vsel %vm374_vm5, 0.0, %v386_v54  ;;  %v414_v61 = vsel %vm977_vm3, %v389_v53, %v400_v55  ;;  %v407_v0 = vsel %vm394_vm6, 0.0, %v403_v57  ;;  %v496_v6 = vmul.f32 0.2, %v488_v59 }
  0xc5   : > { %v412_v62 = vsel %vm977_vm3, %v387_v60, %v402_v58  ;;  %v479_v63 = vadd.f32 %v478_v35, %v414_v61  ;;  %v415_v2 = vsel %vm977_vm3, %v383_v56, %v407_v0  ;;  %vm492_vm7 = vcmp.ge.f32.partialorder %v488_v59, 0.0 }
  0xc6   : > { %v474_v1 = vadd.f32 %v473_v22, %v412_v62  ;;  %v481_v5 = vadd.f32 %v480_v3, %v415_v2  ;;  %v500_v13 = vsel %vm492_vm7, %v488_v59, %v496_v6 }
  0xc7   : > { %v489_v4 = vadd.f32 %v839_v48, %v479_v63 }
  0xc8   : > { %v487_v7 = vadd.f32 %v839_v48, %v474_v1  ;;  %v490_v8 = vadd.f32 %v839_v48, %v481_v5 }
  0xc9   : > { %vm493_vm8 = vcmp.ge.f32.partialorder %v489_v4, 0.0  ;;  %v497_v9 = vmul.f32 0.2, %v489_v4 }
  0xca   : > { %vm491_vm9 = vcmp.ge.f32.partialorder %v487_v7, 0.0  ;;  %v495_v10 = vmul.f32 0.2, %v487_v7  ;;  %vm494_vm10 = vcmp.ge.f32.partialorder %v490_v8, 0.0  ;;  %v498_v11 = vmul.f32 0.2, %v490_v8 }
  0xcb   : > { %v501_v12 = vsel %vm493_vm8, %v489_v4, %v497_v9 }
  0xcc   : > { %v499_v14 = vsel %vm491_vm9, %v487_v7, %v495_v10  ;;  %v502_v15 = vsel %vm494_vm10, %v490_v8, %v498_v11  ;;  %517 = sbr.rel (!%p932_p3) target bundleno = 219 (0xdb), region = 36 }
  0xcd   : > { %v775_v16 = vpack.c.bf16 %v500_v13, %v499_v14  ;;  %v780_v17 = vpack.c.bf16 %v502_v15, %v501_v12 }
  0xcf   : > { %776 = vst [vmem:[%s192_s10] sm:$0xff] %v775_v16  }
  0xd0   : > { %782 = vst [vmem:[%s192_s10 + $0x8] sm:$0xff] %v780_v17  }
  0xd6   : > { %v537_v18 = vld [vmem:[%s192_s10] sm:$0xf]  ;;  %v539_v19 = vld [vmem:[%s192_s10 + $0x4] sm:$0xf] }
  0xd7   : > { %v541_v20 = vld [vmem:[%s192_s10 + $0x8] sm:$0xf]  ;;  %538 = vst [vmem:[%s520_s19] sm:$0xf] %v537_v18  ;;  %v543_v21 = vld [vmem:[%s192_s10 + $0xc] sm:$0xf] }
  0xd8   : > { %540 = vst [vmem:[%s520_s19 + $0x8] sm:$0xf] %v539_v19 }
  0xd9   : > { %542 = vst [vmem:[%s520_s19 + $0x10] sm:$0xf] %v541_v20 }
  0xda   : > { %544 = vst [vmem:[%s520_s19 + $0x18] sm:$0xf] %v543_v21 }
  0xdb PF: > { %s13_s16 = sadd.s32 1, %s878_s16   ;;  %s1041_s12 = smov %s866_s13 }
  0xdc   : > { %p10_p10 = scmp.ge.s32.totalorder %s13_s16, 4   ;;  %s1042_s13 = smov %s941_s22 }
  0xdd   : > { %s1043_s14 = smov %s874_s15  ;;  %s1044_s15 = smov %s1046_s18 }
  0xde   :  { %12 = sbr.rel (!%p10_p10) target bundleno = 3 (0x3), region = 107 }

</bundles_post_ra>
